<compile_context>
chip_gen: v7x
topology: tpu7x:2x2x1
jax: 0.10.0
libtpu: 0.0.40
codegen_flags: <defaults>
</compile_context>

<pallas_src>
import jax
import jax.numpy as jnp
from jax.experimental import pallas as pl
from jax.experimental.pallas import tpu as pltpu


# -----------------------------------------------------------------------------
# Forward wrapper + fused kernel
# -----------------------------------------------------------------------------
def sspsa_forward(x, params):
    """x: (bs, Cin, H, W, B)  ->  (bs, C, H, W, Bout), Bout = (B-7)//2 + 1."""
    bs, Cin, H, W, B = x.shape
    C = params["bn_scale"].shape[0]
    Cb = C // 3
    Ch = params["se_w1"].shape[0]
    Bout = (B - 7) // 2 + 1
    N = H * W * Bout                     # flattened (h, w, band) -> lane axis
    CP = ((C + 7) // 8) * 8              # channel rows per band block (8-aligned)
    KB = 7 * CP                          # branch-conv contraction depth per tap
    PAD = 128                            # lane-aligned zero halo for shifted loads
    NE = PAD + N + PAD
    K1 = 63 * Cin                        # bottle-conv contraction depth
    taps9 = [(dh, dw) for dh in (-1, 0, 1) for dw in (-1, 0, 1)]
    f32 = jnp.float32

    # ------------------ wrapper-side operand preparation (cheap XLA glue) ----
    # im2col patch for the bottle conv, rows ordered (kh, kw, kb, cin).
    xp = jnp.pad(x, ((0, 0), (0, 0), (1, 1), (1, 1), (0, 0)))
    cols = []
    for kh in range(3):
        for kw in range(3):
            for kb in range(7):
                cols.append(xp[:, :, kh:kh + H, kw:kw + W, kb:kb + 2 * Bout:2])
    p1 = jnp.stack(cols, axis=1).reshape(bs, K1, N).astype(f32)

    # bottle weights with the BN scale folded in, flattened to (C, 63*Cin).
    w_b = params["w_bottle"] * params["bn_scale"][None, None, None, None, :]
    w_bottle_mat = jnp.transpose(w_b, (4, 0, 1, 2, 3)).reshape(C, K1)
    bn_bias = params["bn_bias"].reshape(C, 1)

    # c1 (1,1,7) / c2 (3,3,1) zero-embedded into one (3,3,7) kernel so a single
    # pass over the band-im2col buffer produces [out1 | out2 | out3].
    w1e = jnp.zeros((3, 3, 7, C, Cb), f32).at[1, 1].set(params["w_c1"][0, 0])
    w2e = jnp.zeros((3, 3, 7, C, Cb), f32).at[:, :, 3].set(params["w_c2"][:, :, 0])
    wcat = jnp.concatenate([w1e, w2e, params["w_c3"]], axis=-1)   # (3,3,7,C,C)
    wt = jnp.transpose(wcat, (0, 1, 4, 2, 3)).reshape(9, C, 7, C)  # (tap,o,kb,ci)
    w_sp = jnp.zeros((9, C, 7, CP), f32).at[..., :C].set(wt).reshape(9, C, KB)

    # SE weights (shared module) as block-diagonal matrices over the 3 branches.
    w1b = jnp.zeros((3 * Ch, C), f32)
    w2b = jnp.zeros((C, 3 * Ch), f32)
    for j in range(3):
        w1b = w1b.at[j * Ch:(j + 1) * Ch, j * Cb:(j + 1) * Cb].set(params["se_w1"])
        w2b = w2b.at[j * Cb:(j + 1) * Cb, j * Ch:(j + 1) * Ch].set(params["se_w2"])
    b1b = jnp.tile(params["se_b1"].reshape(Ch, 1), (3, 1))
    b2b = jnp.tile(params["se_b2"].reshape(Cb, 1), (3, 1))
    # softmax denominator: sums the 3 branch rows sharing the same in-branch idx
    asum = (jnp.arange(C)[:, None] % Cb == jnp.arange(C)[None, :] % Cb).astype(f32)

    # validity masks implementing the zero padding of the branch convolutions.
    nn_ = jnp.arange(N)
    b_c = nn_ % Bout
    w_c = (nn_ // Bout) % W
    h_c = nn_ // (W * Bout)
    band_mask = jnp.stack(
        [((b_c + kb - 3 >= 0) & (b_c + kb - 3 < Bout)) for kb in range(7)],
        axis=0).astype(f32)                                        # (7, N)
    sp_mask = jnp.stack(
        [((h_c + dh >= 0) & (h_c + dh < H) & (w_c + dw >= 0) & (w_c + dw < W))
         for dh, dw in taps9],
        axis=0).astype(f32)                                        # (9, N)

    # ------------------------------ fused kernel -----------------------------
    def kernel(p1_ref, bmask_ref, smask_ref, wb_ref, bias_ref, wsp_ref,
               w1b_ref, b1b_ref, w2b_ref, b2b_ref, asum_ref,
               o_ref, x1e_ref, xbe_ref):
        # ---- bottle conv: one K=63*Cin matmul, folded BN + ReLU -------------
        x1 = jnp.dot(wb_ref[...], p1_ref[0], preferred_element_type=jnp.float32)
        x1 = jnp.maximum(x1 + bias_ref[...], 0.0)                  # (C, N)

        # ---- stage x1 into a zero-haloed flat buffer (no HBM round trip) ----
        x1e_ref[...] = jnp.zeros_like(x1e_ref)
        x1e_ref[:, PAD:PAD + N] = x1

        # ---- band im2col (7 blocks of CP rows) into VMEM scratch ------------
        xbe_ref[...] = jnp.zeros_like(xbe_ref)
        for kb in range(7):
            db = kb - 3
            piece = x1e_ref[:, PAD + db:PAD + db + N] * bmask_ref[kb:kb + 1, :]
            xbe_ref[kb * CP:kb * CP + C, PAD:PAD + N] = piece

        # ---- branch convs: 9 spatial taps, each a K=7*CP matmul -------------
        feats = jnp.zeros((C, N), jnp.float32)
        for t, (dh, dw) in enumerate(taps9):
            ds = dh * W * Bout + dw * Bout
            op = xbe_ref[:, PAD + ds:PAD + ds + N] * smask_ref[t:t + 1, :]
            feats = feats + jnp.dot(wsp_ref[t], op,
                                    preferred_element_type=jnp.float32)

        # ---- SE (block-diag over branches) + branch softmax -----------------
        mean = jnp.sum(feats, axis=1, keepdims=True) * (1.0 / N)   # (C, 1)
        h1 = jnp.dot(w1b_ref[...], mean, preferred_element_type=jnp.float32)
        h1 = jnp.maximum(h1 + b1b_ref[...], 0.0)                   # (3Ch, 1)
        lg = jnp.dot(w2b_ref[...], h1, preferred_element_type=jnp.float32)
        sig = jax.nn.sigmoid(lg + b2b_ref[...])                    # (C, 1)
        e = jnp.exp(sig)                                           # in (1, e)
        denom = jnp.dot(asum_ref[...], e, preferred_element_type=jnp.float32)
        attn = e * pl.reciprocal(denom, approx=True)               # (C, 1)

        # ---- reweight + residual, single lane-dense store -------------------
        x1r = x1e_ref[:, PAD:PAD + N]
        o_ref[0] = (feats * attn + x1r).astype(o_ref.dtype)

    out = pl.pallas_call(
        kernel,
        out_shape=jax.ShapeDtypeStruct((bs, C, N), f32),
        grid=(bs,),
        in_specs=[
            pl.BlockSpec((1, K1, N), lambda b: (b, 0, 0)),        # im2col patch
            pl.BlockSpec((7, N), lambda b: (0, 0)),               # band masks
            pl.BlockSpec((9, N), lambda b: (0, 0)),               # spatial masks
            pl.BlockSpec((C, K1), lambda b: (0, 0)),              # bottle weights
            pl.BlockSpec((C, 1), lambda b: (0, 0)),               # BN bias
            pl.BlockSpec((9, C, KB), lambda b: (0, 0, 0)),        # branch weights
            pl.BlockSpec((3 * Ch, C), lambda b: (0, 0)),          # SE fc1 (blockdiag)
            pl.BlockSpec((3 * Ch, 1), lambda b: (0, 0)),          # SE b1
            pl.BlockSpec((C, 3 * Ch), lambda b: (0, 0)),          # SE fc2 (blockdiag)
            pl.BlockSpec((C, 1), lambda b: (0, 0)),               # SE b2
            pl.BlockSpec((C, C), lambda b: (0, 0)),               # softmax-sum matrix
        ],
        out_specs=pl.BlockSpec((1, C, N), lambda b: (b, 0, 0)),
        scratch_shapes=[
            pltpu.VMEM((C, NE), f32),    # zero-haloed x1
            pltpu.VMEM((KB, NE), f32),   # zero-haloed band-im2col buffer
        ],
        compiler_params=pltpu.CompilerParams(
            dimension_semantics=("parallel",)),
    )(p1, band_mask, sp_mask, w_bottle_mat, bn_bias, w_sp,
      w1b, b1b, w2b, b2b, asum)

    return out.reshape(bs, C, H, W, Bout)


# -----------------------------------------------------------------------------
# Deterministic parameter init (shapes follow the PyTorch __init__)
# -----------------------------------------------------------------------------
def init_params(key, input_channels, output_channels, reduction=2):
    C = output_channels
    Cb = C // 3
    Ch = max(Cb // reduction, 1)
    ks = jax.random.split(key, 12)

    def conv_w(k, kh, kw, kb, cin, cout):
        fan_in = cin * kh * kw * kb
        return jax.random.normal(k, (kh, kw, kb, cin, cout),
                                 jnp.float32) / jnp.sqrt(float(fan_in))

    w_bottle = conv_w(ks[0], 3, 3, 7, input_channels, C)
    w_c1 = conv_w(ks[1], 1, 1, 7, C, Cb)
    w_c2 = conv_w(ks[2], 3, 3, 1, C, Cb)
    w_c3 = conv_w(ks[3], 3, 3, 7, C, Cb)

    # BatchNorm3d (eval mode), eps = 1e-3, folded to scale/bias.
    gamma = 1.0 + 0.05 * jax.random.normal(ks[4], (C,), jnp.float32)
    beta = 0.05 * jax.random.normal(ks[5], (C,), jnp.float32)
    run_mean = 0.1 * jax.random.normal(ks[6], (C,), jnp.float32)
    run_var = 1.0 + 0.1 * jnp.abs(jax.random.normal(ks[7], (C,), jnp.float32))
    scale = gamma / jnp.sqrt(run_var + 1e-3)
    bias = beta - run_mean * scale

    # SE_3D(C // 3): avgpool -> fc(Cb->Ch) -> relu -> fc(Ch->Cb) -> sigmoid.
    se_w1 = jax.random.normal(ks[8], (Ch, Cb), jnp.float32) / jnp.sqrt(float(Cb))
    se_b1 = 0.05 * jax.random.normal(ks[9], (Ch,), jnp.float32)
    se_w2 = jax.random.normal(ks[10], (Cb, Ch), jnp.float32) / jnp.sqrt(float(Ch))
    se_b2 = 0.05 * jax.random.normal(ks[11], (Cb,), jnp.float32)

    return dict(w_bottle=w_bottle, w_c1=w_c1, w_c2=w_c2, w_c3=w_c3,
                bn_scale=scale, bn_bias=bias,
                se_w1=se_w1, se_b1=se_b1, se_w2=se_w2, se_b2=se_b2)


# -----------------------------------------------------------------------------
# Pure-JAX reference (for correctness check only)
# -----------------------------------------------------------------------------
def sspsa_reference(x, params):
    bs, Cin, H, W, B = x.shape
    C = params["bn_scale"].shape[0]
    Cb = C // 3
    hp = jax.lax.Precision.HIGHEST

    def conv(inp, w, strides, padding):
        wt = jnp.transpose(w, (4, 3, 0, 1, 2))                   # OIDHW
        return jax.lax.conv_general_dilated(
            inp, wt, window_strides=strides, padding=padding,
            dimension_numbers=("NCDHW", "OIDHW", "NCDHW"), precision=hp)

    y = conv(x, params["w_bottle"], (1, 1, 2), ((1, 1), (1, 1), (0, 0)))
    x1 = jnp.maximum(y * params["bn_scale"].reshape(1, C, 1, 1, 1)
                     + params["bn_bias"].reshape(1, C, 1, 1, 1), 0.0)

    o1 = conv(x1, params["w_c1"], (1, 1, 1), ((0, 0), (0, 0), (3, 3)))
    o2 = conv(x1, params["w_c2"], (1, 1, 1), ((1, 1), (1, 1), (0, 0)))
    o3 = conv(x1, params["w_c3"], (1, 1, 1), ((1, 1), (1, 1), (3, 3)))
    feats = jnp.concatenate([o1, o2, o3], axis=1)

    sigs = []
    for j in range(3):
        m = jnp.mean(feats[:, j * Cb:(j + 1) * Cb], axis=(2, 3, 4))   # (bs, Cb)
        h1 = jnp.maximum(m @ params["se_w1"].T + params["se_b1"], 0.0)
        sigs.append(jax.nn.sigmoid(h1 @ params["se_w2"].T + params["se_b2"]))
    attn = jax.nn.softmax(jnp.stack(sigs, axis=1), axis=1)            # (bs,3,Cb)
    attn = attn.reshape(bs, C, 1, 1, 1)
    return feats * attn + x1


# -----------------------------------------------------------------------------
if __name__ == "__main__":
    key = jax.random.PRNGKey(0)
    bs, Cin, Cout = 2, 4, 12            # output_channels divisible by sc=3
    H = W = 8
    B = 16                              # spectral bands
    kx, kp = jax.random.split(key)

    x = jax.random.normal(kx, (bs, Cin, H, W, B), jnp.float32)
    params = init_params(kp, Cin, Cout)

    fwd = jax.jit(lambda xx: sspsa_forward(xx, params))
    out = jax.block_until_ready(fwd(x))

    Bout = (B - 7) // 2 + 1
    assert out.shape == (bs, Cout, H, W, Bout), out.shape

    ref = sspsa_reference(x, params)
    err = float(jnp.max(jnp.abs(out - ref)))
    assert err < 2e-2, f"max abs error vs reference: {err}"

    print("KERNEL_OK")
</pallas_src>

<mosaic_0001>
module attributes {stable_mosaic.version = 11 : i64} {
  func.func @kernel(%arg0: i32, %arg1: memref<1x252x320xf32, #tpu.memory_space<vmem>>, %arg2: memref<7x320xf32, #tpu.memory_space<vmem>>, %arg3: memref<9x320xf32, #tpu.memory_space<vmem>>, %arg4: memref<12x252xf32, #tpu.memory_space<vmem>>, %arg5: memref<12x1xf32, #tpu.memory_space<vmem>>, %arg6: memref<9x12x112xf32, #tpu.memory_space<vmem>>, %arg7: memref<6x12xf32, #tpu.memory_space<vmem>>, %arg8: memref<6x1xf32, #tpu.memory_space<vmem>>, %arg9: memref<12x6xf32, #tpu.memory_space<vmem>>, %arg10: memref<12x1xf32, #tpu.memory_space<vmem>>, %arg11: memref<12x12xf32, #tpu.memory_space<vmem>>, %arg12: memref<1x12x320xf32, #tpu.memory_space<vmem>>, %arg13: memref<12x576xf32, #tpu.memory_space<vmem>>, %arg14: memref<112x576xf32, #tpu.memory_space<vmem>>) attributes {dimension_semantics = [#tpu.dimension_semantics<parallel>], iteration_bounds = array<i64: 2>, scalar_prefetch = 0 : i64, scratch_operands = 2 : i64, tpu.core_type = #tpu.core_type<tc>, window_params = [{transform_indices = @transform_0, window_bounds = array<i64: 1, 252, 320>}, {pipeline_mode = #tpu.pipeline_mode<synchronous>, transform_indices = @transform_1, window_bounds = array<i64: 7, 320>}, {pipeline_mode = #tpu.pipeline_mode<synchronous>, transform_indices = @transform_2, window_bounds = array<i64: 9, 320>}, {pipeline_mode = #tpu.pipeline_mode<synchronous>, transform_indices = @transform_3, window_bounds = array<i64: 12, 252>}, {pipeline_mode = #tpu.pipeline_mode<synchronous>, transform_indices = @transform_4, window_bounds = array<i64: 12, 1>}, {pipeline_mode = #tpu.pipeline_mode<synchronous>, transform_indices = @transform_5, window_bounds = array<i64: 9, 12, 112>}, {pipeline_mode = #tpu.pipeline_mode<synchronous>, transform_indices = @transform_6, window_bounds = array<i64: 6, 12>}, {pipeline_mode = #tpu.pipeline_mode<synchronous>, transform_indices = @transform_7, window_bounds = array<i64: 6, 1>}, {pipeline_mode = #tpu.pipeline_mode<synchronous>, transform_indices = @transform_8, window_bounds = array<i64: 12, 6>}, {pipeline_mode = #tpu.pipeline_mode<synchronous>, transform_indices = @transform_9, window_bounds = array<i64: 12, 1>}, {pipeline_mode = #tpu.pipeline_mode<synchronous>, transform_indices = @transform_10, window_bounds = array<i64: 12, 12>}, {transform_indices = @transform_11, window_bounds = array<i64: 1, 12, 320>}]} {
    %c0 = arith.constant 0 : index
    %c0_0 = arith.constant 0 : index
    %0 = vector.load %arg4[%c0, %c0_0] : memref<12x252xf32, #tpu.memory_space<vmem>>, vector<12x252xf32>
    %c0_1 = arith.constant 0 : index
    %c0_2 = arith.constant 0 : index
    %c0_3 = arith.constant 0 : index
    %1 = vector.load %arg1[%c0_1, %c0_2, %c0_3] : memref<1x252x320xf32, #tpu.memory_space<vmem>>, vector<1x252x320xf32>
    %2 = vector.shape_cast %1 : vector<1x252x320xf32> to vector<252x320xf32>
    %cst = arith.constant dense<0.000000e+00> : vector<12x320xf32>
    %3 = tpu.matmul %0, %2, %cst {dimension_numbers = #tpu.dot_dimension_numbers<[1], [0], [0], [1], [0, 0, 1, 1], [], []>} : vector<12x252xf32>, vector<252x320xf32>, vector<12x320xf32> -> vector<12x320xf32>
    %c0_4 = arith.constant 0 : index
    %c0_5 = arith.constant 0 : index
    %4 = vector.load %arg5[%c0_4, %c0_5] : memref<12x1xf32, #tpu.memory_space<vmem>>, vector<12x1xf32>
    %5 = vector.broadcast %4 : vector<12x1xf32> to vector<12x320xf32>
    %6 = arith.addf %3, %5 : vector<12x320xf32>
    %cst_6 = arith.constant 0.000000e+00 : f32
    %7 = vector.broadcast %cst_6 : f32 to vector<12x320xf32>
    %8 = arith.maximumf %6, %7 : vector<12x320xf32>
    %cst_7 = arith.constant 0.000000e+00 : f32
    %9 = vector.broadcast %cst_7 : f32 to vector<12x576xf32>
    %c0_8 = arith.constant 0 : index
    %c0_9 = arith.constant 0 : index
    %10 = vector.load %arg13[%c0_8, %c0_9] : memref<12x576xf32, #tpu.memory_space<vmem>>, vector<12x576xf32>
    tpu.vector_store %arg13[%c0_8, %c0_9], %9 {strides = array<i32>} : memref<12x576xf32, #tpu.memory_space<vmem>>, vector<12x576xf32>,
    %c0_10 = arith.constant 0 : index
    %c128 = arith.constant 128 : index
    %11 = vector.load %arg13[%c0_10, %c128] : memref<12x576xf32, #tpu.memory_space<vmem>>, vector<12x320xf32>
    tpu.vector_store %arg13[%c0_10, %c128], %8 {strides = array<i32>} : memref<12x576xf32, #tpu.memory_space<vmem>>, vector<12x320xf32>,
    %cst_11 = arith.constant 0.000000e+00 : f32
    %12 = vector.broadcast %cst_11 : f32 to vector<112x576xf32>
    %c0_12 = arith.constant 0 : index
    %c0_13 = arith.constant 0 : index
    %13 = vector.load %arg14[%c0_12, %c0_13] : memref<112x576xf32, #tpu.memory_space<vmem>>, vector<112x576xf32>
    tpu.vector_store %arg14[%c0_12, %c0_13], %12 {strides = array<i32>} : memref<112x576xf32, #tpu.memory_space<vmem>>, vector<112x576xf32>,
    %c0_14 = arith.constant 0 : index
    %c125 = arith.constant 125 : index
    %14 = vector.load %arg13[%c0_14, %c125] : memref<12x576xf32, #tpu.memory_space<vmem>>, vector<12x320xf32>
    %c0_15 = arith.constant 0 : index
    %c0_16 = arith.constant 0 : index
    %15 = vector.load %arg2[%c0_15, %c0_16] : memref<7x320xf32, #tpu.memory_space<vmem>>, vector<1x320xf32>
    %16 = vector.broadcast %15 : vector<1x320xf32> to vector<12x320xf32>
    %17 = arith.mulf %14, %16 : vector<12x320xf32>
    %c0_17 = arith.constant 0 : index
    %c128_18 = arith.constant 128 : index
    %18 = vector.load %arg14[%c0_17, %c128_18] : memref<112x576xf32, #tpu.memory_space<vmem>>, vector<12x320xf32>
    tpu.vector_store %arg14[%c0_17, %c128_18], %17 {strides = array<i32>} : memref<112x576xf32, #tpu.memory_space<vmem>>, vector<12x320xf32>,
    %c0_19 = arith.constant 0 : index
    %c126 = arith.constant 126 : index
    %19 = vector.load %arg13[%c0_19, %c126] : memref<12x576xf32, #tpu.memory_space<vmem>>, vector<12x320xf32>
    %c1 = arith.constant 1 : index
    %c0_20 = arith.constant 0 : index
    %20 = vector.load %arg2[%c1, %c0_20] : memref<7x320xf32, #tpu.memory_space<vmem>>, vector<1x320xf32>
    %21 = vector.broadcast %20 : vector<1x320xf32> to vector<12x320xf32>
    %22 = arith.mulf %19, %21 : vector<12x320xf32>
    %c16 = arith.constant 16 : index
    %c128_21 = arith.constant 128 : index
    %23 = vector.load %arg14[%c16, %c128_21] : memref<112x576xf32, #tpu.memory_space<vmem>>, vector<12x320xf32>
    tpu.vector_store %arg14[%c16, %c128_21], %22 {strides = array<i32>} : memref<112x576xf32, #tpu.memory_space<vmem>>, vector<12x320xf32>,
    %c0_22 = arith.constant 0 : index
    %c127 = arith.constant 127 : index
    %24 = vector.load %arg13[%c0_22, %c127] : memref<12x576xf32, #tpu.memory_space<vmem>>, vector<12x320xf32>
    %c2 = arith.constant 2 : index
    %c0_23 = arith.constant 0 : index
    %25 = vector.load %arg2[%c2, %c0_23] : memref<7x320xf32, #tpu.memory_space<vmem>>, vector<1x320xf32>
    %26 = vector.broadcast %25 : vector<1x320xf32> to vector<12x320xf32>
    %27 = arith.mulf %24, %26 : vector<12x320xf32>
    %c32 = arith.constant 32 : index
    %c128_24 = arith.constant 128 : index
    %28 = vector.load %arg14[%c32, %c128_24] : memref<112x576xf32, #tpu.memory_space<vmem>>, vector<12x320xf32>
    tpu.vector_store %arg14[%c32, %c128_24], %27 {strides = array<i32>} : memref<112x576xf32, #tpu.memory_space<vmem>>, vector<12x320xf32>,
    %c0_25 = arith.constant 0 : index
    %c128_26 = arith.constant 128 : index
    %29 = vector.load %arg13[%c0_25, %c128_26] : memref<12x576xf32, #tpu.memory_space<vmem>>, vector<12x320xf32>
    %c3 = arith.constant 3 : index
    %c0_27 = arith.constant 0 : index
    %30 = vector.load %arg2[%c3, %c0_27] : memref<7x320xf32, #tpu.memory_space<vmem>>, vector<1x320xf32>
    %31 = vector.broadcast %30 : vector<1x320xf32> to vector<12x320xf32>
    %32 = arith.mulf %29, %31 : vector<12x320xf32>
    %c48 = arith.constant 48 : index
    %c128_28 = arith.constant 128 : index
    %33 = vector.load %arg14[%c48, %c128_28] : memref<112x576xf32, #tpu.memory_space<vmem>>, vector<12x320xf32>
    tpu.vector_store %arg14[%c48, %c128_28], %32 {strides = array<i32>} : memref<112x576xf32, #tpu.memory_space<vmem>>, vector<12x320xf32>,
    %c0_29 = arith.constant 0 : index
    %c129 = arith.constant 129 : index
    %34 = vector.load %arg13[%c0_29, %c129] : memref<12x576xf32, #tpu.memory_space<vmem>>, vector<12x320xf32>
    %c4 = arith.constant 4 : index
    %c0_30 = arith.constant 0 : index
    %35 = vector.load %arg2[%c4, %c0_30] : memref<7x320xf32, #tpu.memory_space<vmem>>, vector<1x320xf32>
    %36 = vector.broadcast %35 : vector<1x320xf32> to vector<12x320xf32>
    %37 = arith.mulf %34, %36 : vector<12x320xf32>
    %c64 = arith.constant 64 : index
    %c128_31 = arith.constant 128 : index
    %38 = vector.load %arg14[%c64, %c128_31] : memref<112x576xf32, #tpu.memory_space<vmem>>, vector<12x320xf32>
    tpu.vector_store %arg14[%c64, %c128_31], %37 {strides = array<i32>} : memref<112x576xf32, #tpu.memory_space<vmem>>, vector<12x320xf32>,
    %c0_32 = arith.constant 0 : index
    %c130 = arith.constant 130 : index
    %39 = vector.load %arg13[%c0_32, %c130] : memref<12x576xf32, #tpu.memory_space<vmem>>, vector<12x320xf32>
    %c5 = arith.constant 5 : index
    %c0_33 = arith.constant 0 : index
    %40 = vector.load %arg2[%c5, %c0_33] : memref<7x320xf32, #tpu.memory_space<vmem>>, vector<1x320xf32>
    %41 = vector.broadcast %40 : vector<1x320xf32> to vector<12x320xf32>
    %42 = arith.mulf %39, %41 : vector<12x320xf32>
    %c80 = arith.constant 80 : index
    %c128_34 = arith.constant 128 : index
    %43 = vector.load %arg14[%c80, %c128_34] : memref<112x576xf32, #tpu.memory_space<vmem>>, vector<12x320xf32>
    tpu.vector_store %arg14[%c80, %c128_34], %42 {strides = array<i32>} : memref<112x576xf32, #tpu.memory_space<vmem>>, vector<12x320xf32>,
    %c0_35 = arith.constant 0 : index
    %c131 = arith.constant 131 : index
    %44 = vector.load %arg13[%c0_35, %c131] : memref<12x576xf32, #tpu.memory_space<vmem>>, vector<12x320xf32>
    %c6 = arith.constant 6 : index
    %c0_36 = arith.constant 0 : index
    %45 = vector.load %arg2[%c6, %c0_36] : memref<7x320xf32, #tpu.memory_space<vmem>>, vector<1x320xf32>
    %46 = vector.broadcast %45 : vector<1x320xf32> to vector<12x320xf32>
    %47 = arith.mulf %44, %46 : vector<12x320xf32>
    %c96 = arith.constant 96 : index
    %c128_37 = arith.constant 128 : index
    %48 = vector.load %arg14[%c96, %c128_37] : memref<112x576xf32, #tpu.memory_space<vmem>>, vector<12x320xf32>
    tpu.vector_store %arg14[%c96, %c128_37], %47 {strides = array<i32>} : memref<112x576xf32, #tpu.memory_space<vmem>>, vector<12x320xf32>,
    %cst_38 = arith.constant 0.000000e+00 : f32
    %49 = vector.broadcast %cst_38 : f32 to vector<12x320xf32>
    %c0_39 = arith.constant 0 : index
    %c83 = arith.constant 83 : index
    %50 = vector.load %arg14[%c0_39, %c83] : memref<112x576xf32, #tpu.memory_space<vmem>>, vector<112x320xf32>
    %c0_40 = arith.constant 0 : index
    %c0_41 = arith.constant 0 : index
    %51 = vector.load %arg3[%c0_40, %c0_41] : memref<9x320xf32, #tpu.memory_space<vmem>>, vector<1x320xf32>
    %52 = vector.broadcast %51 : vector<1x320xf32> to vector<112x320xf32>
    %53 = arith.mulf %50, %52 : vector<112x320xf32>
    %c0_42 = arith.constant 0 : index
    %c0_43 = arith.constant 0 : index
    %c0_44 = arith.constant 0 : index
    %54 = vector.load %arg6[%c0_42, %c0_43, %c0_44] : memref<9x12x112xf32, #tpu.memory_space<vmem>>, vector<1x12x112xf32>
    %55 = vector.shape_cast %54 : vector<1x12x112xf32> to vector<12x112xf32>
    %cst_45 = arith.constant dense<0.000000e+00> : vector<12x320xf32>
    %56 = tpu.matmul %55, %53, %cst_45 {dimension_numbers = #tpu.dot_dimension_numbers<[1], [0], [0], [1], [0, 0, 1, 1], [], []>} : vector<12x112xf32>, vector<112x320xf32>, vector<12x320xf32> -> vector<12x320xf32>
    %57 = arith.addf %49, %56 : vector<12x320xf32>
    %c0_46 = arith.constant 0 : index
    %c88 = arith.constant 88 : index
    %58 = vector.load %arg14[%c0_46, %c88] : memref<112x576xf32, #tpu.memory_space<vmem>>, vector<112x320xf32>
    %c1_47 = arith.constant 1 : index
    %c0_48 = arith.constant 0 : index
    %59 = vector.load %arg3[%c1_47, %c0_48] : memref<9x320xf32, #tpu.memory_space<vmem>>, vector<1x320xf32>
    %60 = vector.broadcast %59 : vector<1x320xf32> to vector<112x320xf32>
    %61 = arith.mulf %58, %60 : vector<112x320xf32>
    %c1_49 = arith.constant 1 : index
    %c0_50 = arith.constant 0 : index
    %c0_51 = arith.constant 0 : index
    %62 = vector.load %arg6[%c1_49, %c0_50, %c0_51] : memref<9x12x112xf32, #tpu.memory_space<vmem>>, vector<1x12x112xf32>
    %63 = vector.shape_cast %62 : vector<1x12x112xf32> to vector<12x112xf32>
    %cst_52 = arith.constant dense<0.000000e+00> : vector<12x320xf32>
    %64 = tpu.matmul %63, %61, %cst_52 {dimension_numbers = #tpu.dot_dimension_numbers<[1], [0], [0], [1], [0, 0, 1, 1], [], []>} : vector<12x112xf32>, vector<112x320xf32>, vector<12x320xf32> -> vector<12x320xf32>
    %65 = arith.addf %57, %64 : vector<12x320xf32>
    %c0_53 = arith.constant 0 : index
    %c93 = arith.constant 93 : index
    %66 = vector.load %arg14[%c0_53, %c93] : memref<112x576xf32, #tpu.memory_space<vmem>>, vector<112x320xf32>
    %c2_54 = arith.constant 2 : index
    %c0_55 = arith.constant 0 : index
    %67 = vector.load %arg3[%c2_54, %c0_55] : memref<9x320xf32, #tpu.memory_space<vmem>>, vector<1x320xf32>
    %68 = vector.broadcast %67 : vector<1x320xf32> to vector<112x320xf32>
    %69 = arith.mulf %66, %68 : vector<112x320xf32>
    %c2_56 = arith.constant 2 : index
    %c0_57 = arith.constant 0 : index
    %c0_58 = arith.constant 0 : index
    %70 = vector.load %arg6[%c2_56, %c0_57, %c0_58] : memref<9x12x112xf32, #tpu.memory_space<vmem>>, vector<1x12x112xf32>
    %71 = vector.shape_cast %70 : vector<1x12x112xf32> to vector<12x112xf32>
    %cst_59 = arith.constant dense<0.000000e+00> : vector<12x320xf32>
    %72 = tpu.matmul %71, %69, %cst_59 {dimension_numbers = #tpu.dot_dimension_numbers<[1], [0], [0], [1], [0, 0, 1, 1], [], []>} : vector<12x112xf32>, vector<112x320xf32>, vector<12x320xf32> -> vector<12x320xf32>
    %73 = arith.addf %65, %72 : vector<12x320xf32>
    %c0_60 = arith.constant 0 : index
    %c123 = arith.constant 123 : index
    %74 = vector.load %arg14[%c0_60, %c123] : memref<112x576xf32, #tpu.memory_space<vmem>>, vector<112x320xf32>
    %c3_61 = arith.constant 3 : index
    %c0_62 = arith.constant 0 : index
    %75 = vector.load %arg3[%c3_61, %c0_62] : memref<9x320xf32, #tpu.memory_space<vmem>>, vector<1x320xf32>
    %76 = vector.broadcast %75 : vector<1x320xf32> to vector<112x320xf32>
    %77 = arith.mulf %74, %76 : vector<112x320xf32>
    %c3_63 = arith.constant 3 : index
    %c0_64 = arith.constant 0 : index
    %c0_65 = arith.constant 0 : index
    %78 = vector.load %arg6[%c3_63, %c0_64, %c0_65] : memref<9x12x112xf32, #tpu.memory_space<vmem>>, vector<1x12x112xf32>
    %79 = vector.shape_cast %78 : vector<1x12x112xf32> to vector<12x112xf32>
    %cst_66 = arith.constant dense<0.000000e+00> : vector<12x320xf32>
    %80 = tpu.matmul %79, %77, %cst_66 {dimension_numbers = #tpu.dot_dimension_numbers<[1], [0], [0], [1], [0, 0, 1, 1], [], []>} : vector<12x112xf32>, vector<112x320xf32>, vector<12x320xf32> -> vector<12x320xf32>
    %81 = arith.addf %73, %80 : vector<12x320xf32>
    %c0_67 = arith.constant 0 : index
    %c128_68 = arith.constant 128 : index
    %82 = vector.load %arg14[%c0_67, %c128_68] : memref<112x576xf32, #tpu.memory_space<vmem>>, vector<112x320xf32>
    %c4_69 = arith.constant 4 : index
    %c0_70 = arith.constant 0 : index
    %83 = vector.load %arg3[%c4_69, %c0_70] : memref<9x320xf32, #tpu.memory_space<vmem>>, vector<1x320xf32>
    %84 = vector.broadcast %83 : vector<1x320xf32> to vector<112x320xf32>
    %85 = arith.mulf %82, %84 : vector<112x320xf32>
    %c4_71 = arith.constant 4 : index
    %c0_72 = arith.constant 0 : index
    %c0_73 = arith.constant 0 : index
    %86 = vector.load %arg6[%c4_71, %c0_72, %c0_73] : memref<9x12x112xf32, #tpu.memory_space<vmem>>, vector<1x12x112xf32>
    %87 = vector.shape_cast %86 : vector<1x12x112xf32> to vector<12x112xf32>
    %cst_74 = arith.constant dense<0.000000e+00> : vector<12x320xf32>
    %88 = tpu.matmul %87, %85, %cst_74 {dimension_numbers = #tpu.dot_dimension_numbers<[1], [0], [0], [1], [0, 0, 1, 1], [], []>} : vector<12x112xf32>, vector<112x320xf32>, vector<12x320xf32> -> vector<12x320xf32>
    %89 = arith.addf %81, %88 : vector<12x320xf32>
    %c0_75 = arith.constant 0 : index
    %c133 = arith.constant 133 : index
    %90 = vector.load %arg14[%c0_75, %c133] : memref<112x576xf32, #tpu.memory_space<vmem>>, vector<112x320xf32>
    %c5_76 = arith.constant 5 : index
    %c0_77 = arith.constant 0 : index
    %91 = vector.load %arg3[%c5_76, %c0_77] : memref<9x320xf32, #tpu.memory_space<vmem>>, vector<1x320xf32>
    %92 = vector.broadcast %91 : vector<1x320xf32> to vector<112x320xf32>
    %93 = arith.mulf %90, %92 : vector<112x320xf32>
    %c5_78 = arith.constant 5 : index
    %c0_79 = arith.constant 0 : index
    %c0_80 = arith.constant 0 : index
    %94 = vector.load %arg6[%c5_78, %c0_79, %c0_80] : memref<9x12x112xf32, #tpu.memory_space<vmem>>, vector<1x12x112xf32>
    %95 = vector.shape_cast %94 : vector<1x12x112xf32> to vector<12x112xf32>
    %cst_81 = arith.constant dense<0.000000e+00> : vector<12x320xf32>
    %96 = tpu.matmul %95, %93, %cst_81 {dimension_numbers = #tpu.dot_dimension_numbers<[1], [0], [0], [1], [0, 0, 1, 1], [], []>} : vector<12x112xf32>, vector<112x320xf32>, vector<12x320xf32> -> vector<12x320xf32>
    %97 = arith.addf %89, %96 : vector<12x320xf32>
    %c0_82 = arith.constant 0 : index
    %c163 = arith.constant 163 : index
    %98 = vector.load %arg14[%c0_82, %c163] : memref<112x576xf32, #tpu.memory_space<vmem>>, vector<112x320xf32>
    %c6_83 = arith.constant 6 : index
    %c0_84 = arith.constant 0 : index
    %99 = vector.load %arg3[%c6_83, %c0_84] : memref<9x320xf32, #tpu.memory_space<vmem>>, vector<1x320xf32>
    %100 = vector.broadcast %99 : vector<1x320xf32> to vector<112x320xf32>
    %101 = arith.mulf %98, %100 : vector<112x320xf32>
    %c6_85 = arith.constant 6 : index
    %c0_86 = arith.constant 0 : index
    %c0_87 = arith.constant 0 : index
    %102 = vector.load %arg6[%c6_85, %c0_86, %c0_87] : memref<9x12x112xf32, #tpu.memory_space<vmem>>, vector<1x12x112xf32>
    %103 = vector.shape_cast %102 : vector<1x12x112xf32> to vector<12x112xf32>
    %cst_88 = arith.constant dense<0.000000e+00> : vector<12x320xf32>
    %104 = tpu.matmul %103, %101, %cst_88 {dimension_numbers = #tpu.dot_dimension_numbers<[1], [0], [0], [1], [0, 0, 1, 1], [], []>} : vector<12x112xf32>, vector<112x320xf32>, vector<12x320xf32> -> vector<12x320xf32>
    %105 = arith.addf %97, %104 : vector<12x320xf32>
    %c0_89 = arith.constant 0 : index
    %c168 = arith.constant 168 : index
    %106 = vector.load %arg14[%c0_89, %c168] : memref<112x576xf32, #tpu.memory_space<vmem>>, vector<112x320xf32>
    %c7 = arith.constant 7 : index
    %c0_90 = arith.constant 0 : index
    %107 = vector.load %arg3[%c7, %c0_90] : memref<9x320xf32, #tpu.memory_space<vmem>>, vector<1x320xf32>
    %108 = vector.broadcast %107 : vector<1x320xf32> to vector<112x320xf32>
    %109 = arith.mulf %106, %108 : vector<112x320xf32>
    %c7_91 = arith.constant 7 : index
    %c0_92 = arith.constant 0 : index
    %c0_93 = arith.constant 0 : index
    %110 = vector.load %arg6[%c7_91, %c0_92, %c0_93] : memref<9x12x112xf32, #tpu.memory_space<vmem>>, vector<1x12x112xf32>
    %111 = vector.shape_cast %110 : vector<1x12x112xf32> to vector<12x112xf32>
    %cst_94 = arith.constant dense<0.000000e+00> : vector<12x320xf32>
    %112 = tpu.matmul %111, %109, %cst_94 {dimension_numbers = #tpu.dot_dimension_numbers<[1], [0], [0], [1], [0, 0, 1, 1], [], []>} : vector<12x112xf32>, vector<112x320xf32>, vector<12x320xf32> -> vector<12x320xf32>
    %113 = arith.addf %105, %112 : vector<12x320xf32>
    %c0_95 = arith.constant 0 : index
    %c173 = arith.constant 173 : index
    %114 = vector.load %arg14[%c0_95, %c173] : memref<112x576xf32, #tpu.memory_space<vmem>>, vector<112x320xf32>
    %c8 = arith.constant 8 : index
    %c0_96 = arith.constant 0 : index
    %115 = vector.load %arg3[%c8, %c0_96] : memref<9x320xf32, #tpu.memory_space<vmem>>, vector<1x320xf32>
    %116 = vector.broadcast %115 : vector<1x320xf32> to vector<112x320xf32>
    %117 = arith.mulf %114, %116 : vector<112x320xf32>
    %c8_97 = arith.constant 8 : index
    %c0_98 = arith.constant 0 : index
    %c0_99 = arith.constant 0 : index
    %118 = vector.load %arg6[%c8_97, %c0_98, %c0_99] : memref<9x12x112xf32, #tpu.memory_space<vmem>>, vector<1x12x112xf32>
    %119 = vector.shape_cast %118 : vector<1x12x112xf32> to vector<12x112xf32>
    %cst_100 = arith.constant dense<0.000000e+00> : vector<12x320xf32>
    %120 = tpu.matmul %119, %117, %cst_100 {dimension_numbers = #tpu.dot_dimension_numbers<[1], [0], [0], [1], [0, 0, 1, 1], [], []>} : vector<12x112xf32>, vector<112x320xf32>, vector<12x320xf32> -> vector<12x320xf32>
    %121 = arith.addf %113, %120 : vector<12x320xf32>
    %cst_101 = arith.constant dense<0.000000e+00> : vector<12xf32>
    %122 = vector.multi_reduction <add>, %121, %cst_101 [1] : vector<12x320xf32> to vector<12xf32>
    %123 = vector.shape_cast %122 : vector<12xf32> to vector<12x1xf32>
    %cst_102 = arith.constant 3.125000e-03 : f32
    %124 = vector.broadcast %cst_102 : f32 to vector<12x1xf32>
    %125 = arith.mulf %123, %124 : vector<12x1xf32>
    %c0_103 = arith.constant 0 : index
    %c0_104 = arith.constant 0 : index
    %126 = vector.load %arg7[%c0_103, %c0_104] : memref<6x12xf32, #tpu.memory_space<vmem>>, vector<6x12xf32>
    %cst_105 = arith.constant dense<0.000000e+00> : vector<6x1xf32>
    %127 = tpu.matmul %126, %125, %cst_105 {dimension_numbers = #tpu.dot_dimension_numbers<[1], [0], [0], [1], [0, 0, 1, 1], [], []>} : vector<6x12xf32>, vector<12x1xf32>, vector<6x1xf32> -> vector<6x1xf32>
    %c0_106 = arith.constant 0 : index
    %c0_107 = arith.constant 0 : index
    %128 = vector.load %arg8[%c0_106, %c0_107] : memref<6x1xf32, #tpu.memory_space<vmem>>, vector<6x1xf32>
    %129 = arith.addf %127, %128 : vector<6x1xf32>
    %cst_108 = arith.constant 0.000000e+00 : f32
    %130 = vector.broadcast %cst_108 : f32 to vector<6x1xf32>
    %131 = arith.maximumf %129, %130 : vector<6x1xf32>
    %c0_109 = arith.constant 0 : index
    %c0_110 = arith.constant 0 : index
    %132 = vector.load %arg9[%c0_109, %c0_110] : memref<12x6xf32, #tpu.memory_space<vmem>>, vector<12x6xf32>
    %cst_111 = arith.constant dense<0.000000e+00> : vector<12x1xf32>
    %133 = tpu.matmul %132, %131, %cst_111 {dimension_numbers = #tpu.dot_dimension_numbers<[1], [0], [0], [1], [0, 0, 1, 1], [], []>} : vector<12x6xf32>, vector<6x1xf32>, vector<12x1xf32> -> vector<12x1xf32>
    %c0_112 = arith.constant 0 : index
    %c0_113 = arith.constant 0 : index
    %134 = vector.load %arg10[%c0_112, %c0_113] : memref<12x1xf32, #tpu.memory_space<vmem>>, vector<12x1xf32>
    %135 = arith.addf %133, %134 : vector<12x1xf32>
    %136 = arith.negf %135 : vector<12x1xf32>
    %137 = math.exp %136 : vector<12x1xf32>
    %cst_114 = arith.constant 1.000000e+00 : f32
    %138 = vector.broadcast %cst_114 : f32 to vector<12x1xf32>
    %139 = arith.addf %138, %137 : vector<12x1xf32>
    %140 = arith.divf %138, %139 : vector<12x1xf32>
    %141 = math.exp %140 : vector<12x1xf32>
    %c0_115 = arith.constant 0 : index
    %c0_116 = arith.constant 0 : index
    %142 = vector.load %arg11[%c0_115, %c0_116] : memref<12x12xf32, #tpu.memory_space<vmem>>, vector<12x12xf32>
    %cst_117 = arith.constant dense<0.000000e+00> : vector<12x1xf32>
    %143 = tpu.matmul %142, %141, %cst_117 {dimension_numbers = #tpu.dot_dimension_numbers<[1], [0], [0], [1], [0, 0, 1, 1], [], []>} : vector<12x12xf32>, vector<12x1xf32>, vector<12x1xf32> -> vector<12x1xf32>
    %144 = tpu.reciprocal %143 {approx = true} : vector<12x1xf32> -> vector<12x1xf32>
    %145 = arith.mulf %141, %144 : vector<12x1xf32>
    %c0_118 = arith.constant 0 : index
    %c128_119 = arith.constant 128 : index
    %146 = vector.load %arg13[%c0_118, %c128_119] : memref<12x576xf32, #tpu.memory_space<vmem>>, vector<12x320xf32>
    %147 = vector.broadcast %145 : vector<12x1xf32> to vector<12x320xf32>
    %148 = arith.mulf %121, %147 : vector<12x320xf32>
    %149 = arith.addf %148, %146 : vector<12x320xf32>
    %c0_120 = arith.constant 0 : index
    %c0_121 = arith.constant 0 : index
    %c0_122 = arith.constant 0 : index
    %150 = vector.load %arg12[%c0_120, %c0_121, %c0_122] : memref<1x12x320xf32, #tpu.memory_space<vmem>>, vector<1x12x320xf32>
    %151 = vector.shape_cast %150 : vector<1x12x320xf32> to vector<12x320xf32>
    %152 = vector.shape_cast %149 : vector<12x320xf32> to vector<1x12x320xf32>
    tpu.vector_store %arg12[%c0_120, %c0_121, %c0_122], %152 {strides = array<i32>} : memref<1x12x320xf32, #tpu.memory_space<vmem>>, vector<1x12x320xf32>,
    return
  }
  func.func @transform_0(%arg0: i32) -> (i32, i32, i32) {
    %c0_i32 = arith.constant 0 : i32
    %c0_i32_0 = arith.constant 0 : i32
    %c0_i32_1 = arith.constant 0 : i32
    return %arg0, %c0_i32, %c0_i32_0 : i32, i32, i32
  }
  func.func @transform_1(%arg0: i32) -> (i32, i32) {
    %c0_i32 = arith.constant 0 : i32
    %c0_i32_0 = arith.constant 0 : i32
    %c0_i32_1 = arith.constant 0 : i32
    return %c0_i32, %c0_i32_0 : i32, i32
  }
  func.func @transform_2(%arg0: i32) -> (i32, i32) {
    %c0_i32 = arith.constant 0 : i32
    %c0_i32_0 = arith.constant 0 : i32
    %c0_i32_1 = arith.constant 0 : i32
    return %c0_i32, %c0_i32_0 : i32, i32
  }
  func.func @transform_3(%arg0: i32) -> (i32, i32) {
    %c0_i32 = arith.constant 0 : i32
    %c0_i32_0 = arith.constant 0 : i32
    %c0_i32_1 = arith.constant 0 : i32
    return %c0_i32, %c0_i32_0 : i32, i32
  }
  func.func @transform_4(%arg0: i32) -> (i32, i32) {
    %c0_i32 = arith.constant 0 : i32
    %c0_i32_0 = arith.constant 0 : i32
    %c0_i32_1 = arith.constant 0 : i32
    return %c0_i32, %c0_i32_0 : i32, i32
  }
  func.func @transform_5(%arg0: i32) -> (i32, i32, i32) {
    %c0_i32 = arith.constant 0 : i32
    %c0_i32_0 = arith.constant 0 : i32
    %c0_i32_1 = arith.constant 0 : i32
    %c0_i32_2 = arith.constant 0 : i32
    return %c0_i32, %c0_i32_0, %c0_i32_1 : i32, i32, i32
  }
  func.func @transform_6(%arg0: i32) -> (i32, i32) {
    %c0_i32 = arith.constant 0 : i32
    %c0_i32_0 = arith.constant 0 : i32
    %c0_i32_1 = arith.constant 0 : i32
    return %c0_i32, %c0_i32_0 : i32, i32
  }
  func.func @transform_7(%arg0: i32) -> (i32, i32) {
    %c0_i32 = arith.constant 0 : i32
    %c0_i32_0 = arith.constant 0 : i32
    %c0_i32_1 = arith.constant 0 : i32
    return %c0_i32, %c0_i32_0 : i32, i32
  }
  func.func @transform_8(%arg0: i32) -> (i32, i32) {
    %c0_i32 = arith.constant 0 : i32
    %c0_i32_0 = arith.constant 0 : i32
    %c0_i32_1 = arith.constant 0 : i32
    return %c0_i32, %c0_i32_0 : i32, i32
  }
  func.func @transform_9(%arg0: i32) -> (i32, i32) {
    %c0_i32 = arith.constant 0 : i32
    %c0_i32_0 = arith.constant 0 : i32
    %c0_i32_1 = arith.constant 0 : i32
    return %c0_i32, %c0_i32_0 : i32, i32
  }
  func.func @transform_10(%arg0: i32) -> (i32, i32) {
    %c0_i32 = arith.constant 0 : i32
    %c0_i32_0 = arith.constant 0 : i32
    %c0_i32_1 = arith.constant 0 : i32
    return %c0_i32, %c0_i32_0 : i32, i32
  }
  func.func @transform_11(%arg0: i32) -> (i32, i32, i32) {
    %c0_i32 = arith.constant 0 : i32
    %c0_i32_0 = arith.constant 0 : i32
    %c0_i32_1 = arith.constant 0 : i32
    return %arg0, %c0_i32, %c0_i32_0 : i32, i32, i32
  }
}

</mosaic_0001>

<bundles_post_ra>
// kernel: _lambda_.1
= control target key start
LH: loop header
LB: loop body
LE: loop exit
PB: predicated region body
PF: predicated region fallthrough
CT: control target
= control target key end

     0   :  { %s8099_s17 = smov 0   ;;  %s12142_s0 = inlined_call_operand.vmem [shape: f32[2,252,320], index: 0, kind: input, shape index: {}]   ;;  %s12143_s1 = inlined_call_operand.vmem [shape: f32[7,320], index: 1, kind: input, shape index: {}]   ;;  %s12144_s2 = inlined_call_operand.vmem [shape: f32[9,320], index: 2, kind: input, shape index: {}]   ;;  %s12145_s3 = inlined_call_operand.vmem [shape: f32[12,252], index: 3, kind: input, shape index: {}]   ;;  %s12146_s4 = inlined_call_operand.vmem [shape: f32[12,1], index: 4, kind: input, shape index: {}]   ;;  %s12147_s5 = inlined_call_operand.vmem [shape: f32[9,12,112], index: 5, kind: input, shape index: {}]   ;;  %s12148_s6 = inlined_call_operand.vmem [shape: f32[6,12], index: 6, kind: input, shape index: {}]   ;;  %s12149_s7 = inlined_call_operand.vmem [shape: f32[6,1], index: 7, kind: input, shape index: {}]   ;;  %s12150_s8 = inlined_call_operand.vmem [shape: f32[12,6], index: 8, kind: input, shape index: {}]   ;;  %s12151_s9 = inlined_call_operand.vmem [shape: f32[12,1], index: 9, kind: input, shape index: {}]   ;;  %s12152_s10 = inlined_call_operand.vmem [shape: f32[12,12], index: 10, kind: input, shape index: {}]   ;;  %s12153_s11 = inlined_call_operand.vmem [shape: f32[2,12,320], index: 11, kind: output, shape index: {}]  }
   0x1 LB: > { %s5663_s18 = sadd.s32 4294967295, %s8018_s17   ;;  %p5667_p0 = scmp.ge.s32.totalorder %s8018_s17, 1  ;;  %s8018_s17 = sphi %s8099_s17, %s21_s17  }
   0x2   : > { %p337_p1 = scmp.lt.s32.totalorder %s8018_s17, 3 }
   0x4   : > { %p338_p2 = pnand %p5667_p0, %p337_p1 }
   0x6   : > { %341 = sbr.rel (%p338_p2) target bundleno = 2226 (0x8b2), region = 64 }
   0xd   : > { %p377_p3 = scmp.lt.s32.totalorder %s5663_s18, 1  ;;  %v8110_v0 = vld [vmem:[%s12145_s3 + $0x8] sm:$0xff]  ;;  %vm499_vm0 = vcmask 1014784   ;;  %v772_v1 = vlaneseq  ;;  %v8020_v2 = vmov 0   ;;  %v487_v3 = vld [vmem:[%s12146_s4] sm:$0xff]  ;;  %s8021_s14 = smov 125  }
   0xe   : > { %5672 = vmatprep.mubr.msk.f32.mxu0 %vm499_vm0, %v8110_v0  ;;  %6935 = vset.pattern.permute.xlu0 %v8020_v2  ;;  %v8122_v5 = vld [vmem:[%s12143_s1] ss:$8 sm:$0x7]  ;;  %v8147_v14 = vld [vmem:[%s12143_s1 + $0x1] ss:$8 sm:$0x7] }
   0xf   : > { %s12982_s18 = smov (!%p377_p3, %s5663_s18), 1  ;;  %v773_v4 = vshrl.u32 %v772_v1, 7  ;;  %7916 = vset.pattern.permute.xlu1 %v8020_v2  ;;  %491 = vperm.xlu0 %6935, %v487_v3   ;;  %v488_v6 = vld [vmem:[%s12146_s4 + $0x8] sm:$0xf]  ;;  %v8022_v27 = vmov 0.0   ;;  %s8023_s19 = smov 126  }
  0x10   : > { %s6906_s25 = smul.u32 768, %s12982_s18  ;;  %680 = vst [vmem:[#allocation2 + $0x28] sm:$0xf] %v8022_v27  ;;  %674 = vst [vmem:[#allocation2] sm:$0xff] %v8022_v27  ;;  %s8024_s20 = smov 127   ;;  %vm506_vm1 = vcmask 1043456  }
  0x11   : > { %v8128_v7 = vsub.s32 0, %v773_v4  ;;  %v8130_v8 = vsub.s32 1, %v773_v4  ;;  %v8132_v9 = vsub.s32 2, %v773_v4  ;;  %677 = vst [vmem:[#allocation2 + $0x18] sm:$0xff] %v8022_v27  ;;  %681 = vst [vmem:[#allocation2 + $0x30] sm:$0xf] %v8022_v27 }
  0x12   : > { %s8137_s30 = scalar_lea.vmem %s12142_s0, %s6906_s25  ;;  %682 = vst [vmem:[#allocation2 + $0x38] sm:$0xf] %v8022_v27  ;;  %683 = vst [vmem:[#allocation2 + $0x40] sm:$0xf] %v8022_v27  ;;  %s8025_s23 = smov 1   ;;  %vm8031_vm2 = vmmov 1  }
  0x13   : > { %12411 = vst [vmem:[#allocation4_spill] sm:$0xff] %v8128_v7  ;;  %12412 = vst [vmem:[#allocation5_spill] sm:$0xff] %v8132_v9  ;;  %v775_v10 = vrot.slane %v8122_v5, %v8128_v7  ;;  %v392_v11 = vld [vmem:[%s8137_s30 + $0x8] sm:$0xff]  ;;  %v395_v12 = vld [vmem:[%s8137_s30 + $0x20] sm:$0xff]  ;;  %496 = vperm.xlu0 %6935, %v488_v6   ;;  %v783_v15 = vrot.slane %v8122_v5, %v8132_v9  ;;  %v779_v20 = vrot.slane %v8122_v5, %v8130_v8  ;;  %s8026_s28 = smov 2   ;;  %s8027_s29 = smov 3  }
  0x14   : > { %v391_v13 = vld [vmem:[%s8137_s30] sm:$0xff]  ;;  %v6245_v16 = vpack.c.bf16 %v395_v12, %v392_v11  ;;  %v394_v17 = vld [vmem:[%s8137_s30 + $0x18] sm:$0xff]  ;;  %v401_v19 = vld [vmem:[%s8137_s30 + $0x50] sm:$0xff]  ;;  %695 = vst [vmem:[#allocation3 + $0x18] sm:$0xff] %v8022_v27  ;;  %v866_v29 = vrot.slane %v8147_v14, %v8130_v8  ;;  %v862_v33 = vrot.slane %v8147_v14, %v8128_v7  ;;  %v870_v42 = vrot.slane %v8147_v14, %v8132_v9  ;;  %s8028_s21 = smov 123   ;;  %s8029_s25 = smov 5  }
  0x15   : > { %v398_v18 = vld [vmem:[%s8137_s30 + $0x38] sm:$0xff]  ;;  %784 = vrot.lane.b32.xlu1 %v775_v10, %s8021_s14  ;;  %v6247_v21 = vpack.c.bf16 %v394_v17, %v391_v13  ;;  %v397_v23 = vld [vmem:[%s8137_s30 + $0x30] sm:$0xff]  ;;  %v400_v24 = vld [vmem:[%s8137_s30 + $0x48] sm:$0xff]  ;;  %698 = vst [vmem:[#allocation3 + $0x30] sm:$0xff] %v8022_v27  ;;  %s8030_s26 = smov 88   ;;  %s8032_s16 = smov 35  }
  0x16   : > { %v6249_v22 = vpack.c.bf16 %v401_v19, %v398_v18  ;;  %v404_v25 = vld [vmem:[%s8137_s30 + $0x68] sm:$0xff]  ;;  %6246 = vmatprep.subr.bf16.mxu0 %v6245_v16  ;;  %v407_v26 = vld [vmem:[%s8137_s30 + $0x80] sm:$0xff]  ;;  %699 = vst [vmem:[#allocation3 + $0x38] sm:$0xff] %v8022_v27  ;;  %700 = vst [vmem:[#allocation3 + $0x40] sm:$0xff] %v8022_v27  ;;  %v6251_v28 = vpack.c.bf16 %v400_v24, %v397_v23  ;;  %s8033_s13 = smov 83   ;;  %s8034_s12 = smov 40  }
  0x17   : > { %705 = vst [vmem:[#allocation3 + $0x68] sm:$0xff] %v8022_v27  ;;  %708 = vst [vmem:[#allocation3 + $0x80] sm:$0xff] %v8022_v27  ;;  %6248 = vmatpush1.bf16.msra.mxu0 %v6247_v21  ;;  %788 = vrot.lane.b32.xlu0 %v783_v15, %s8021_s14  ;;  %v6253_v30 = vpack.c.bf16 %v407_v26, %v404_v25  ;;  %v403_v31 = vld [vmem:[%s8137_s30 + $0x60] sm:$0xff]  ;;  %v406_v32 = vld [vmem:[%s8137_s30 + $0x78] sm:$0xff]  ;;  %vm678_vm4 = vcmask 523264   ;;  %vm684_vm5 = vcmask 519168  }
  0x18   : > { %709 = vst [vmem:[#allocation3 + $0x88] sm:$0xff] %v8022_v27  ;;  %710 = vst [vmem:[#allocation3 + $0x90] sm:$0xff] %v8022_v27  ;;  %6250 = vmatprep.subr.bf16.mxu0 %v6249_v22  ;;  %v410_v34 = vld [vmem:[%s8137_s30 + $0x98] sm:$0xff]  ;;  %v413_v35 = vld [vmem:[%s8137_s30 + $0xb0] sm:$0xff]  ;;  %v6255_v37 = vpack.c.bf16 %v406_v32, %v403_v31  ;;  %vm790_vm6 = vcmask 1022976   ;;  %vm877_vm7 = vcmask 1031168  }
  0x19   : > { %715 = vst [vmem:[#allocation3 + $0xb8] sm:$0xff] %v8022_v27  ;;  %718 = vst [vmem:[#allocation3 + $0xd0] sm:$0xff] %v8022_v27  ;;  %786 = vrot.lane.b32.xlu1 %v779_v20, %s8021_s14  ;;  %v5678_v36 = vld [vmem:[%s12143_s1 + $0x2] ss:$8 sm:$0x7]  ;;  %v6257_v39 = vpack.c.bf16 %v413_v35, %v410_v34  ;;  %v418_v49 = vld [vmem:[%s8137_s30 + $0xd8] sm:$0xff] }
  0x1a   : > { %719 = vst [vmem:[#allocation3 + $0xd8] sm:$0xff] %v8022_v27  ;;  %720 = vst [vmem:[#allocation3 + $0xe0] sm:$0xff] %v8022_v27  ;;  %v949_v38 = vrot.slane %v5678_v36, %v8128_v7  ;;  %v409_v40 = vld [vmem:[%s8137_s30 + $0x90] sm:$0xff]  ;;  %v412_v41 = vld [vmem:[%s8137_s30 + $0xa8] sm:$0xff]  ;;  %v957_v46 = vrot.slane %v5678_v36, %v8132_v9  ;;  %v953_v50 = vrot.slane %v5678_v36, %v8130_v8  ;;  %vm964_vm8 = vcmask 1039360  }
  0x1b   : > { %725 = vst [vmem:[#allocation3 + $0x108] sm:$0xff] %v8022_v27  ;;  %728 = vst [vmem:[#allocation3 + $0x120] sm:$0xff] %v8022_v27  ;;  %6252 = vmatpush1.bf16.msra.mxu0 %v6251_v28  ;;  %873 = vrot.lane.b32.xlu0 %v866_v29, %s8023_s19  ;;  %v416_v43 = vld [vmem:[%s8137_s30 + $0xc8] sm:$0xff]  ;;  %v419_v44 = vld [vmem:[%s8137_s30 + $0xe0] sm:$0xff]  ;;  %v6259_v45 = vpack.c.bf16 %v412_v41, %v409_v40  ;;  %vm1003_vm9 = vcmask 7168   ;;  %vm916_vm10 = vcmask 15360  }
  0x1c   : > { %729 = vst [vmem:[#allocation3 + $0x128] sm:$0xff] %v8022_v27  ;;  %730 = vst [vmem:[#allocation3 + $0x130] sm:$0xff] %v8022_v27  ;;  %6254 = vmatprep.subr.bf16.mxu0 %v6253_v30  ;;  %v6261_v47 = vpack.c.bf16 %v419_v44, %v416_v43  ;;  %v415_v48 = vld [vmem:[%s8137_s30 + $0xc0] sm:$0xff]  ;;  %v422_v51 = vld [vmem:[%s8137_s30 + $0xf8] sm:$0xff]  ;;  %vm829_vm11 = vcmask 23552   ;;  %vm1436_vm12 = vcmask 719872  }
  0x1d   : > { %735 = vst [vmem:[#allocation3 + $0x158] sm:$0xff] %v8022_v27  ;;  %738 = vst [vmem:[#allocation3 + $0x170] sm:$0xff] %v8022_v27  ;;  %871 = vrot.lane.b32.xlu1 %v862_v33, %s8023_s19  ;;  %v425_v52 = vld [vmem:[%s8137_s30 + $0x110] sm:$0xff]  ;;  %v6263_v54 = vpack.c.bf16 %v418_v49, %v415_v48  ;;  %v424_v58 = vld [vmem:[%s8137_s30 + $0x108] sm:$0xff]  ;;  %vm2850_vm13 = vcmask 1006592   ;;  %vm3084_vm14 = vcmask 39936  }
  0x1e   : > { %739 = vst [vmem:[#allocation3 + $0x178] sm:$0xff] %v8022_v27  ;;  %740 = vst [vmem:[#allocation3 + $0x180] sm:$0xff] %v8022_v27  ;;  %v5680_v53 = vld [vmem:[%s12143_s1 + $0x4] ss:$8 sm:$0x7]  ;;  %v6265_v56 = vpack.c.bf16 %v425_v52, %v422_v51  ;;  %v430_v2 = vld [vmem:[%s8137_s30 + $0x138] sm:$0xff] }
  0x1f   : > { %745 = vst [vmem:[#allocation3 + $0x1a8] sm:$0xff] %v8022_v27  ;;  %748 = vst [vmem:[#allocation3 + $0x1c0] sm:$0xff] %v8022_v27  ;;  %6256 = vmatpush1.bf16.msra.mxu0 %v6255_v37  ;;  %958 = vrot.lane.b32.xlu0 %v949_v38, %s8024_s20  ;;  %v1074_v55 = vrot.slane %v5680_v53, %v8130_v8  ;;  %v421_v57 = vld [vmem:[%s8137_s30 + $0xf0] sm:$0xff]  ;;  %v1070_v59 = vrot.slane %v5680_v53, %v8128_v7  ;;  %v428_v60 = vld [vmem:[%s8137_s30 + $0x128] sm:$0xff]  ;;  %vm2580_vm15 = vcmask 285696  }
  0x20   : > { %749 = vst [vmem:[#allocation3 + $0x1c8] sm:$0xff] %v8022_v27  ;;  %750 = vst [vmem:[#allocation3 + $0x1d0] sm:$0xff] %v8022_v27  ;;  %6258 = vmatprep.subr.bf16.mxu0 %v6257_v39  ;;  %v431_v61 = vld [vmem:[%s8137_s30 + $0x140] sm:$0xff]  ;;  %v6267_v62 = vpack.c.bf16 %v424_v58, %v421_v57  ;;  %v1078_v3 = vrot.slane %v5680_v53, %v8132_v9  ;;  %v434_v4 = vld [vmem:[%s8137_s30 + $0x158] sm:$0xff] }
  0x21   : > { %755 = vst [vmem:[#allocation3 + $0x1f8] sm:$0xff] %v8022_v27  ;;  %758 = vst [vmem:[#allocation3 + $0x210] sm:$0xff] %v8022_v27  ;;  %875 = vrot.lane.b32.xlu1 %v870_v42, %s8023_s19  ;;  %v6269_v63 = vpack.c.bf16 %v431_v61, %v428_v60  ;;  %v427_v1 = vld [vmem:[%s8137_s30 + $0x120] sm:$0xff]  ;;  %v437_v5 = vld [vmem:[%s8137_s30 + $0x170] sm:$0xff] }
  0x22   : > { %759 = vst [vmem:[#allocation3 + $0x218] sm:$0xff] %v8022_v27  ;;  %760 = vst [vmem:[#allocation3 + $0x220] sm:$0xff] %v8022_v27  ;;  %v6271_v6 = vpack.c.bf16 %v430_v2, %v427_v1  ;;  %v6273_v10 = vpack.c.bf16 %v437_v5, %v434_v4  ;;  %v433_v11 = vld [vmem:[%s8137_s30 + $0x150] sm:$0xff]  ;;  %v436_v12 = vld [vmem:[%s8137_s30 + $0x168] sm:$0xff] }
  0x23   : > { %6260 = vmatpush1.bf16.msra.mxu0 %v6259_v45  ;;  %962 = vrot.lane.b32.xlu0 %v957_v46, %s8024_s20  ;;  %v440_v13 = vld [vmem:[%s8137_s30 + $0x188] sm:$0xff]  ;;  %v443_v14 = vld [vmem:[%s8137_s30 + $0x1a0] sm:$0xff]  ;;  %v6275_v15 = vpack.c.bf16 %v436_v12, %v433_v11  ;;  %v442_v18 = vld [vmem:[%s8137_s30 + $0x198] sm:$0xff] }
  0x24   : > { %6262 = vmatprep.subr.bf16.mxu0 %v6261_v47  ;;  %v6277_v16 = vpack.c.bf16 %v443_v14, %v440_v13  ;;  %v439_v17 = vld [vmem:[%s8137_s30 + $0x180] sm:$0xff]  ;;  %v446_v19 = vld [vmem:[%s8137_s30 + $0x1b8] sm:$0xff]  ;;  %v449_v20 = vld [vmem:[%s8137_s30 + $0x1d0] sm:$0xff] }
  0x25   : > { %960 = vrot.lane.b32.xlu1 %v953_v50, %s8024_s20  ;;  %v6279_v21 = vpack.c.bf16 %v442_v18, %v439_v17  ;;  %v5681_v22 = vld [vmem:[%s12143_s1 + $0x5] ss:$8 sm:$0x7]  ;;  %v5682_v23 = vld [vmem:[%s12143_s1 + $0x6] ss:$8 sm:$0x7]  ;;  %v6281_v24 = vpack.c.bf16 %v449_v20, %v446_v19  ;;  %vm8323_vm3 = vmpackc.low %vm506_vm1, %vm8031_vm2 }
  0x26   : > { %v445_v25 = vld [vmem:[%s8137_s30 + $0x1b0] sm:$0xff]  ;;  %v448_v26 = vld [vmem:[%s8137_s30 + $0x1c8] sm:$0xff]  ;;  %v1146_v28 = vrot.slane %v5681_v22, %v8130_v8  ;;  %v1142_v29 = vrot.slane %v5681_v22, %v8128_v7  ;;  %v455_v31 = vld [vmem:[%s8137_s30 + $0x200] sm:$0xff]  ;;  %v1214_v32 = vrot.slane %v5682_v23, %v8128_v7  ;;  %v1150_v33 = vrot.slane %v5681_v22, %v8132_v9 }
  0x27   : > { %6264 = vmatpush1.bf16.msra.mxu0 %v6263_v54  ;;  %1081 = vrot.lane.b32.xlu0 %v1074_v55, %s8025_s23  ;;  %v452_v30 = vld [vmem:[%s8137_s30 + $0x1e8] sm:$0xff]  ;;  %v6283_v34 = vpack.c.bf16 %v448_v26, %v445_v25  ;;  %v451_v36 = vld [vmem:[%s8137_s30 + $0x1e0] sm:$0xff]  ;;  %v454_v37 = vld [vmem:[%s8137_s30 + $0x1f8] sm:$0xff]  ;;  %v1222_v40 = vrot.slane %v5682_v23, %v8132_v9  ;;  %v1218_v41 = vrot.slane %v5682_v23, %v8130_v8  ;;  %v12413_v22 = vmov 0 }
  0x28   : > { %6266 = vmatprep.subr.bf16.mxu0 %v6265_v56  ;;  %v6285_v35 = vpack.c.bf16 %v455_v31, %v452_v30  ;;  %v458_v38 = vld [vmem:[%s8137_s30 + $0x218] sm:$0xff]  ;;  %v461_v39 = vld [vmem:[%s8137_s30 + $0x230] sm:$0xff]  ;;  %v6287_v42 = vpack.c.bf16 %v454_v37, %v451_v36  ;;  %v460_v46 = vld [vmem:[%s8137_s30 + $0x228] sm:$0xff]  ;;  %v12414_v22 = vsel %vm8323_vm3, 4294967295, %v12413_v22  ;;  %vm1755_vm2 = vcmask 916480  }
  0x29   : > { %1079 = vrot.lane.b32.xlu1 %v1070_v59, %s8025_s23  ;;  %v5701_v43 = vld [vmem:[%s12144_s2 + $0x3] ss:$8 sm:$0x7]  ;;  %v6289_v44 = vpack.c.bf16 %v461_v39, %v458_v38  ;;  %v5715_v52 = vld [vmem:[%s12144_s2 + $0x5] ss:$8 sm:$0x7] }
  0x2a   : > { %v457_v45 = vld [vmem:[%s8137_s30 + $0x210] sm:$0xff]  ;;  %v464_v47 = vld [vmem:[%s8137_s30 + $0x248] sm:$0xff]  ;;  %v467_v48 = vld [vmem:[%s8137_s30 + $0x260] sm:$0xff]  ;;  %v2843_v49 = vrot.slane %v5701_v43, %v8132_v9  ;;  %v2839_v50 = vrot.slane %v5701_v43, %v8130_v8  ;;  %v3570_v58 = vrot.slane %v5715_v52, %v8130_v8  ;;  %v3566_v59 = vrot.slane %v5715_v52, %v8128_v7  ;;  %12415 = vst [vmem:[#allocation6_spill] sm:$0xff] %v12414_v22 }
  0x2b   : > { %6268 = vmatpush1.bf16.msra.mxu0 %v6267_v62  ;;  %1151 = vrot.lane.b32.xlu0 %v1142_v29, %s8026_s28  ;;  %v6291_v51 = vpack.c.bf16 %v460_v46, %v457_v45  ;;  %v6293_v53 = vpack.c.bf16 %v467_v48, %v464_v47  ;;  %v463_v54 = vld [vmem:[%s8137_s30 + $0x240] sm:$0xff]  ;;  %v466_v55 = vld [vmem:[%s8137_s30 + $0x258] sm:$0xff]  ;;  %v473_v57 = vld [vmem:[%s8137_s30 + $0x290] sm:$0xff]  ;;  %v3574_v5 = vrot.slane %v5715_v52, %v8132_v9 }
  0x2c   : > { %6270 = vmatprep.subr.bf16.mxu0 %v6269_v63  ;;  %v470_v56 = vld [vmem:[%s8137_s30 + $0x278] sm:$0xff]  ;;  %v6295_v60 = vpack.c.bf16 %v466_v55, %v463_v54  ;;  %v5683_v61 = vld [vmem:[%s12144_s2 + $0x1] ss:$8 sm:$0x7] }
  0x2d   : > { %1083 = vrot.lane.b32.xlu1 %v1078_v3, %s8025_s23  ;;  %v6297_v62 = vpack.c.bf16 %v473_v57, %v470_v56  ;;  %v469_v63 = vld [vmem:[%s8137_s30 + $0x270] sm:$0xff]  ;;  %v472_v1 = vld [vmem:[%s8137_s30 + $0x288] sm:$0xff]  ;;  %v479_v3 = vld [vmem:[%s8137_s30 + $0x2c0] sm:$0xff]  ;;  %v1421_v4 = vrot.slane %v5683_v61, %v8128_v7 }
  0x2e   : > { %v476_v2 = vld [vmem:[%s8137_s30 + $0x2a8] sm:$0xff]  ;;  %v475_v11 = vld [vmem:[%s8137_s30 + $0x2a0] sm:$0xff]  ;;  %v478_v12 = vld [vmem:[%s8137_s30 + $0x2b8] sm:$0xff] }
  0x2f   : > { %6272 = vmatpush1.bf16.msra.mxu0 %v6271_v6  ;;  %1155 = vrot.lane.b32.xlu0 %v1150_v33, %s8026_s28  ;;  %v6299_v6 = vpack.c.bf16 %v472_v1, %v469_v63  ;;  %v482_v13 = vld [vmem:[%s8137_s30 + $0x2d8] sm:$0xff]  ;;  %v485_v14 = vld [vmem:[%s8137_s30 + $0x2f0] sm:$0xf]  ;;  %v6303_v17 = vpack.c.bf16 %v478_v12, %v475_v11  ;;  %v5722_v18 = vld [vmem:[%s12144_s2 + $0x6] ss:$8 sm:$0x7] }
  0x30   : > { %6274 = vmatprep.subr.bf16.mxu0 %v6273_v10  ;;  %v6301_v10 = vpack.c.bf16 %v479_v3, %v476_v2  ;;  %v6305_v19 = vpack.c.bf16 %v485_v14, %v482_v13  ;;  %v481_v20 = vld [vmem:[%s8137_s30 + $0x2d0] sm:$0xff]  ;;  %v4001_v25 = vrot.slane %v5722_v18, %v8130_v8  ;;  %v3997_v26 = vrot.slane %v5722_v18, %v8128_v7  ;;  %v447_v33 = vld [vmem:[%s8137_s30 + $0x1c0] sm:$0xff]  ;;  %v8355_v38 = vld [vmem:[%s12145_s3 + $0x18] sm:$0xf] }
  0x31   : > { %1153 = vrot.lane.b32.xlu1 %v1146_v28, %s8026_s28  ;;  %v441_v23 = vld [vmem:[%s8137_s30 + $0x190] sm:$0xff]  ;;  %v8350_v36 = vld [vmem:[%s12145_s3] sm:$0xff]  ;;  %v462_v54 = vld [vmem:[%s8137_s30 + $0x238] sm:$0xff] }
  0x32   : > { %v1330_v29 = vld [vmem:[%s12144_s2] ss:$8 sm:$0x7]  ;;  %v5729_v48 = vld [vmem:[%s12144_s2 + $0x7] ss:$8 sm:$0x7] }
  0x33   : > { %6276 = vmatpush1.bf16.msra.mxu0 %v6275_v15  ;;  %1225 = vrot.lane.b32.xlu0 %v1218_v41, %s8027_s29  ;;  %v1425_v15 = vrot.slane %v5683_v61, %v8130_v8  ;;  %v393_v31 = vld [vmem:[%s8137_s30 + $0x10] sm:$0xff]  ;;  %v402_v41 = vld [vmem:[%s8137_s30 + $0x58] sm:$0xff]  ;;  %v1343_v45 = vrot.slane %v1330_v29, %v8132_v9  ;;  %v1339_v52 = vrot.slane %v1330_v29, %v8130_v8  ;;  %v420_v3 = vld [vmem:[%s8137_s30 + $0xe8] sm:$0xff] }
  0x34   : > { %6278 = vmatprep.subr.bf16.mxu0 %v6277_v16  ;;  %v1429_v16 = vrot.slane %v5683_v61, %v8132_v9  ;;  %v453_v43 = vld [vmem:[%s8137_s30 + $0x1f0] sm:$0xff]  ;;  %v4428_v55 = vrot.slane %v5729_v48, %v8128_v7  ;;  %v423_v11 = vld [vmem:[%s8137_s30 + $0x100] sm:$0xff]  ;;  %v426_v12 = vld [vmem:[%s8137_s30 + $0x118] sm:$0xff] }
  0x35   : > { %1223 = vrot.lane.b32.xlu1 %v1214_v32, %s8027_s29  ;;  %v396_v32 = vld [vmem:[%s8137_s30 + $0x28] sm:$0xff]  ;;  %v8370_v46 = vld [vmem:[%s12145_s3 + $0x10] sm:$0xf] }
  0x36   : > { %v6313_v37 = vpack.c.bf16 %v396_v32, %v393_v31  ;;  %v465_v61 = vld [vmem:[%s8137_s30 + $0x250] sm:$0xff]  ;;  %v480_v14 = vld [vmem:[%s8137_s30 + $0x2c8] sm:$0xff] }
  0x37   : > { %6280 = vmatpush1.bf16.msra.mxu0 %v6279_v21  ;;  %2846 = vrot.lane.b32.xlu0 %v2839_v50, %s8028_s21  ;;  %v484_v21 = vld [vmem:[%s8137_s30 + $0x2e8] sm:$0xf]  ;;  %v405_v50 = vld [vmem:[%s8137_s30 + $0x70] sm:$0xff] }
  0x38   : > { %6282 = vmatprep.subr.bf16.mxu0 %v6281_v24  ;;  %v444_v24 = vld [vmem:[%s8137_s30 + $0x1a8] sm:$0xff]  ;;  %v6308_v28 = vpack.c.bf16 %v484_v21, %v481_v20  ;;  %v417_v2 = vld [vmem:[%s8137_s30 + $0xd0] sm:$0xff]  ;;  %v486_v20 = vld [vmem:[%s8137_s30 + $0x2f8] sm:$0xf] }
  0x39   : > { %1227 = vrot.lane.b32.xlu1 %v1222_v40, %s8027_s29  ;;  %v6311_v30 = vpack.c.bf16 %v444_v24, %v441_v23  ;;  %v399_v40 = vld [vmem:[%s8137_s30 + $0x40] sm:$0xff]  ;;  %v477_v13 = vld [vmem:[%s8137_s30 + $0x2b0] sm:$0xff] }
  0x3a   : > { %v6317_v47 = vpack.c.bf16 %v402_v41, %v399_v40  ;;  %v435_v24 = vld [vmem:[%s8137_s30 + $0x160] sm:$0xff] }
  0x3b   : > { %6284 = vmatpush1.bf16.msra.mxu0 %v6283_v34  ;;  %3575 = vrot.lane.b32.xlu0 %v3566_v59, %s8029_s25  ;;  %v450_v34 = vld [vmem:[%s8137_s30 + $0x1d8] sm:$0xff] }
  0x3c   : > { %6286 = vmatprep.subr.bf16.mxu0 %v6285_v35  ;;  %v1335_v35 = vrot.slane %v1330_v29, %v8128_v7  ;;  %v6315_v39 = vpack.c.bf16 %v450_v34, %v447_v33  ;;  %v414_v59 = vld [vmem:[%s8137_s30 + $0xb8] sm:$0xff]  ;;  %v852_v33 = vld [vmem:[#allocation2 + $0x28] sm:$0xf] }
  0x3d   : > { %2848 = vrot.lane.b32.xlu1 %v2843_v49, %s8028_s21 }
  0x3f   : > { %6288 = vmatpush1.bf16.msra.mxu0 %v6287_v42  ;;  %3579 = vrot.lane.b32.xlu0 %v3574_v5, %s8029_s25  ;;  %v4005_v42 = vrot.slane %v5722_v18, %v8132_v9  ;;  %v474_v5 = vld [vmem:[%s8137_s30 + $0x298] sm:$0xff]  ;;  %v432_v18 = vld [vmem:[%s8137_s30 + $0x148] sm:$0xff] }
  0x40   : > { %6290 = vmatprep.subr.bf16.mxu0 %v6289_v44  ;;  %v456_v44 = vld [vmem:[%s8137_s30 + $0x208] sm:$0xff] }
  0x41   : > { %3577 = vrot.lane.b32.xlu1 %v3570_v58, %s8029_s25  ;;  %v6319_v49 = vpack.c.bf16 %v456_v44, %v453_v43  ;;  %v411_v58 = vld [vmem:[%s8137_s30 + $0xa0] sm:$0xff]  ;;  %v939_v43 = vld [vmem:[#allocation2 + $0x28] sm:$0xf] }
  0x42   : > { %v6325_v63 = vpack.c.bf16 %v414_v59, %v411_v58  ;;  %v8478_v59 = vld [vmem:[%s12143_s1 + $0x3] ss:$8 sm:$0x7] }
  0x43   : > { %6292 = vmatpush1.bf16.msra.mxu0 %v6291_v51  ;;  %1432 = vrot.lane.b32.xlu0 %v1425_v15, %s8030_s26  ;;  %v408_v51 = vld [vmem:[%s8137_s30 + $0x88] sm:$0xff]  ;;  %v6333_v15 = vpack.c.bf16 %v426_v12, %v423_v11 }
  0x44   : > { %6294 = vmatprep.subr.bf16.mxu0 %v6293_v53  ;;  %v459_v53 = vld [vmem:[%s8137_s30 + $0x220] sm:$0xff]  ;;  %v6321_v56 = vpack.c.bf16 %v408_v51, %v405_v50 }
  0x45   : > { %1430 = vrot.lane.b32.xlu1 %v1421_v4, %s8030_s26  ;;  %v6323_v57 = vpack.c.bf16 %v462_v54, %v459_v53  ;;  %v471_v4 = vld [vmem:[%s8137_s30 + $0x280] sm:$0xff] }
  0x47   : > { %6296 = vmatpush1.bf16.msra.mxu0 %v6295_v60  ;;  %4006 = vrot.lane.b32.xlu0 %v3997_v26, %s8032_s16  ;;  %v4432_v60 = vrot.slane %v5729_v48, %v8130_v8 }
  0x48   : > { %6298 = vmatprep.subr.bf16.mxu0 %v6297_v62  ;;  %v468_v62 = vld [vmem:[%s8137_s30 + $0x268] sm:$0xff] }
  0x49   : > { %1434 = vrot.lane.b32.xlu1 %v1429_v16, %s8030_s26  ;;  %v6327_v1 = vpack.c.bf16 %v468_v62, %v465_v61  ;;  %v6335_v16 = vpack.c.bf16 %v480_v14, %v477_v13  ;;  %v1034_v62 = vrot.slane %v8478_v59, %v8128_v7 }
  0x4b   : > { %6300 = vmatpush1.bf16.msra.mxu0 %v6299_v6  ;;  %4010 = vrot.lane.b32.xlu0 %v4005_v42, %s8032_s16  ;;  %v6329_v6 = vpack.c.bf16 %v420_v3, %v417_v2 }
  0x4c   : > { %6302 = vmatprep.subr.bf16.mxu0 %v6301_v10  ;;  %v6331_v10 = vpack.c.bf16 %v474_v5, %v471_v4 }
  0x4d   : > { %4008 = vrot.lane.b32.xlu1 %v4001_v25, %s8032_s16  ;;  %v438_v25 = vld [vmem:[%s8137_s30 + $0x178] sm:$0xff] }
  0x4e   : > { %v6342_v26 = vpack.c.bf16 %v438_v25, %v435_v24 }
  0x4f   : > { %6304 = vmatpush1.bf16.msra.mxu0 %v6303_v17  ;;  %1346 = vrot.lane.b32.xlu0 %v1339_v52, %s8033_s13  ;;  %v429_v17 = vld [vmem:[%s8137_s30 + $0x130] sm:$0xff] }
  0x50   : > { %6307 = vmatprep.subr.msk.bf16.mxu0 %vm8323_vm3, %v6305_v19  ;;  %v483_v19 = vld [vmem:[%s8137_s30 + $0x2e0] sm:$0xff]  ;;  %v6337_v21 = vpack.c.bf16 %v432_v18, %v429_v17 }
  0x51   : > { %1344 = vrot.lane.b32.xlu1 %v1335_v35, %s8033_s13  ;;  %v6339_v23 = vpack.c.bf16 %v486_v20, %v483_v19 }
  0x53   : > { %6310 = vmatpush1.bf16.msk.msra.mxu0 %vm8323_vm3, %v6308_v28  ;;  %4439 = vrot.lane.b32.xlu0 %v4432_v60, %s8034_s12  ;;  %v766_v28 = vld [vmem:[#allocation2 + $0x28] sm:$0xf] }
  0x54   : > { %6312 = vmatprep.subr.bf16.mxu0 %v6311_v30 }
  0x55   : > { %1348 = vrot.lane.b32.xlu1 %v1343_v45, %s8033_s13 }
  0x56   : > { %581 = vmatmul.mubr.f32.vlgmr.msra.gmra.mrb[0].mxu0 %v8350_v36 }
  0x57   : > { %6314 = vmatpush3.bf16.msra.mxu0 %v6313_v37  ;;  %5673 = vmatprep.mubr.msk.f32.mxu0 %vm499_vm0, %v8355_v38 }
  0x58   : > { %6316 = vmatprep.subr.bf16.mxu0 %v6315_v39 }
  0x59   : > { %4437 = vrot.lane.b32.xlu1 %v4428_v55, %s8034_s12 }
  0x5a   : > { %587 = vmatmul.mubr.f32.gmra.mrb[2].mxu0 %v8370_v46 }
  0x5b   : > { %6318 = vmatpush3.bf16.msra.mxu0 %v6317_v47  ;;  %5675 = vmatprep.mubr.msk.f32.mxu0 %vm499_vm0, %v8110_v0  ;;  %v4436_v0 = vrot.slane %v5729_v48, %v8132_v9 }
  0x5c   : > { %6320 = vmatprep.subr.bf16.mxu0 %v6319_v49 }
  0x5d   : > { %4441 = vrot.lane.b32.xlu1 %v4436_v0, %s8034_s12 }
  0x5f   : > { %6322 = vmatpush3.bf16.msra.mxu0 %v6321_v56 }
  0x60   : > { %6324 = vmatprep.subr.bf16.mxu0 %v6323_v57 }
  0x63   : > { %6326 = vmatpush3.bf16.msra.mxu0 %v6325_v63 }
  0x64   : > { %6328 = vmatprep.subr.bf16.mxu0 %v6327_v1  ;;  %v1038_v1 = vrot.slane %v8478_v59, %v8130_v8 }
  0x67   : > { %6330 = vmatpush3.bf16.msra.mxu0 %v6329_v6 }
  0x68   : > { %6332 = vmatprep.subr.bf16.mxu0 %v6331_v10 }
  0x6b   : > { %6334 = vmatpush3.bf16.msra.mxu0 %v6333_v15 }
  0x6c   : > { %6336 = vmatprep.subr.bf16.mxu0 %v6335_v16 }
  0x6f   : > { %6338 = vmatpush3.bf16.msra.mxu0 %v6337_v21 }
  0x70   : > { %6341 = vmatprep.subr.msk.bf16.mxu0 %vm8323_vm3, %v6339_v23 }
  0x73   : > { %6343 = vmatpush3.bf16.msra.mxu0 %v6342_v26 }
  0x76   : > { %658 = vmatmul.mubr.f32.vlgmr.msra.gmra.mrb[4].mxu0 %v8350_v36 }
  0x77   : > { %5676 = vmatprep.mubr.msk.f32.mxu0 %vm499_vm0, %v8355_v38  ;;  %vm1350_vm0 = vcmask 678912  }
  0x7a   : > { %663 = vmatmul.mubr.f32.gmra.mrb[6].mxu0 %v8370_v46 }
  0x7b   : > { %1826 = vmatprep.mubr.f32.mxu0 %v8022_v27 }
  0x87   : > { %v785_v29 = vpop.permute.xlu1 %784 }
  0x88   : > { %v801_v30 = vmul.f32 %v785_v29, %v766_v28  ;;  %v797_v31 = vmul.f32 0.0, %v785_v29 }
  0x8a   : > { %821 = vrot.lane.b32.xlu1 %v801_v30, %s8027_s29  ;;  %813 = vrot.lane.b32.xlu0 %v797_v31, %s8027_s29 }
  0x8b   : > { %v8419_v32 = vpop.permute.xlu1 %786 }
  0x8c   : > { %v8490_v4 = vsel %vm790_vm6, %v785_v29, %v8419_v32 }
  0x8e   : > { %v8423_v35 = vpop.permute.xlu0 %491 }
  0x8f   : > { %v8421_v34 = vpop.permute.xlu1 %871 }
  0x90   : > { %v888_v36 = vmul.f32 %v8421_v34, %v852_v33  ;;  %v884_v37 = vmul.f32 0.0, %v8421_v34 }
  0x92   : > { %908 = vrot.lane.b32.xlu1 %v888_v36, %s8026_s28  ;;  %900 = vrot.lane.b32.xlu0 %v884_v37, %s8026_s28  ;;  %v8431_v38 = vpop.permute.xlu0 %496 }
  0x93   : > { %v8429_v27 = vpop.permute.xlu1 %875 }
  0x96   : > { %v8435_v40 = vpop.permute.xlu0 %788 }
  0x97   : > { %v8433_v39 = vpop.permute.xlu1 %960  ;;  %v8528_v31 = vsel %vm790_vm6, %v8419_v32, %v8435_v40 }
  0x9a   : > { %v8437_v41 = vpop.permute.xlu0 %873 }
  0x9b   : > { %v8439_v42 = vpop.permute.xlu1 %1079  ;;  %v878_v18 = vsel %vm877_vm7, %v8421_v34, %v8437_v41 }
  0x9e   : > { %v8441_v44 = vpop.permute.xlu0 %958 }
  0x9f   : > { %v975_v45 = vmul.f32 %v8441_v44, %v939_v43  ;;  %v971_v46 = vmul.f32 0.0, %v8441_v44  ;;  %v8447_v47 = vpop.permute.xlu1 %1083  ;;  %v965_v24 = vsel %vm964_vm8, %v8441_v44, %v8433_v39  ;;  %v879_v44 = vsel %vm877_vm7, %v8437_v41, %v8429_v27 }
  0xa1   : > { %995 = vrot.lane.b32.xlu0 %v975_v45, %s8025_s23  ;;  %987 = vrot.lane.b32.xlu1 %v971_v46, %s8025_s23 }
  0xa2   : > { %v8469_v56 = vpop.permute.xlu0 %962 }
  0xa3   : > { %v8449_v48 = vpop.permute.xlu1 %1153 }
  0xa6   : > { %v8471_v57 = vpop.permute.xlu0 %1081 }
  0xa7   : > { %v8451_v49 = vpop.permute.xlu1 %1223  ;;  %v8523_v29 = vsel %vm1003_vm9, %v8439_v42, %v8471_v57 }
  0xaa   : > { %v8473_v58 = vpop.permute.xlu0 %1151 }
  0xab   : > { %v8453_v50 = vpop.permute.xlu1 %1227  ;;  %v8540_v32 = vsel %vm916_vm10, %v8473_v58, %v8449_v48 }
  0xae   : > { %v8486_v2 = vpop.permute.xlu0 %1155 }
  0xaf   : > { %v8455_v51 = vpop.permute.xlu1 %2848 }
  0xb2   : > { %v8507_v20 = vpop.permute.xlu0 %1225 }
  0xb3   : > { %v8457_v52 = vpop.permute.xlu1 %3577  ;;  %v8550_v41 = vsel %vm829_vm11, %v8451_v49, %v8507_v20 }
  0xb6   : > { %v8516_v28 = vpop.permute.xlu0 %2846 }
  0xb7   : > { %v8459_v53 = vpop.permute.xlu1 %1430  ;;  %12416 = vst [vmem:[#allocation7_spill] sm:$0xff] %v8516_v28 }
  0xb8   : > { %v1443_v54 = vmul.f32 0.0, %v8459_v53 }
  0xba   : > { %v6936_v55 = vpack.i.bf16 %v1443_v54, %v1443_v54  ;;  %v8542_v45 = vpop.permute.xlu0 %3575 }
  0xbc   : > { %6937 = vrot.lane.b32.xlu0 %v6936_v55, %s8034_s12  ;;  %6947 = vrot.lane.b32.xlu1 %v6936_v55, %s8034_s12 }
  0xc0   : > { %6942 = vrot.lane.b32.xlu0 %v6936_v55, %s8034_s12  ;;  %6957 = vrot.lane.b32.xlu1 %v6936_v55, %s8034_s12 }
  0xc4   : > { %6952 = vrot.lane.b32.xlu0 %v6936_v55, %s8034_s12  ;;  %6967 = vrot.lane.b32.xlu1 %v6936_v55, %s8034_s12 }
  0xc8   : > { %6962 = vrot.lane.b32.xlu0 %v6936_v55, %s8034_s12  ;;  %v966_v55 = vsel %vm964_vm8, %v8433_v39, %v8469_v56 }
 0x129   : > { %v582_v60 = vpop.f32.mrb[0].mxu0 }
 0x12a   : > { %v583_v61 = vadd.f32 %v582_v60, %v8423_v35  ;;  %v584_v0 = vpop.f32.mrb[1].mxu0 }
 0x12b   : > { %v585_v63 = vadd.f32 %v584_v0, %v8423_v35 }
 0x12c   : > { %v668_v3 = vmax.f32 %v583_v61, 0.0 }
 0x12d   : > { %v669_v5 = vmax.f32 %v585_v63, 0.0  ;;  %v588_v6 = vpop.f32.mrb[2].mxu0  ;;  %v8556_v63 = vpop.permute.xlu0 %3579 }
 0x12e   : > { %686 = vst [vmem:[#allocation2 + $0x8] sm:$0xff] %v668_v3  ;;  %v8492_v10 = vmul.f32 %v1034_v62, %v668_v3  ;;  %v589_v11 = vadd.f32 %v588_v6, %v8431_v38  ;;  %v590_v12 = vpop.f32.mrb[3].mxu0  ;;  %v1090_v13 = vmul.f32 %v8439_v42, %v668_v3  ;;  %v798_v14 = vmul.f32 %v8490_v4, %v668_v3 }
 0x12f   : > { %687 = vst [vmem:[#allocation2 + $0x10] sm:$0xff] %v669_v5  ;;  %v8497_v15 = vmul.f32 %v1038_v1, %v669_v5  ;;  %v591_v16 = vadd.f32 %v590_v12, %v8431_v38  ;;  %v1162_v21 = vmul.f32 %v8473_v58, %v668_v3  ;;  %v885_v23 = vmul.f32 %v878_v18, %v668_v3 }
 0x130   : > { %1052 = vst [vmem:[#allocation3 + $0xf8] sm:$0xff] %v8492_v10  ;;  %v671_v17 = vmax.f32 %v589_v11, 0.0  ;;  %1102 = vrot.lane.b32.xlu1 %v1090_v13, %s8024_s20  ;;  %815 = vrot.lane.b32.xlu0 %v798_v14, %s8027_s29  ;;  %v1234_v25 = vmul.f32 %v8451_v49, %v668_v3  ;;  %v972_v26 = vmul.f32 %v965_v24, %v668_v3 }
 0x131   : > { %1053 = vst [vmem:[#allocation3 + $0x100] sm:$0xff] %v8497_v15  ;;  %v672_v19 = vmax.f32 %v591_v16, 0.0  ;;  %v799_v36 = vmul.f32 %v8528_v31, %v669_v5  ;;  %v1091_v37 = vmul.f32 %v8523_v29, %v669_v5  ;;  %v886_v46 = vmul.f32 %v879_v44, %v669_v5 }
 0x132   : > { %689 = vst [vmem:[#allocation2 + $0x30] sm:$0xf] %v671_v17  ;;  %v1163_v54 = vmul.f32 %v8540_v32, %v669_v5  ;;  %v973_v60 = vmul.f32 %v966_v55, %v669_v5  ;;  %v1235_v61 = vmul.f32 %v8550_v41, %v669_v5  ;;  %v1433_v5 = vpop.permute.xlu0 %1432 }
 0x133   : > { %690 = vst [vmem:[#allocation2 + $0x38] sm:$0xf] %v672_v19 }
 0x134   : > { %1174 = vrot.lane.b32.xlu1 %v1162_v21, %s8023_s19  ;;  %902 = vrot.lane.b32.xlu0 %v885_v23, %s8026_s28  ;;  %v8575_v23 = vsel %vm1436_vm12, %v8459_v53, %v1433_v5 }
 0x135   : > { %12417 = vst [vmem:[#allocation8_spill] sm:$0xff] %v8575_v23 }
 0x138   : > { %1246 = vrot.lane.b32.xlu1 %v1234_v25, %s8021_s14  ;;  %989 = vrot.lane.b32.xlu0 %v972_v26, %s8025_s23 }
 0x139   : > { %v1025_v30 = vld [vmem:[#allocation2 + $0x30] sm:$0xf] }
 0x13a   : > { %v1049_v33 = vmul.f32 %v1034_v62, %v1025_v30  ;;  %v1026_v34 = vld [vmem:[#allocation2 + $0x38] sm:$0xf]  ;;  %v767_v62 = vld [vmem:[#allocation2 + $0x30] sm:$0xf] }
 0x13b   : > { %v1050_v43 = vmul.f32 %v1038_v1, %v1026_v34  ;;  %v1061_v0 = vld [vmem:[#allocation2 + $0x30] sm:$0xf]  ;;  %v802_v1 = vmul.f32 %v8490_v4, %v767_v62  ;;  %v941_v62 = vld [vmem:[#allocation2 + $0x38] sm:$0xf] }
 0x13c   : > { %1055 = vst [vmem:[#allocation3 + $0x120] sm:$0xf] %v1049_v33  ;;  %817 = vrot.lane.b32.xlu1 %v799_v36, %s8027_s29  ;;  %1104 = vrot.lane.b32.xlu0 %v1091_v37, %s8024_s20  ;;  %v1093_v3 = vmul.f32 %v8439_v42, %v1061_v0  ;;  %v853_v6 = vld [vmem:[#allocation2 + $0x30] sm:$0xf]  ;;  %v8569_v42 = vpop.permute.xlu1 %1434 }
 0x13d   : > { %1056 = vst [vmem:[#allocation3 + $0x128] sm:$0xf] %v1050_v43  ;;  %v1133_v11 = vld [vmem:[#allocation2 + $0x30] sm:$0xf]  ;;  %v889_v13 = vmul.f32 %v878_v18, %v853_v6  ;;  %v8580_v25 = vsel %vm1436_vm12, %v1433_v5, %v8569_v42  ;;  %v768_v43 = vld [vmem:[#allocation2 + $0x38] sm:$0xf] }
 0x13e   : > { %v1165_v14 = vmul.f32 %v8473_v58, %v1133_v11  ;;  %v940_v16 = vld [vmem:[#allocation2 + $0x30] sm:$0xf]  ;;  %12418 = vst [vmem:[#allocation9_spill] sm:$0xff] %v8580_v25 }
 0x13f   : > { %v1205_v19 = vld [vmem:[#allocation2 + $0x30] sm:$0xf]  ;;  %v976_v30 = vmul.f32 %v965_v24, %v940_v16 }
 0x140   : > { %904 = vrot.lane.b32.xlu1 %v886_v46, %s8026_s28  ;;  %1176 = vrot.lane.b32.xlu0 %v1163_v54, %s8023_s19  ;;  %v1237_v33 = vmul.f32 %v8451_v49, %v1205_v19  ;;  %v803_v49 = vmul.f32 %v8528_v31, %v768_v43  ;;  %v854_v54 = vld [vmem:[#allocation2 + $0x38] sm:$0xf]  ;;  %v8630_v16 = vpop.permute.xlu1 %4008 }
 0x143   : > { %v8565_v21 = vld [vmem:[#allocation3 + $0x120] sm:$0xff] }
 0x144   : > { %991 = vrot.lane.b32.xlu1 %v973_v60, %s8025_s23  ;;  %1248 = vrot.lane.b32.xlu0 %v1235_v61, %s8021_s14  ;;  %v8567_v4 = vld [vmem:[#allocation3 + $0x128] sm:$0xff]  ;;  %v1472_v34 = vmul.f32 %v8575_v23, %v8565_v21  ;;  %v1042_v60 = vrot.slane %v8478_v59, %v8132_v9  ;;  %v890_v61 = vmul.f32 %v879_v44, %v854_v54 }
 0x145   : > { %v1473_v36 = vmul.f32 %v8580_v25, %v8567_v4  ;;  %v1062_v59 = vld [vmem:[#allocation2 + $0x38] sm:$0xf]  ;;  %v1158_v44 = vsel %vm916_vm10, %v8449_v48, %v8486_v2 }
 0x146   : > { %v1094_v11 = vmul.f32 %v8523_v29, %v1062_v59  ;;  %v8686_v59 = vsel %vm3084_vm14, %v8457_v52, %v8556_v63 }
 0x147   : > { %v6981_v24 = vpack.i.bf16 %v1473_v36, %v1472_v34 }
 0x148   : > { %823 = vrot.lane.b32.xlu1 %v802_v1, %s8027_s29  ;;  %1108 = vrot.lane.b32.xlu0 %v1093_v3, %s8024_s20  ;;  %v977_v3 = vmul.f32 %v966_v55, %v941_v62  ;;  %v1134_v55 = vld [vmem:[#allocation2 + $0x38] sm:$0xf]  ;;  %v8670_v62 = vsel %vm2850_vm13, %v8516_v28, %v8455_v51 }
 0x149   : > { %v5787_v39 = vpop.f32.mrb[4].mxu0  ;;  %v1166_v5 = vmul.f32 %v8540_v32, %v1134_v55  ;;  %v8632_v32 = vpop.permute.xlu0 %4006 }
 0x14a   : > { %v5788_v12 = vpop.f32.mrb[5].mxu0 }
 0x14b   : > { %v5789_v17 = vadd.f32 %v5788_v12, %v5787_v39  ;;  %v1230_v39 = vsel %vm829_vm11, %v8507_v20, %v8453_v50  ;;  %v1206_v12 = vld [vmem:[#allocation2 + $0x38] sm:$0xf]  ;;  %v1468_v50 = vmul.f32 %v8575_v23, %v8492_v10  ;;  %v1469_v20 = vmul.f32 %v8580_v25, %v8497_v15 }
 0x14c   : > { %910 = vrot.lane.b32.xlu1 %v889_v13, %s8026_s28  ;;  %1180 = vrot.lane.b32.xlu0 %v1165_v14, %s8023_s19  ;;  %v1238_v14 = vmul.f32 %v8550_v41, %v1206_v12  ;;  %v3607_v41 = vmul.f32 %v8542_v45, %v8565_v21 }
 0x14d   : > { %v660_v18 = vadd.f32 %v5789_v17, %v8423_v35  ;;  %v5790_v58 = vpop.f32.mrb[6].mxu0 }
 0x14e   : > { %v5791_v26 = vpop.f32.mrb[7].mxu0 }
 0x14f   : > { %v670_v37 = vmax.f32 %v660_v18, 0.0  ;;  %v5792_v53 = vadd.f32 %v5791_v26, %v5790_v58  ;;  %v6971_v18 = vpack.i.bf16 %v1469_v20, %v1468_v50  ;;  %v3604_v58 = vmul.f32 %v8542_v45, %v8492_v10 }
 0x150   : > { %997 = vrot.lane.b32.xlu1 %v976_v30, %s8025_s23  ;;  %1252 = vrot.lane.b32.xlu0 %v1237_v33, %s8021_s14  ;;  %v8643_v30 = vpop.permute.xlu1 %1344  ;;  %v8645_v33 = vpop.permute.xlu0 %4010 }
 0x151   : > { %688 = vst.msk [vmem:[#allocation2 + $0x18] sm:$0xff] %vm678_vm4, %v670_v37  ;;  %v665_v35 = vadd.f32 %v5792_v53, %v8431_v38  ;;  %v1086_v38 = vsel %vm1003_vm9, %v8471_v57, %v8447_v47  ;;  %v6976_v36 = vpack.i.bf16 %v3607_v41, %v3604_v58 }
 0x153   : > { %v673_v46 = vmax.f32 %v665_v35, 0.0 }
 0x154   : > { %6982 = vrot.lane.b32.xlu1 %v6981_v24, %s8034_s12  ;;  %825 = vrot.lane.b32.xlu0 %v803_v49, %s8027_s29  ;;  %v8652_v10 = vpop.permute.xlu1 %1348  ;;  %v8654_v35 = vpop.permute.xlu0 %1346 }
 0x155   : > { %691 = vst.msk [vmem:[#allocation2 + $0x40] sm:$0xf] %vm684_vm5, %v673_v46  ;;  %12419 = vst [vmem:[#allocation10_spill] sm:$0xff] %v8652_v10 }
 0x158   : > { %v8600_v0 = vld [vmem:[#allocation2 + $0x18] sm:$0xff]  ;;  %912 = vrot.lane.b32.xlu0 %v890_v61, %s8026_s28 }
 0x159   : > { %v1048_v31 = vmul.f32 %v1042_v60, %v8600_v0  ;;  %v1092_v1 = vmul.f32 %v1086_v38, %v8600_v0  ;;  %v1164_v57 = vmul.f32 %v1158_v44, %v8600_v0  ;;  %v1236_v48 = vmul.f32 %v1230_v39, %v8600_v0 }
 0x15a   : > { %v800_v43 = vmul.f32 %v8600_v0, %v8435_v40  ;;  %v887_v46 = vmul.f32 %v8600_v0, %v8429_v27 }
 0x15b   : > { %1054 = vst.msk [vmem:[#allocation3 + $0x108] sm:$0xff] %vm678_vm4, %v1048_v31  ;;  %1106 = vrot.lane.b32.xlu1 %v1092_v1, %s8024_s20  ;;  %v974_v31 = vmul.f32 %v8600_v0, %v8469_v56 }
 0x15c   : > { %v1027_v6 = vld [vmem:[#allocation2 + $0x40] sm:$0xf]  ;;  %999 = vrot.lane.b32.xlu0 %v977_v3, %s8025_s23  ;;  %v2887_v3 = vmul.f32 %v8670_v62, %v8567_v4 }
 0x15d   : > { %v1051_v47 = vmul.f32 %v1042_v60, %v1027_v6  ;;  %v769_v2 = vld [vmem:[#allocation2 + $0x40] sm:$0xf] }
 0x15e   : > { %v804_v29 = vmul.f32 %v8435_v40, %v769_v2  ;;  %v855_v13 = vld [vmem:[#allocation2 + $0x40] sm:$0xf] }
 0x15f   : > { %1057 = vst.msk [vmem:[#allocation3 + $0x130] sm:$0xf] %vm684_vm5, %v1051_v47  ;;  %1178 = vrot.lane.b32.xlu1 %v1164_v57, %s8023_s19  ;;  %v891_v17 = vmul.f32 %v8429_v27, %v855_v13  ;;  %v942_v19 = vld [vmem:[#allocation2 + $0x40] sm:$0xf]  ;;  %v8672_v27 = vpop.permute.xlu1 %4437  ;;  %v8698_v57 = vsel %vm3084_vm14, %v8542_v45, %v8457_v52 }
 0x160   : > { %1110 = vrot.lane.b32.xlu0 %v1094_v11, %s8024_s20  ;;  %v978_v26 = vmul.f32 %v8469_v56, %v942_v19  ;;  %v1063_v34 = vld [vmem:[#allocation2 + $0x40] sm:$0xf]  ;;  %v3608_v55 = vmul.f32 %v8698_v57, %v8567_v4 }
 0x161   : > { %v1095_v37 = vmul.f32 %v1086_v38, %v1063_v34  ;;  %v1135_v53 = vld [vmem:[#allocation2 + $0x40] sm:$0xf]  ;;  %v8674_v38 = vpop.permute.xlu0 %4439 }
 0x162   : > { %v1167_v24 = vmul.f32 %v1158_v44, %v1135_v53  ;;  %v1207_v49 = vld [vmem:[#allocation2 + $0x40] sm:$0xf]  ;;  %v8662_v60 = vld [vmem:[#allocation3 + $0x108] sm:$0xff]  ;;  %v2883_v44 = vmul.f32 %v8670_v62, %v8497_v15 }
 0x163   : > { %1250 = vrot.lane.b32.xlu1 %v1236_v48, %s8021_s14  ;;  %v1239_v40 = vmul.f32 %v1230_v39, %v1207_v49  ;;  %v2884_v1 = vmul.f32 %v8455_v51, %v8662_v60  ;;  %v8693_v0 = vpop.permute.xlu1 %4441  ;;  %v3606_v63 = vmul.f32 %v8686_v59, %v8662_v60  ;;  %v3605_v39 = vmul.f32 %v8698_v57, %v8497_v15 }
 0x164   : > { %1182 = vrot.lane.b32.xlu0 %v1166_v5, %s8023_s19 }
 0x165   : > { %v814_v47 = vpop.permute.xlu0 %813  ;;  %v6986_v11 = vpack.i.bf16 %v2884_v1, %v2883_v44  ;;  %v6991_v5 = vpack.i.bf16 %v3606_v63, %v3605_v39 }
 0x166   : > { %v8659_v54 = vld [vmem:[#allocation3 + $0x130] sm:$0xff] }
 0x167   : > { %827 = vrot.lane.b32.xlu1 %v804_v29, %s8027_s29  ;;  %v2888_v61 = vmul.f32 %v8455_v51, %v8659_v54  ;;  %v3609_v56 = vmul.f32 %v8686_v59, %v8659_v54  ;;  %v1474_v52 = vmul.f32 %v8569_v42, %v8659_v54  ;;  %v822_v12 = vpop.permute.xlu1 %821  ;;  %v1470_v29 = vmul.f32 %v8569_v42, %v8662_v60 }
 0x168   : > { %1254 = vrot.lane.b32.xlu0 %v1238_v14, %s8021_s14 }
 0x169   : > { %v6996_v6 = vpack.i.bf16 %v2888_v61, %v2887_v3  ;;  %v7001_v48 = vpack.i.bf16 %v3609_v56, %v3608_v55  ;;  %v901_v2 = vpop.permute.xlu0 %900  ;;  %v7006_v14 = vpack.i.bf16 %v1474_v52, %v1470_v29 }
 0x16b   : > { %914 = vrot.lane.b32.xlu1 %v891_v17, %s8026_s28  ;;  %v909_v50 = vpop.permute.xlu1 %908 }
 0x16c   : > { %6972 = vrot.lane.b32.xlu0 %v6971_v18, %s8034_s12 }
 0x16d   : > { %v8714_v13 = vpop.permute.xlu0 %995 }
 0x16f   : > { %1001 = vrot.lane.b32.xlu1 %v978_v26, %s8025_s23  ;;  %v988_v15 = vpop.permute.xlu1 %987 }
 0x170   : > { %6977 = vrot.lane.b32.xlu0 %v6976_v36, %s8028_s21 }
 0x171   : > { %v8717_v20 = vpop.permute.xlu0 %6937 }
 0x173   : > { %1112 = vrot.lane.b32.xlu1 %v1095_v37, %s8024_s20  ;;  %v8719_v17 = vpop.permute.xlu1 %6947 }
 0x174   : > { %819 = vrot.lane.b32.xlu0 %v800_v43, %s8027_s29  ;;  %12420 = vst [vmem:[#allocation11_spill] sm:$0xff] %v8719_v17 }
 0x175   : > { %v8721_v19 = vpop.permute.xlu0 %6942 }
 0x176   : > { %12421 = vst [vmem:[#allocation12_spill] sm:$0xff] %v8721_v19 }
 0x177   : > { %1184 = vrot.lane.b32.xlu1 %v1167_v24, %s8023_s19  ;;  %v8723_v18 = vpop.permute.xlu1 %6957 }
 0x178   : > { %906 = vrot.lane.b32.xlu0 %v887_v46, %s8026_s28  ;;  %12422 = vst [vmem:[#allocation13_spill] sm:$0xff] %v8723_v18 }
 0x179   : > { %v8725_v41 = vpop.permute.xlu0 %6952 }
 0x17a   : > { %12423 = vst [vmem:[#allocation14_spill] sm:$0xff] %v8725_v41 }
 0x17b   : > { %1256 = vrot.lane.b32.xlu1 %v1239_v40, %s8021_s14  ;;  %v8727_v58 = vpop.permute.xlu1 %6967  ;;  %s8035_s14 = smov 93  }
 0x17c   : > { %993 = vrot.lane.b32.xlu0 %v974_v31, %s8025_s23  ;;  %12424 = vst [vmem:[#allocation15_spill] sm:$0xff] %v8727_v58  ;;  %s8036_s23 = smov 45  }
 0x17d   : > { %v8729_v26 = vpop.permute.xlu0 %6962 }
 0x17e   : > { %12425 = vst [vmem:[#allocation16_spill] sm:$0xff] %v8729_v26 }
 0x17f   : > { %6997 = vrot.lane.b32.xlu1 %v6996_v6, %s8029_s25 }
 0x180   : > { %6987 = vrot.lane.b32.xlu0 %v6986_v11, %s8029_s25 }
 0x183   : > { %7002 = vrot.lane.b32.xlu1 %v7001_v48, %s8028_s21 }
 0x184   : > { %6992 = vrot.lane.b32.xlu0 %v6991_v5, %s8028_s21 }
 0x188   : > { %7007 = vrot.lane.b32.xlu0 %v7006_v14, %s8034_s12 }
 0x1a2   : > { %v1103_v34 = vpop.permute.xlu1 %1102  ;;  %v816_v36 = vpop.permute.xlu0 %815 }
 0x1a3   : > { %v8732_v37 = vsel %vm829_vm11, %v814_v47, %v816_v36 }
 0x1a4   : > { %842 = vst [vmem:[#allocation3 + $0x8] sm:$0xff] %v8732_v37  ;;  %v1444_v44 = vmul.f32 %v8575_v23, %v8732_v37 }
 0x1a6   : > { %v1175_v53 = vpop.permute.xlu1 %1174  ;;  %v903_v43 = vpop.permute.xlu0 %902 }
 0x1a7   : > { %v8736_v24 = vsel %vm916_vm10, %v901_v2, %v903_v43 }
 0x1a8   : > { %929 = vst [vmem:[#allocation3 + $0x58] sm:$0xff] %v8736_v24  ;;  %v1452_v39 = vmul.f32 %v8575_v23, %v8736_v24 }
 0x1aa   : > { %v1247_v49 = vpop.permute.xlu1 %1246  ;;  %v990_v46 = vpop.permute.xlu0 %989 }
 0x1ab   : > { %v8740_v40 = vsel %vm1003_vm9, %v988_v15, %v990_v46 }
 0x1ac   : > { %1016 = vst [vmem:[#allocation3 + $0xa8] sm:$0xff] %v8740_v40  ;;  %v1460_v15 = vmul.f32 %v8575_v23, %v8740_v40 }
 0x1ae   : > { %v8743_v61 = vpop.permute.xlu1 %817  ;;  %v8745_v31 = vpop.permute.xlu0 %1104 }
 0x1af   : > { %v8749_v1 = vsel %vm829_vm11, %v816_v36, %v8743_v61  ;;  %v8753_v3 = vsel %vm964_vm8, %v1103_v34, %v8745_v31 }
 0x1b0   : > { %843 = vst [vmem:[#allocation3 + $0x10] sm:$0xff] %v8749_v1  ;;  %1124 = vst [vmem:[#allocation3 + $0x148] sm:$0xff] %v8753_v3  ;;  %v1445_v6 = vmul.f32 %v8580_v25, %v8749_v1 }
 0x1b2   : > { %v8761_v56 = vpop.permute.xlu1 %904  ;;  %v8763_v47 = vpop.permute.xlu0 %1176  ;;  %v7011_v11 = vpack.i.bf16 %v1445_v6, %v1444_v44 }
 0x1b3   : > { %v8767_v63 = vsel %vm916_vm10, %v903_v43, %v8761_v56  ;;  %v8771_v55 = vsel %vm877_vm7, %v1175_v53, %v8763_v47 }
 0x1b4   : > { %930 = vst [vmem:[#allocation3 + $0x60] sm:$0xff] %v8767_v63  ;;  %1196 = vst [vmem:[#allocation3 + $0x198] sm:$0xff] %v8771_v55  ;;  %7012 = vrot.lane.b32.xlu0 %v7011_v11, %s8034_s12  ;;  %v1453_v48 = vmul.f32 %v8580_v25, %v8767_v63 }
 0x1b6   : > { %v8780_v2 = vpop.permute.xlu1 %991  ;;  %v8782_v5 = vpop.permute.xlu0 %1248  ;;  %v7016_v52 = vpack.i.bf16 %v1453_v48, %v1452_v39 }
 0x1b7   : > { %v8786_v29 = vsel %vm1003_vm9, %v990_v46, %v8780_v2  ;;  %v8790_v14 = vsel %vm790_vm6, %v1247_v49, %v8782_v5 }
 0x1b8   : > { %1017 = vst [vmem:[#allocation3 + $0xb0] sm:$0xff] %v8786_v29  ;;  %1268 = vst [vmem:[#allocation3 + $0x1e8] sm:$0xff] %v8790_v14  ;;  %7017 = vrot.lane.b32.xlu0 %v7016_v52, %s8034_s12  ;;  %v1461_v34 = vmul.f32 %v8580_v25, %v8786_v29 }
 0x1ba   : > { %v824_v36 = vpop.permute.xlu1 %823  ;;  %v1109_v53 = vpop.permute.xlu0 %1108  ;;  %v7021_v43 = vpack.i.bf16 %v1461_v34, %v1460_v15  ;;  %v3586_v15 = vmul.f32 %v8542_v45, %v8732_v37 }
 0x1bb   : > { %v833_v46 = vsel %vm829_vm11, %v822_v12, %v824_v36 }
 0x1bc   : > { %845 = vst [vmem:[#allocation3 + $0x30] sm:$0xf] %v833_v46  ;;  %7022 = vrot.lane.b32.xlu1 %v7021_v43, %s8034_s12 }
 0x1be   : > { %v911_v49 = vpop.permute.xlu1 %910  ;;  %v1181_v44 = vpop.permute.xlu0 %1180 }
 0x1bf   : > { %v920_v6 = vsel %vm916_vm10, %v909_v50, %v911_v49 }
 0x1c0   : > { %932 = vst [vmem:[#allocation3 + $0x80] sm:$0xf] %v920_v6 }
 0x1c2   : > { %v998_v11 = vpop.permute.xlu1 %997  ;;  %v1253_v39 = vpop.permute.xlu0 %1252 }
 0x1c3   : > { %v1007_v48 = vsel %vm1003_vm9, %v8714_v13, %v998_v11  ;;  %v8804_v52 = vld [vmem:[#allocation3 + $0x30] sm:$0xff]  ;;  %v3592_v13 = vmul.f32 %v8542_v45, %v8736_v24 }
 0x1c4   : > { %1019 = vst [vmem:[#allocation3 + $0xd0] sm:$0xf] %v1007_v48  ;;  %v3589_v12 = vmul.f32 %v8542_v45, %v8804_v52 }
 0x1c6   : > { %v826_v34 = vpop.permute.xlu0 %825  ;;  %v7026_v43 = vpack.i.bf16 %v3589_v12, %v3586_v15  ;;  %v8818_v48 = vpop.permute.xlu1 %6982 }
 0x1c7   : > { %v834_v46 = vsel %vm829_vm11, %v824_v36, %v826_v34  ;;  %v8811_v50 = vld [vmem:[#allocation3 + $0x80] sm:$0xff]  ;;  %12426 = vst [vmem:[#allocation17_spill] sm:$0xff] %v8818_v48  ;;  %v3598_v36 = vmul.f32 %v8542_v45, %v8740_v40 }
 0x1c8   : > { %846 = vst [vmem:[#allocation3 + $0x38] sm:$0xf] %v834_v46  ;;  %7027 = vrot.lane.b32.xlu1 %v7026_v43, %s8028_s21  ;;  %v3595_v6 = vmul.f32 %v8542_v45, %v8811_v50 }
 0x1ca   : > { %v913_v22 = vpop.permute.xlu0 %912  ;;  %v7031_v28 = vpack.i.bf16 %v3595_v6, %v3592_v13  ;;  %v4017_v6 = vmul.f32 %v8632_v32, %v8732_v37 }
 0x1cb   : > { %v921_v26 = vsel %vm916_vm10, %v911_v49, %v913_v22  ;;  %v8821_v15 = vld [vmem:[#allocation3 + $0xd0] sm:$0xff] }
 0x1cc   : > { %933 = vst [vmem:[#allocation3 + $0x88] sm:$0xf] %v921_v26  ;;  %7032 = vrot.lane.b32.xlu0 %v7031_v28, %s8028_s21  ;;  %v3601_v12 = vmul.f32 %v8542_v45, %v8821_v15  ;;  %v4020_v26 = vmul.f32 %v8632_v32, %v8804_v52 }
 0x1cd   : > { %v1107_v43 = vpop.permute.xlu1 %1106 }
 0x1ce   : > { %v8830_v46 = vsel %vm964_vm8, %v8745_v31, %v1107_v43  ;;  %1126 = vst.msk [vmem:[#allocation3 + $0x158] sm:$0xff] %vm678_vm4, %v1107_v43  ;;  %v1000_v13 = vpop.permute.xlu0 %999  ;;  %v7036_v49 = vpack.i.bf16 %v3601_v12, %v3598_v36  ;;  %v7041_v12 = vpack.i.bf16 %v4020_v26, %v4017_v6  ;;  %v4026_v43 = vmul.f32 %v8632_v32, %v8811_v50 }
 0x1cf   : > { %1125 = vst [vmem:[#allocation3 + $0x150] sm:$0xff] %v8830_v46  ;;  %v1008_v28 = vsel %vm1003_vm9, %v998_v11, %v1000_v13 }
 0x1d0   : > { %1020 = vst [vmem:[#allocation3 + $0xd8] sm:$0xf] %v1008_v28  ;;  %7037 = vrot.lane.b32.xlu1 %v7036_v49, %s8028_s21  ;;  %v4023_v49 = vmul.f32 %v8632_v32, %v8736_v24 }
 0x1d1   : > { %v1179_v58 = vpop.permute.xlu1 %1178 }
 0x1d2   : > { %v8842_v31 = vsel %vm877_vm7, %v8763_v47, %v1179_v58  ;;  %1198 = vst.msk [vmem:[#allocation3 + $0x1a8] sm:$0xff] %vm678_vm4, %v1179_v58  ;;  %v1111_v36 = vpop.permute.xlu0 %1110  ;;  %v7046_v28 = vpack.i.bf16 %v4026_v43, %v4023_v49  ;;  %v3610_v43 = vmul.f32 %v8542_v45, %v8753_v3 }
 0x1d3   : > { %1197 = vst [vmem:[#allocation3 + $0x1a0] sm:$0xff] %v8842_v31  ;;  %v1116_v11 = vsel %vm964_vm8, %v1109_v53, %v1111_v36 }
 0x1d4   : > { %1127 = vst [vmem:[#allocation3 + $0x170] sm:$0xf] %v1116_v11  ;;  %7042 = vrot.lane.b32.xlu1 %v7041_v12, %s8035_s14 }
 0x1d5   : > { %v1251_v47 = vpop.permute.xlu1 %1250 }
 0x1d6   : > { %v8854_v58 = vsel %vm790_vm6, %v8782_v5, %v1251_v47  ;;  %1270 = vst.msk [vmem:[#allocation3 + $0x1f8] sm:$0xff] %vm678_vm4, %v1251_v47  ;;  %v1183_v26 = vpop.permute.xlu0 %1182 }
 0x1d7   : > { %1269 = vst [vmem:[#allocation3 + $0x1f0] sm:$0xff] %v8854_v58  ;;  %v1188_v53 = vsel %vm877_vm7, %v1181_v44, %v1183_v26  ;;  %v8865_v47 = vld [vmem:[#allocation3 + $0xd8] sm:$0xff] }
 0x1d8   : > { %1199 = vst [vmem:[#allocation3 + $0x1c0] sm:$0xf] %v1188_v53  ;;  %7047 = vrot.lane.b32.xlu1 %v7046_v28, %s8035_s14 }
 0x1d9   : > { %v828_v6 = vpop.permute.xlu1 %827 }
 0x1da   : > { %v835_v12 = vsel %vm829_vm11, %v826_v34, %v828_v6  ;;  %v1255_v11 = vpop.permute.xlu0 %1254 }
 0x1db   : > { %847 = vst.msk [vmem:[#allocation3 + $0x40] sm:$0xf] %vm684_vm5, %v835_v12  ;;  %v1260_v5 = vsel %vm790_vm6, %v1253_v39, %v1255_v11  ;;  %v8863_v18 = vld [vmem:[#allocation3 + $0x170] sm:$0xff]  ;;  %v1465_v39 = vmul.f32 %v8580_v25, %v8865_v47  ;;  %v8879_v12 = vld [vmem:[#allocation3 + $0x38] sm:$0xff] }
 0x1dc   : > { %12427 = vst [vmem:[#allocation18_spill] sm:$0xff] %v8863_v18  ;;  %1271 = vst [vmem:[#allocation3 + $0x210] sm:$0xf] %v1260_v5  ;;  %v3613_v44 = vmul.f32 %v8542_v45, %v8863_v18  ;;  %v1464_v5 = vmul.f32 %v8575_v23, %v8821_v15  ;;  %v1449_v17 = vmul.f32 %v8580_v25, %v8879_v12 }
 0x1dd   : > { %v915_v49 = vpop.permute.xlu1 %914 }
 0x1de   : > { %v922_v28 = vsel %vm916_vm10, %v913_v22, %v915_v49  ;;  %v8872_v34 = vpop.permute.xlu0 %6972  ;;  %v7051_v53 = vpack.i.bf16 %v3613_v44, %v3610_v43  ;;  %v3616_v22 = vmul.f32 %v8542_v45, %v8771_v55 }
 0x1df   : > { %12428 = vst [vmem:[#allocation19_spill] sm:$0xff] %v8872_v34  ;;  %934 = vst.msk [vmem:[#allocation3 + $0x90] sm:$0xf] %vm684_vm5, %v922_v28  ;;  %v8877_v6 = vld [vmem:[#allocation3 + $0x1c0] sm:$0xff]  ;;  %v7076_v28 = vpack.i.bf16 %v1465_v39, %v1464_v5  ;;  %v1448_v34 = vmul.f32 %v8575_v23, %v8804_v52 }
 0x1e0   : > { %12429 = vst [vmem:[#allocation20_spill] sm:$0xff] %v8877_v6  ;;  %7052 = vrot.lane.b32.xlu0 %v7051_v53, %s8028_s21  ;;  %v3619_v43 = vmul.f32 %v8542_v45, %v8877_v6 }
 0x1e1   : > { %v1002_v44 = vpop.permute.xlu1 %1001  ;;  %v7061_v5 = vpack.i.bf16 %v1449_v17, %v1448_v34 }
 0x1e2   : > { %v1009_v49 = vsel %vm1003_vm9, %v1000_v13, %v1002_v44  ;;  %v8889_v41 = vpop.permute.xlu0 %6977  ;;  %v7056_v48 = vpack.i.bf16 %v3619_v43, %v3616_v22  ;;  %v8906_v44 = vld [vmem:[#allocation3 + $0x88] sm:$0xff] }
 0x1e3   : > { %12430 = vst [vmem:[#allocation21_spill] sm:$0xff] %v8889_v41  ;;  %1021 = vst.msk [vmem:[#allocation3 + $0xe0] sm:$0xf] %vm684_vm5, %v1009_v49  ;;  %v8894_v53 = vld [vmem:[#allocation3 + $0x210] sm:$0xff]  ;;  %v1457_v49 = vmul.f32 %v8580_v25, %v8906_v44 }
 0x1e4   : > { %12431 = vst [vmem:[#allocation22_spill] sm:$0xff] %v8894_v53  ;;  %7077 = vrot.lane.b32.xlu0 %v7076_v28, %s8034_s12  ;;  %7057 = vrot.lane.b32.xlu1 %v7056_v48, %s8028_s21  ;;  %v3625_v22 = vmul.f32 %v8542_v45, %v8894_v53  ;;  %v3622_v48 = vmul.f32 %v8542_v45, %v8790_v14  ;;  %v8918_v28 = vld [vmem:[#allocation3 + $0x1f8] sm:$0xff] }
 0x1e5   : > { %v1113_v19 = vpop.permute.xlu1 %1112  ;;  %v1456_v45 = vmul.f32 %v8575_v23, %v8811_v50 }
 0x1e6   : > { %v1117_v13 = vsel %vm964_vm8, %v1111_v36, %v1113_v19  ;;  %1129 = vst.msk [vmem:[#allocation3 + $0x180] sm:$0xf] %vm684_vm5, %v1113_v19  ;;  %v820_v39 = vpop.permute.xlu0 %819  ;;  %v7066_v34 = vpack.i.bf16 %v3625_v22, %v3622_v48  ;;  %v2908_v22 = vmul.f32 %v8455_v51, %v8918_v28  ;;  %v2859_v48 = vmul.f32 %v8670_v62, %v8749_v1  ;;  %v9061_v41 = vld [vmem:[#allocation3 + $0x90] sm:$0xff] }
 0x1e7   : > { %1128 = vst [vmem:[#allocation3 + $0x178] sm:$0xf] %v1117_v13  ;;  %v832_v43 = vsel %vm829_vm11, %v8743_v61, %v820_v39  ;;  %vm2082_vm8 = vcmask 367616   ;;  %vm5389_vm11 = vcmask 1045504  }
 0x1e8   : > { %844 = vst.msk [vmem:[#allocation3 + $0x18] sm:$0xff] %vm678_vm4, %v832_v43  ;;  %7062 = vrot.lane.b32.xlu1 %v7061_v5, %s8034_s12  ;;  %v7071_v5 = vpack.i.bf16 %v1457_v49, %v1456_v45  ;;  %v3587_v49 = vmul.f32 %v8698_v57, %v8749_v1 }
 0x1e9   : > { %v1185_v36 = vpop.permute.xlu1 %1184 }
 0x1ea   : > { %v1189_v19 = vsel %vm877_vm7, %v1183_v26, %v1185_v36  ;;  %1201 = vst.msk [vmem:[#allocation3 + $0x1d0] sm:$0xf] %vm684_vm5, %v1185_v36  ;;  %v907_v17 = vpop.permute.xlu0 %906  ;;  %vm2346_vm7 = vcmask 760832  }
 0x1eb   : > { %1200 = vst [vmem:[#allocation3 + $0x1c8] sm:$0xf] %v1189_v19  ;;  %v919_v61 = vsel %vm916_vm10, %v8761_v56, %v907_v17  ;;  %vm5382_vm10 = vcmask 48128  }
 0x1ec   : > { %931 = vst.msk [vmem:[#allocation3 + $0x68] sm:$0xff] %vm678_vm4, %v919_v61  ;;  %7067 = vrot.lane.b32.xlu1 %v7066_v34, %s8028_s21  ;;  %v2867_v61 = vmul.f32 %v8670_v62, %v8767_v63 }
 0x1ed   : > { %v1257_v26 = vpop.permute.xlu1 %1256 }
 0x1ee   : > { %v1261_v13 = vsel %vm790_vm6, %v1255_v11, %v1257_v26  ;;  %1273 = vst.msk [vmem:[#allocation3 + $0x220] sm:$0xf] %vm684_vm5, %v1257_v26  ;;  %v994_v39 = vpop.permute.xlu0 %993  ;;  %v2907_v11 = vmul.f32 %v8670_v62, %v8854_v58  ;;  %vm1670_vm6 = vcmask 326656  }
 0x1ef   : > { %1272 = vst [vmem:[#allocation3 + $0x218] sm:$0xf] %v1261_v13  ;;  %v1006_v56 = vsel %vm1003_vm9, %v8780_v2, %v994_v39  ;;  %v8930_v43 = vld [vmem:[#allocation3 + $0x18] sm:$0xff]  ;;  %vm8038_vm9 = vmmov 0  }
 0x1f0   : > { %1018 = vst.msk [vmem:[#allocation3 + $0xb8] sm:$0xff] %vm678_vm4, %v1006_v56  ;;  %7072 = vrot.lane.b32.xlu1 %v7071_v5, %s8034_s12  ;;  %v2860_v36 = vmul.f32 %v8455_v51, %v8930_v43  ;;  %v7106_v19 = vpack.i.bf16 %v2908_v22, %v2907_v11  ;;  %v3588_v2 = vmul.f32 %v8686_v59, %v8930_v43  ;;  %v8956_v22 = vld [vmem:[#allocation3 + $0x158] sm:$0xff] }
 0x1f1   : > { %v3599_v5 = vmul.f32 %v8698_v57, %v8786_v29  ;;  %v2875_v11 = vmul.f32 %v8670_v62, %v8786_v29 }
 0x1f2   : > { %v7081_v17 = vpack.i.bf16 %v2860_v36, %v2859_v48  ;;  %v7111_v26 = vpack.i.bf16 %v3588_v2, %v3587_v49  ;;  %v2892_v2 = vmul.f32 %v8455_v51, %v8956_v22  ;;  %v8970_v49 = vld [vmem:[#allocation3 + $0x1a8] sm:$0xff] }
 0x1f3   : > { %v8942_v34 = vld [vmem:[#allocation3 + $0x68] sm:$0xff]  ;;  %12432 = vst [vmem:[#allocation23_spill] sm:$0xff] %v8970_v49 }
 0x1f4   : > { %7107 = vrot.lane.b32.xlu1 %v7106_v19, %s8029_s25  ;;  %7082 = vrot.lane.b32.xlu0 %v7081_v17, %s8029_s25  ;;  %v2868_v45 = vmul.f32 %v8455_v51, %v8942_v34  ;;  %v3612_v17 = vmul.f32 %v8686_v59, %v8956_v22 }
 0x1f6   : > { %v7086_v13 = vpack.i.bf16 %v2868_v45, %v2867_v61  ;;  %v3611_v61 = vmul.f32 %v8698_v57, %v8830_v46  ;;  %v2891_v45 = vmul.f32 %v8670_v62, %v8830_v46 }
 0x1f7   : > { %v8952_v39 = vld [vmem:[#allocation3 + $0xb8] sm:$0xff] }
 0x1f8   : > { %7112 = vrot.lane.b32.xlu1 %v7111_v26, %s8028_s21  ;;  %7087 = vrot.lane.b32.xlu0 %v7086_v13, %s8029_s25  ;;  %v3600_v56 = vmul.f32 %v8686_v59, %v8952_v39  ;;  %v2876_v48 = vmul.f32 %v8455_v51, %v8952_v39  ;;  %v7126_v26 = vpack.i.bf16 %v3612_v17, %v3611_v61 }
 0x1f9   : > { %v7096_v13 = vpack.i.bf16 %v2892_v2, %v2891_v45  ;;  %v3624_v17 = vmul.f32 %v8686_v59, %v8918_v28  ;;  %v3594_v2 = vmul.f32 %v8686_v59, %v8942_v34  ;;  %v3623_v61 = vmul.f32 %v8698_v57, %v8854_v58 }
 0x1fa   : > { %v7121_v36 = vpack.i.bf16 %v3600_v56, %v3599_v5  ;;  %v7091_v19 = vpack.i.bf16 %v2876_v48, %v2875_v11  ;;  %v3618_v5 = vmul.f32 %v8686_v59, %v8970_v49  ;;  %v2900_v56 = vmul.f32 %v8455_v51, %v8970_v49 }
 0x1fb   : > { %v3617_v11 = vmul.f32 %v8698_v57, %v8842_v31  ;;  %v2899_v48 = vmul.f32 %v8670_v62, %v8842_v31  ;;  %v3593_v45 = vmul.f32 %v8698_v57, %v8767_v63 }
 0x1fc   : > { %7122 = vrot.lane.b32.xlu1 %v7121_v36, %s8028_s21  ;;  %7092 = vrot.lane.b32.xlu0 %v7091_v19, %s8029_s25 }
 0x1fd   : > { %v7131_v36 = vpack.i.bf16 %v3618_v5, %v3617_v11  ;;  %v7101_v19 = vpack.i.bf16 %v2900_v56, %v2899_v48  ;;  %v1477_v5 = vmul.f32 %v8580_v25, %v8830_v46  ;;  %v1485_v56 = vmul.f32 %v8580_v25, %v8842_v31  ;;  %v9002_v11 = vld [vmem:[#allocation3 + $0x180] sm:$0xff] }
 0x1fe   : > { %v1476_v48 = vmul.f32 %v8575_v23, %v8753_v3 }
 0x200   : > { %7127 = vrot.lane.b32.xlu1 %v7126_v26, %s8028_s21  ;;  %7097 = vrot.lane.b32.xlu0 %v7096_v13, %s8029_s25  ;;  %v7136_v26 = vpack.i.bf16 %v3624_v17, %v3623_v61  ;;  %v7116_v13 = vpack.i.bf16 %v3594_v2, %v3593_v45  ;;  %v1493_v2 = vmul.f32 %v8580_v25, %v8854_v58 }
 0x201   : > { %v1482_v61 = vmul.f32 %v8569_v42, %v9002_v11  ;;  %v1492_v45 = vmul.f32 %v8575_v23, %v8790_v14 }
 0x204   : > { %7132 = vrot.lane.b32.xlu1 %v7131_v36, %s8028_s21  ;;  %7102 = vrot.lane.b32.xlu0 %v7101_v19, %s8029_s25  ;;  %v1484_v36 = vmul.f32 %v8575_v23, %v8771_v55  ;;  %v7141_v19 = vpack.i.bf16 %v1477_v5, %v1476_v48  ;;  %v7151_v5 = vpack.i.bf16 %v1493_v2, %v1492_v45 }
 0x206   : > { %v7146_v17 = vpack.i.bf16 %v1485_v56, %v1484_v36 }
 0x208   : > { %7137 = vrot.lane.b32.xlu1 %v7136_v26, %s8028_s21  ;;  %7117 = vrot.lane.b32.xlu0 %v7116_v13, %s8028_s21  ;;  %v1478_v26 = vmul.f32 %v8569_v42, %v8956_v22  ;;  %v9023_v13 = vsel %vm2580_vm15, %v8630_v16, %v8645_v33 }
 0x209   : > { %12433 = vst [vmem:[#allocation24_spill] sm:$0xff] %v9023_v13  ;;  %v4019_v48 = vmul.f32 %v9023_v13, %v8930_v43  ;;  %v4040_v36 = vmul.f32 %v9023_v13, %v8659_v54  ;;  %v4025_v54 = vmul.f32 %v9023_v13, %v8942_v34 }
 0x20a   : > { %v7201_v56 = vpack.i.bf16 %v1482_v61, %v1478_v26  ;;  %v9046_v26 = vld [vmem:[#allocation3 + $0x40] sm:$0xff] }
 0x20c   : > { %7142 = vrot.lane.b32.xlu1 %v7141_v19, %s8034_s12  ;;  %7147 = vrot.lane.b32.xlu0 %v7146_v17, %s8034_s12  ;;  %v9032_v19 = vsel %vm2580_vm15, %v8632_v32, %v8630_v16  ;;  %v9034_v17 = vld [vmem:[#allocation3 + $0x1d0] sm:$0xff] }
 0x20d   : > { %12434 = vst [vmem:[#allocation25_spill] sm:$0xff] %v9032_v19  ;;  %v4018_v33 = vmul.f32 %v9032_v19, %v8749_v1  ;;  %v4039_v2 = vmul.f32 %v9032_v19, %v8567_v4  ;;  %v1490_v16 = vmul.f32 %v8569_v42, %v9034_v17 }
 0x20f   : > { %v7156_v61 = vpack.i.bf16 %v4019_v48, %v4018_v33  ;;  %v7211_v45 = vpack.i.bf16 %v4040_v36, %v4039_v2  ;;  %v9057_v48 = vld [vmem:[%s12144_s2 + $0x2] ss:$8 sm:$0x7]  ;;  %v2864_v2 = vmul.f32 %v8455_v51, %v9046_v26 }
 0x210   : > { %7152 = vrot.lane.b32.xlu1 %v7151_v5, %s8034_s12  ;;  %7202 = vrot.lane.b32.xlu0 %v7201_v56, %s8034_s12  ;;  %v4024_v5 = vmul.f32 %v9032_v19, %v8767_v63  ;;  %v1486_v56 = vmul.f32 %v8569_v42, %v8970_v49 }
 0x212   : > { %v7161_v36 = vpack.i.bf16 %v4025_v54, %v4024_v5  ;;  %v7221_v33 = vpack.i.bf16 %v1490_v16, %v1486_v56  ;;  %v2872_v54 = vmul.f32 %v8455_v51, %v9061_v41  ;;  %v4044_v16 = vmul.f32 %v8632_v32, %v8863_v18  ;;  %v9073_v5 = vld [vmem:[#allocation3 + $0xe0] sm:$0xff] }
 0x213   : > { %12435 = vst [vmem:[#allocation26_spill] sm:$0xff] %v9073_v5  ;;  %v2871_v56 = vmul.f32 %v8670_v62, %v8906_v44  ;;  %v4049_v18 = vmul.f32 %v9023_v13, %v8970_v49 }
 0x214   : > { %7157 = vrot.lane.b32.xlu1 %v7156_v61, %s8035_s14  ;;  %7212 = vrot.lane.b32.xlu0 %v7211_v45, %s8035_s14  ;;  %v2863_v61 = vmul.f32 %v8670_v62, %v8879_v12  ;;  %v2335_v45 = vrot.slane %v9057_v48, %v8130_v8 }
 0x216   : > { %v7166_v23 = vpack.i.bf16 %v2864_v2, %v2863_v61  ;;  %v2880_v61 = vmul.f32 %v8455_v51, %v9073_v5  ;;  %v9121_v5 = vld [vmem:[#allocation3 + $0x1c8] sm:$0xff] }
 0x218   : > { %7162 = vrot.lane.b32.xlu1 %v7161_v36, %s8035_s14  ;;  %7222 = vrot.lane.b32.xlu0 %v7221_v33, %s8034_s12  ;;  %v4041_v36 = vmul.f32 %v8632_v32, %v8753_v3  ;;  %v7171_v33 = vpack.i.bf16 %v2872_v54, %v2871_v56  ;;  %v4050_v56 = vmul.f32 %v8632_v32, %v8877_v6 }
 0x21a   : > { %v7231_v2 = vpack.i.bf16 %v4044_v16, %v4041_v36  ;;  %v4031_v16 = vmul.f32 %v9023_v13, %v8952_v39  ;;  %v9095_v36 = vld [vmem:[#allocation3 + $0x178] sm:$0xff] }
 0x21c   : > { %7167 = vrot.lane.b32.xlu1 %v7166_v23, %s8029_s25  ;;  %2342 = vrot.lane.b32.xlu0 %v2335_v45, %s8035_s14  ;;  %v2879_v23 = vmul.f32 %v8670_v62, %v8865_v47  ;;  %v4048_v45 = vmul.f32 %v9032_v19, %v8842_v31 }
 0x21e   : > { %v7176_v25 = vpack.i.bf16 %v2880_v61, %v2879_v23  ;;  %v7241_v54 = vpack.i.bf16 %v4049_v18, %v4048_v45  ;;  %v4030_v18 = vmul.f32 %v9032_v19, %v8786_v29  ;;  %v9111_v61 = vsel %vm1350_vm0, %v8643_v30, %v8654_v35 }
 0x21f   : > { %v1362_v49 = vmul.f32 %v9111_v61, %v8804_v52 }
 0x220   : > { %7172 = vrot.lane.b32.xlu1 %v7171_v33, %s8029_s25  ;;  %7232 = vrot.lane.b32.xlu0 %v7231_v2, %s8035_s14  ;;  %v9100_v33 = vsel %vm1350_vm0, %v8654_v35, %v8652_v10  ;;  %v4047_v2 = vmul.f32 %v8632_v32, %v8771_v55  ;;  %v7181_v45 = vpack.i.bf16 %v4031_v16, %v4030_v18 }
 0x221   : > { %12436 = vst [vmem:[#allocation27_spill] sm:$0xff] %v9100_v33  ;;  %v1363_v23 = vmul.f32 %v9100_v33, %v8879_v12  ;;  %v2903_v16 = vmul.f32 %v8670_v62, %v9121_v5  ;;  %v4055_v18 = vmul.f32 %v9023_v13, %v8918_v28 }
 0x222   : > { %v7246_v6 = vpack.i.bf16 %v4050_v56, %v4047_v2  ;;  %v2904_v56 = vmul.f32 %v8455_v51, %v9034_v17  ;;  %v4054_v2 = vmul.f32 %v9032_v19, %v8854_v58 }
 0x223   : > { %v7256_v35 = vpack.i.bf16 %v1363_v23, %v1362_v49  ;;  %v4032_v23 = vmul.f32 %v8632_v32, %v8821_v15 }
 0x224   : > { %7177 = vrot.lane.b32.xlu1 %v7176_v25, %s8029_s25  ;;  %7242 = vrot.lane.b32.xlu0 %v7241_v54, %s8035_s14  ;;  %v2895_v25 = vmul.f32 %v8670_v62, %v9095_v36  ;;  %v2896_v54 = vmul.f32 %v8455_v51, %v9002_v11  ;;  %v7266_v49 = vpack.i.bf16 %v4055_v18, %v4054_v2  ;;  %v9149_v18 = vld [vmem:[#allocation3 + $0x218] sm:$0xff]  ;;  %v9151_v2 = vld [vmem:[#allocation3 + $0x220] sm:$0xff] }
 0x226   : > { %v7186_v10 = vpack.i.bf16 %v2896_v54, %v2895_v25  ;;  %v4053_v25 = vmul.f32 %v8632_v32, %v8790_v14 }
 0x228   : > { %7182 = vrot.lane.b32.xlu1 %v7181_v45, %s8035_s14  ;;  %7247 = vrot.lane.b32.xlu0 %v7246_v6, %s8035_s14  ;;  %v7191_v6 = vpack.i.bf16 %v2904_v56, %v2903_v16  ;;  %v4056_v45 = vmul.f32 %v8632_v32, %v8894_v53  ;;  %v4037_v16 = vmul.f32 %v9023_v13, %v8662_v60 }
 0x229   : > { %v1371_v56 = vmul.f32 %v9100_v33, %v8906_v44  ;;  %v1370_v60 = vmul.f32 %v9111_v61, %v8811_v50  ;;  %v2911_v53 = vmul.f32 %v8670_v62, %v9149_v18 }
 0x22c   : > { %7187 = vrot.lane.b32.xlu1 %v7186_v10, %s8029_s25  ;;  %7257 = vrot.lane.b32.xlu0 %v7256_v35, %s8036_s23  ;;  %v4029_v10 = vmul.f32 %v8632_v32, %v8740_v40  ;;  %v7271_v35 = vpack.i.bf16 %v4056_v45, %v4053_v25  ;;  %v4038_v45 = vmul.f32 %v8632_v32, %v8565_v21 }
 0x22d   : > { %v7281_v25 = vpack.i.bf16 %v1371_v56, %v1370_v60  ;;  %v1375_v60 = vmul.f32 %v9100_v33, %v8786_v29 }
 0x22e   : > { %v7196_v54 = vpack.i.bf16 %v4032_v23, %v4029_v10 }
 0x230   : > { %7192 = vrot.lane.b32.xlu1 %v7191_v6, %s8029_s25  ;;  %7267 = vrot.lane.b32.xlu0 %v7266_v49, %s8035_s14  ;;  %v9153_v6 = vpop.permute.xlu1 %6997  ;;  %v9157_v49 = vld [vmem:[#allocation3 + $0x100] sm:$0xff] }
 0x231   : > { %12437 = vst [vmem:[#allocation28_spill] sm:$0xff] %v9153_v6  ;;  %v4036_v23 = vmul.f32 %v9157_v49, %v9032_v19 }
 0x233   : > { %v7206_v10 = vpack.i.bf16 %v4037_v16, %v4036_v23  ;;  %v5702_v16 = vld [vmem:[%s12147_s5 + $0x30] sm:$0xff] }
 0x234   : > { %7197 = vrot.lane.b32.xlu1 %v7196_v54, %s8035_s14  ;;  %7272 = vrot.lane.b32.xlu0 %v7271_v35, %s8035_s14  ;;  %v2912_v54 = vmul.f32 %v8455_v51, %v9151_v2  ;;  %v9171_v35 = vld [vmem:[#allocation3 + $0xf8] sm:$0xff]  ;;  %v9178_v56 = vpop.permute.xlu1 %7002  ;;  %v4043_v51 = vmul.f32 %v9023_v13, %v8956_v22 }
 0x235   : > { %v4035_v6 = vmul.f32 %v9171_v35, %v8632_v32  ;;  %12438 = vst [vmem:[#allocation29_spill] sm:$0xff] %v9178_v56  ;;  %6068 = vmatprep.mubr.msk.f32.mxu1 %vm1755_vm2, %v5702_v16  ;;  %v4042_v32 = vmul.f32 %v9032_v19, %v8830_v46 }
 0x236   : > { %v7291_v23 = vpack.i.bf16 %v2912_v54, %v2911_v53  ;;  %v1374_v53 = vmul.f32 %v9111_v61, %v8740_v40  ;;  %v9195_v54 = vld [vmem:[#allocation2] sm:$0xff] }
 0x237   : > { %v7216_v62 = vpack.i.bf16 %v4038_v45, %v4035_v6  ;;  %v7226_v45 = vpack.i.bf16 %v4043_v51, %v4042_v32  ;;  %12441 = vst [vmem:[#allocation32_spill] sm:$0xff] %v9195_v54  ;;  %v1373_v16 = vmul.f32 %v9195_v54, %v8643_v30  ;;  %v1386_v51 = vmul.f32 %v9111_v61, %v8565_v21 }
 0x238   : > { %7207 = vrot.lane.b32.xlu1 %v7206_v10, %s8035_s14  ;;  %7282 = vrot.lane.b32.xlu0 %v7281_v25, %s8036_s23  ;;  %v9185_v10 = vpop.permute.xlu0 %6987  ;;  %v9193_v6 = vpop.permute.xlu1 %7022  ;;  %v7296_v25 = vpack.i.bf16 %v1375_v60, %v1374_v53  ;;  %v1387_v60 = vmul.f32 %v9100_v33, %v8567_v4  ;;  %v2339_v30 = vrot.slane %v9057_v48, %v8132_v9 }
 0x239   : > { %12439 = vst [vmem:[#allocation30_spill] sm:$0xff] %v9185_v10  ;;  %12440 = vst [vmem:[#allocation31_spill] sm:$0xff] %v9193_v6  ;;  %v9207_v40 = vpack.i.bf16 %v1373_v16, %v1373_v16  ;;  %v1391_v21 = vmul.f32 %v9100_v33, %v8830_v46  ;;  %v1494_v4 = vmul.f32 %v8569_v42, %v8918_v28 }
 0x23a   : > { %v7316_v53 = vpack.i.bf16 %v1387_v60, %v1386_v51  ;;  %v1359_v51 = vmul.f32 %v9100_v33, %v8749_v1 }
 0x23c   : > { %7217 = vrot.lane.b32.xlu1 %v7216_v62, %s8035_s14  ;;  %7292 = vrot.lane.b32.xlu0 %v7291_v23, %s8029_s25  ;;  %v2331_v62 = vrot.slane %v9057_v48, %v8128_v7  ;;  %v9203_v23 = vpop.permute.xlu0 %6992  ;;  %v9205_v56 = vpop.permute.xlu1 %7027  ;;  %v1390_v48 = vmul.f32 %v9111_v61, %v8753_v3  ;;  %v1407_v3 = vmul.f32 %v9100_v33, %v8854_v58 }
 0x23d   : > { %12442 = vst [vmem:[#allocation33_spill] sm:$0xff] %v9203_v23  ;;  %12443 = vst [vmem:[#allocation34_spill] sm:$0xff] %v9205_v56  ;;  %v1366_v58 = vmul.f32 %v9111_v61, %v8736_v24 }
 0x240   : > { %7227 = vrot.lane.b32.xlu1 %v7226_v45, %s8035_s14  ;;  %7297 = vrot.lane.b32.xlu0 %v7296_v25, %s8036_s23  ;;  %v1498_v45 = vmul.f32 %v8569_v42, %v9151_v2  ;;  %v9224_v25 = vpop.permute.xlu0 %7007 }
 0x241   : > { %12445 = vst [vmem:[#allocation36_spill] sm:$0xff] %v9224_v25 }
 0x242   : > { %v9218_v32 = vpop.permute.xlu1 %7037  ;;  %v7236_v16 = vpack.i.bf16 %v1498_v45, %v1494_v4 }
 0x243   : > { %12444 = vst [vmem:[#allocation35_spill] sm:$0xff] %v9218_v32  ;;  %v3590_v32 = vmul.f32 %v8698_v57, %v8879_v12 }
 0x244   : > { %2340 = vrot.lane.b32.xlu1 %v2331_v62, %s8035_s14  ;;  %7307 = vrot.lane.b32.xlu0 %v9207_v40, %s8036_s23  ;;  %v7326_v62 = vpack.i.bf16 %v1391_v21, %v1390_v48  ;;  %v9234_v60 = vpop.permute.xlu0 %7012  ;;  %v1367_v48 = vmul.f32 %v9100_v33, %v8767_v63 }
 0x245   : > { %12446 = vst [vmem:[#allocation37_spill] sm:$0xff] %v9234_v60  ;;  %v12454_v56 = vunpack.i.h.bf16 %v9234_v60 }
 0x246   : > { %v9236_v46 = vpop.permute.xlu1 %7042 }
 0x247   : > { %12447 = vst [vmem:[#allocation38_spill] sm:$0xff] %v9236_v46  ;;  %v1382_v46 = vmul.f32 %v9171_v35, %v9111_v61 }
 0x248   : > { %2344 = vrot.lane.b32.xlu1 %v2339_v30, %s8035_s14  ;;  %7317 = vrot.lane.b32.xlu0 %v7316_v53, %s8036_s23  ;;  %v1358_v30 = vmul.f32 %v9111_v61, %v8732_v37  ;;  %v1406_v53 = vmul.f32 %v9111_v61, %v8790_v14  ;;  %v9249_v45 = vpop.permute.xlu0 %7017  ;;  %v9265_v14 = vld [vmem:[%s12144_s2 + $0x18] ss:$8 sm:$0x7] }
 0x249   : > { %12448 = vst [vmem:[#allocation39_spill] sm:$0xff] %v9249_v45 }
 0x24a   : > { %v7251_v28 = vpack.i.bf16 %v1359_v51, %v1358_v30  ;;  %v9251_v21 = vpop.permute.xlu1 %7047  ;;  %v7346_v4 = vpack.i.bf16 %v1407_v3, %v1406_v53  ;;  %v7276_v51 = vpack.i.bf16 %v1367_v48, %v1366_v58  ;;  %v4859_v30 = vrot.slane %v9265_v14, %v8128_v7 }
 0x24b   : > { %12449 = vst [vmem:[#allocation40_spill] sm:$0xff] %v9251_v21  ;;  %v7014_v3 = vunpack.i.l.bf16 %v9234_v60  ;;  %v1379_v48 = vmul.f32 %v9100_v33, %v8865_v47  ;;  %v3591_v58 = vmul.f32 %v8686_v59, %v9046_v26 }
 0x24c   : > { %7237 = vrot.lane.b32.xlu1 %v7236_v16, %s8034_s12  ;;  %7327 = vrot.lane.b32.xlu0 %v7326_v62, %s8036_s23  ;;  %v9260_v16 = vpop.permute.xlu0 %7032 }
 0x24d   : > { %12450 = vst [vmem:[#allocation41_spill] sm:$0xff] %v9260_v16  ;;  %v1672_v25 = vsel %vm1670_vm6, %v7014_v3, %v12454_v56  ;;  %v7356_v19 = vpack.i.bf16 %v3591_v58, %v3590_v32  ;;  %v9319_v56 = vsel %vm1670_vm6, %v8674_v38, %v8693_v0  ;;  %v4867_v32 = vrot.slane %v9265_v14, %v8132_v9 }
 0x24e   : > { %v1399_v58 = vmul.f32 %v9100_v33, %v8842_v31 }
 0x250   : > { %7252 = vrot.lane.b32.xlu1 %v7251_v28, %s8036_s23  ;;  %7332 = vrot.lane.b32.xlu0 %v9207_v40, %s8036_s23 }
 0x252   : > { %v9276_v53 = vpop.permute.xlu0 %7052 }
 0x253   : > { %12452 = vst [vmem:[#allocation43_spill] sm:$0xff] %v9276_v53  ;;  %v1378_v53 = vmul.f32 %v9111_v61, %v8821_v15 }
 0x254   : > { %7262 = vrot.lane.b32.xlu1 %v9207_v40, %s8036_s23  ;;  %7347 = vrot.lane.b32.xlu0 %v7346_v4, %s8036_s23  ;;  %v6940_v4 = vunpack.i.h.bf16 %v8717_v20 }
 0x255   : > { %v7301_v7 = vpack.i.bf16 %v1379_v48, %v1378_v53 }
 0x256   : > { %v9267_v62 = vpop.permute.xlu1 %7057 }
 0x257   : > { %12451 = vst [vmem:[#allocation42_spill] sm:$0xff] %v9267_v62 }
 0x258   : > { %7277 = vrot.lane.b32.xlu1 %v7276_v51, %s8036_s23  ;;  %7352 = vrot.lane.b32.xlu0 %v9207_v40, %s8036_s23  ;;  %v6939_v51 = vunpack.i.l.bf16 %v8717_v20  ;;  %v1383_v20 = vmul.f32 %v9157_v49, %v9100_v33 }
 0x25a   : > { %v9279_v21 = vpop.permute.xlu1 %7062  ;;  %v1671_v62 = vsel %vm1670_vm6, %v6939_v51, %v7014_v3  ;;  %v9312_v51 = vsel %vm1670_vm6, %v8672_v27, %v8674_v38  ;;  %v7019_v3 = vunpack.i.l.bf16 %v9249_v45 }
 0x25b   : > { %12453 = vst [vmem:[#allocation44_spill] sm:$0xff] %v9279_v21  ;;  %v7064_v28 = vunpack.i.l.bf16 %v9279_v21  ;;  %v12455_v23 = vunpack.i.h.bf16 %v9279_v21 }
 0x25c   : > { %7287 = vrot.lane.b32.xlu1 %v9207_v40, %s8036_s23  ;;  %4868 = vrot.lane.b32.xlu0 %v4859_v30, %s8036_s23 }
 0x25d   : > { %v1674_v16 = vsel %vm1670_vm6, %v6940_v4, %v7064_v28  ;;  %v1675_v30 = vsel %vm1670_vm6, %v7064_v28, %v12455_v23  ;;  %v9314_v4 = vpop.permute.xlu0 %7077  ;;  %v7311_v23 = vpack.i.bf16 %v1383_v20, %v1382_v46  ;;  %v12205_v28 = vunpack.i.h.bf16 %v9249_v45 }
 0x25e   : > { %v9307_v54 = vpop.permute.xlu1 %7067  ;;  %v6344_v12 = vpack.c.bf16 %v1675_v30, %v1672_v25  ;;  %v6346_v13 = vpack.c.bf16 %v1674_v16, %v1671_v62  ;;  %12457 = vst [vmem:[#allocation46_spill] sm:$0xff] %v9314_v4  ;;  %v12458_v25 = vld [vmem:[#allocation12_spill] sm:$0xff]  ;;  %v7079_v0 = vunpack.i.l.bf16 %v9314_v4  ;;  %v4450_v46 = vmul.f32 %v9319_v56, %v8930_v43  ;;  %v12460_v30 = vld [vmem:[#allocation19_spill] sm:$0xff] }
 0x25f   : > { %12456 = vst [vmem:[#allocation45_spill] sm:$0xff] %v9307_v54  ;;  %v6945_v16 = vunpack.i.h.bf16 %v12458_v25  ;;  %v6944_v62 = vunpack.i.l.bf16 %v12458_v25  ;;  %v4451_v20 = vmul.f32 %v8672_v27, %v8804_v52  ;;  %v1678_v52 = vsel %vm1670_vm6, %v7019_v3, %v12205_v28  ;;  %v12466_v28 = vld [vmem:[#allocation17_spill] sm:$0xff] }
 0x260   : > { %7302 = vrot.lane.b32.xlu1 %v7301_v7, %s8036_s23  ;;  %7357 = vrot.lane.b32.xlu0 %v7356_v19, %s8028_s21  ;;  %v4449_v19 = vmul.f32 %v9312_v51, %v8749_v1  ;;  %v7024_v1 = vunpack.i.l.bf16 %v9193_v6 }
 0x261   : > { %6345 = vmatprep.subr.bf16.mxu0 %v6344_v12  ;;  %v6974_v12 = vunpack.i.l.bf16 %v12460_v30  ;;  %v1677_v38 = vsel %vm1670_vm6, %v6944_v62, %v7019_v3  ;;  %v4448_v3 = vmul.f32 %v8672_v27, %v8732_v37 }
 0x262   : > { %6347 = vmatpush1.bf16.msra.mxu0 %v6346_v13  ;;  %v9331_v7 = vpop.permute.xlu1 %7072  ;;  %v7366_v54 = vpack.i.bf16 %v4450_v46, %v4449_v19  ;;  %v1398_v19 = vmul.f32 %v9111_v61, %v8771_v55  ;;  %v4456_v55 = vmul.f32 %v9319_v56, %v8942_v34 }
 0x263   : > { %12459 = vst [vmem:[#allocation12_spill] sm:$0xff] %v9331_v7  ;;  %v7074_v48 = vunpack.i.l.bf16 %v9331_v7  ;;  %v12461_v13 = vunpack.i.h.bf16 %v9331_v7  ;;  %v12469_v7 = vunpack.i.h.bf16 %v12460_v30 }
 0x264   : > { %7312 = vrot.lane.b32.xlu1 %v7311_v23, %s8036_s23  ;;  %4872 = vrot.lane.b32.xlu0 %v4867_v32, %s8036_s23  ;;  %v12464_v32 = vunpack.i.h.bf16 %v9314_v4  ;;  %v12470_v4 = vld [vmem:[#allocation14_spill] sm:$0xff] }
 0x265   : > { %v1680_v53 = vsel %vm1670_vm6, %v6945_v16, %v7074_v48  ;;  %v1681_v21 = vsel %vm1670_vm6, %v7074_v48, %v12461_v13  ;;  %v12465_v16 = vld [vmem:[#allocation11_spill] sm:$0xff]  ;;  %v6984_v48 = vunpack.i.l.bf16 %v12466_v28 }
 0x266   : > { %v9357_v60 = vpop.permute.xlu1 %7107  ;;  %v9359_v25 = vpop.permute.xlu0 %7082  ;;  %v6348_v23 = vpack.c.bf16 %v1681_v21, %v1678_v52  ;;  %v6350_v33 = vpack.c.bf16 %v1680_v53, %v1677_v38  ;;  %v1687_v62 = vsel %vm1670_vm6, %v7079_v0, %v12464_v32  ;;  %v6950_v9 = vunpack.i.h.bf16 %v12465_v16 }
 0x267   : > { %12462 = vst [vmem:[#allocation19_spill] sm:$0xff] %v9357_v60  ;;  %12463 = vst [vmem:[#allocation47_spill] sm:$0xff] %v9359_v25  ;;  %v12467_v21 = vunpack.i.h.bf16 %v9193_v6  ;;  %v6949_v46 = vunpack.i.l.bf16 %v12465_v16  ;;  %v7336_v32 = vpack.i.bf16 %v1399_v58, %v1398_v19  ;;  %v6954_v16 = vunpack.i.l.bf16 %v12470_v4  ;;  %v12488_v6 = vld [vmem:[#allocation9_spill] sm:$0xff] }
 0x268   : > { %7322 = vrot.lane.b32.xlu1 %v9207_v40, %s8036_s23  ;;  %7367 = vrot.lane.b32.xlu0 %v7366_v54, %s8030_s26  ;;  %v1686_v37 = vsel %vm1670_vm6, %v6950_v9, %v7079_v0  ;;  %v7371_v54 = vpack.i.bf16 %v4451_v20, %v4448_v3  ;;  %v12471_v0 = vunpack.i.h.bf16 %v12466_v28  ;;  %v6955_v20 = vunpack.i.h.bf16 %v12470_v4 }
 0x269   : > { %v1684_v38 = vsel %vm1670_vm6, %v7024_v1, %v12467_v21  ;;  %6349 = vmatprep.subr.bf16.mxu0 %v6348_v23  ;;  %v1690_v21 = vsel %vm1670_vm6, %v6974_v12, %v12469_v7  ;;  %v1683_v9 = vsel %vm1670_vm6, %v6949_v46, %v7024_v1  ;;  %v4455_v7 = vmul.f32 %v9312_v51, %v8767_v63 }
 0x26a   : > { %v6352_v53 = vpack.c.bf16 %v1687_v62, %v1684_v38  ;;  %6351 = vmatpush1.bf16.msra.mxu0 %v6350_v33  ;;  %v9379_v13 = vpop.permute.xlu1 %7112  ;;  %v9381_v52 = vpop.permute.xlu0 %7087  ;;  %v6354_v33 = vpack.c.bf16 %v1686_v37, %v1683_v9  ;;  %v1693_v58 = vsel %vm1670_vm6, %v6984_v48, %v12471_v0  ;;  %v1689_v23 = vsel %vm1670_vm6, %v6954_v16, %v6974_v12  ;;  %v9431_v16 = vld [vmem:[#allocation3 + $0x130] sm:$0xff]  ;;  %v12477_v9 = vld [vmem:[#allocation10_spill] sm:$0xff] }
 0x26b   : > { %12468 = vst [vmem:[#allocation11_spill] sm:$0xff] %v9381_v52  ;;  %v6356_v62 = vpack.c.bf16 %v1693_v58, %v1690_v21  ;;  %v7376_v38 = vpack.i.bf16 %v4456_v55, %v4455_v7  ;;  %v3597_v19 = vmul.f32 %v8686_v59, %v9061_v41  ;;  %v4457_v46 = vmul.f32 %v8672_v27, %v8811_v50  ;;  %v9443_v58 = vld [vmem:[#allocation3 + $0xa8] sm:$0xff] }
 0x26c   : > { %6353 = vmatprep.subr.bf16.mxu0 %v6352_v53  ;;  %7337 = vrot.lane.b32.xlu1 %v7336_v32, %s8036_s23  ;;  %v1692_v37 = vsel %vm1670_vm6, %v6955_v20, %v6984_v48  ;;  %v3596_v4 = vmul.f32 %v8698_v57, %v8906_v44  ;;  %v4454_v12 = vmul.f32 %v8672_v27, %v8736_v24 }
 0x26d   : > { %7372 = vrot.lane.b32.xlu0 %v7371_v54, %s8030_s26  ;;  %v6358_v63 = vpack.c.bf16 %v1692_v37, %v1689_v23  ;;  %v4462_v54 = vmul.f32 %v9319_v56, %v8952_v39  ;;  %v4863_v44 = vrot.slane %v9265_v14, %v8130_v8  ;;  %v4461_v24 = vmul.f32 %v9312_v51, %v8786_v29  ;;  %v9439_v14 = vld [vmem:[#allocation3 + $0x108] sm:$0xff] }
 0x26e   : > { %6355 = vmatpush1.bf16.msra.mxu0 %v6354_v33  ;;  %v9399_v1 = vpop.permute.xlu1 %7122  ;;  %v9401_v3 = vpop.permute.xlu0 %7092  ;;  %v7361_v50 = vpack.i.bf16 %v3597_v19, %v3596_v4  ;;  %v7381_v48 = vpack.i.bf16 %v4457_v46, %v4454_v12  ;;  %v1388_v33 = vmul.f32 %v9431_v16, %v12477_v9  ;;  %v4463_v0 = vmul.f32 %v8672_v27, %v8821_v15  ;;  %v12480_v19 = vld [vmem:[#allocation26_spill] sm:$0xff] }
 0x26f   : > { %12472 = vst [vmem:[#allocation17_spill] sm:$0xff] %v9401_v3  ;;  %6357 = vmatprep.subr.bf16.mxu0 %v6356_v62  ;;  %v7391_v55 = vpack.i.bf16 %v4462_v54, %v4461_v24  ;;  %v1384_v29 = vmul.f32 %v9439_v14, %v12477_v9  ;;  %v4460_v7 = vmul.f32 %v9443_v58, %v8672_v27  ;;  %v9471_v24 = vld [vmem:[#allocation3 + $0x128] sm:$0xff] }
 0x270   : > { %7342 = vrot.lane.b32.xlu1 %v9207_v40, %s8036_s23  ;;  %v3603_v46 = vmul.f32 %v8686_v59, %v12480_v19  ;;  %v1392_v37 = vmul.f32 %v12477_v9, %v8956_v22  ;;  %v4471_v54 = vmul.f32 %v9431_v16, %v9319_v56 }
 0x271   : > { %7377 = vrot.lane.b32.xlu0 %v7376_v38, %s8030_s26  ;;  %v7386_v62 = vpack.i.bf16 %v1388_v33, %v1384_v29  ;;  %v7396_v15 = vpack.i.bf16 %v4463_v0, %v4460_v7  ;;  %v1396_v38 = vmul.f32 %v12477_v9, %v9002_v11  ;;  %v3614_v33 = vmul.f32 %v8698_v57, %v9095_v36 }
 0x272   : > { %6359 = vmatpush1.bf16.msra.mxu0 %v6358_v63  ;;  %v9415_v53 = vpop.permute.xlu1 %7127  ;;  %v9417_v32 = vpop.permute.xlu0 %7097  ;;  %v3602_v63 = vmul.f32 %v8698_v57, %v8865_v47  ;;  %v4470_v47 = vmul.f32 %v9471_v24, %v9312_v51  ;;  %v3615_v0 = vmul.f32 %v8686_v59, %v9002_v11 }
 0x273   : > { %12473 = vst [vmem:[#allocation14_spill] sm:$0xff] %v9415_v53  ;;  %12474 = vst [vmem:[#allocation48_spill] sm:$0xff] %v9417_v32 }
 0x274   : > { %7362 = vrot.lane.b32.xlu1 %v7361_v50, %s8028_s21  ;;  %v7401_v50 = vpack.i.bf16 %v1396_v38, %v1392_v37  ;;  %v1404_v38 = vmul.f32 %v12477_v9, %v9034_v17 }
 0x275   : > { %7382 = vrot.lane.b32.xlu0 %v7381_v48, %s8030_s26  ;;  %v7406_v48 = vpack.i.bf16 %v3603_v46, %v3602_v63  ;;  %v12485_v46 = vld [vmem:[#allocation23_spill] sm:$0xff]  ;;  %v7421_v63 = vpack.i.bf16 %v3615_v0, %v3614_v33  ;;  %v12490_v33 = vld [vmem:[#allocation8_spill] sm:$0xff] }
 0x276   : > { %v9427_v40 = vpop.permute.xlu1 %7132  ;;  %v9429_v21 = vpop.permute.xlu0 %7102  ;;  %v1400_v37 = vmul.f32 %v12477_v9, %v12485_v46 }
 0x277   : > { %12475 = vst [vmem:[#allocation49_spill] sm:$0xff] %v9427_v40  ;;  %12476 = vst [vmem:[#allocation50_spill] sm:$0xff] %v9429_v21 }
 0x278   : > { %4870 = vrot.lane.b32.xlu1 %v4863_v44, %s8036_s23  ;;  %v4468_v44 = vmul.f32 %v9439_v14, %v9319_v56 }
 0x279   : > { %7392 = vrot.lane.b32.xlu0 %v7391_v55, %s8030_s26  ;;  %v4467_v55 = vmul.f32 %v9157_v49, %v9312_v51 }
 0x27a   : > { %v9447_v20 = vpop.permute.xlu1 %7137  ;;  %v9449_v23 = vpop.permute.xlu0 %7117 }
 0x27b   : > { %12478 = vst [vmem:[#allocation10_spill] sm:$0xff] %v9447_v20  ;;  %12479 = vst [vmem:[#allocation51_spill] sm:$0xff] %v9449_v23 }
 0x27c   : > { %7387 = vrot.lane.b32.xlu1 %v7386_v62, %s8036_s23  ;;  %v7416_v62 = vpack.i.bf16 %v4471_v54, %v4470_v47  ;;  %v1489_v54 = vmul.f32 %v12488_v6, %v9121_v5  ;;  %v3621_v47 = vmul.f32 %v8686_v59, %v9034_v17  ;;  %v3627_v17 = vmul.f32 %v8686_v59, %v9151_v2 }
 0x27d   : > { %7397 = vrot.lane.b32.xlu0 %v7396_v15, %s8030_s26  ;;  %v7411_v15 = vpack.i.bf16 %v4468_v44, %v4467_v55  ;;  %v3620_v44 = vmul.f32 %v8698_v57, %v9121_v5  ;;  %v12489_v55 = vld [vmem:[#allocation20_spill] sm:$0xff] }
 0x27e   : > { %v9461_v4 = vpop.permute.xlu1 %7142  ;;  %v9463_v12 = vpop.permute.xlu0 %7147  ;;  %v1488_v0 = vmul.f32 %v12490_v33, %v12489_v55 }
 0x27f   : > { %12481 = vst [vmem:[#allocation26_spill] sm:$0xff] %v9461_v4  ;;  %12482 = vst [vmem:[#allocation52_spill] sm:$0xff] %v9463_v12 }
 0x280   : > { %7402 = vrot.lane.b32.xlu1 %v7401_v50, %s8036_s23  ;;  %v7456_v45 = vpack.i.bf16 %v1489_v54, %v1488_v0  ;;  %v4480_v0 = vmul.f32 %v9319_v56, %v12485_v46  ;;  %v7090_v46 = vunpack.i.h.bf16 %v9381_v52 }
 0x281   : > { %7407 = vrot.lane.b32.xlu0 %v7406_v48, %s8028_s21  ;;  %v7441_v48 = vpack.i.bf16 %v1404_v38, %v1400_v37 }
 0x282   : > { %v9481_v29 = vpop.permute.xlu1 %7152  ;;  %v9483_v7 = vpop.permute.xlu0 %7202 }
 0x283   : > { %12483 = vst [vmem:[#allocation53_spill] sm:$0xff] %v9481_v29  ;;  %12484 = vst [vmem:[#allocation54_spill] sm:$0xff] %v9483_v7 }
 0x284   : > { %7417 = vrot.lane.b32.xlu1 %v7416_v62, %s8030_s26  ;;  %v12491_v62 = vld [vmem:[#allocation18_spill] sm:$0xff] }
 0x285   : > { %7412 = vrot.lane.b32.xlu0 %v7411_v15, %s8030_s26  ;;  %v4475_v15 = vmul.f32 %v8672_v27, %v12491_v62  ;;  %v9521_v62 = vld [vmem:[#allocation3 + $0x120] sm:$0xff] }
 0x286   : > { %v9491_v50 = vpop.permute.xlu1 %7157  ;;  %v9493_v11 = vpop.permute.xlu0 %7212  ;;  %v4469_v54 = vmul.f32 %v9521_v62, %v8672_v27 }
 0x287   : > { %12486 = vst [vmem:[#allocation23_spill] sm:$0xff] %v9491_v50  ;;  %12487 = vst [vmem:[#allocation55_spill] sm:$0xff] %v9493_v11  ;;  %v7426_v11 = vpack.i.bf16 %v3621_v47, %v3620_v44  ;;  %v3626_v50 = vmul.f32 %v8698_v57, %v9149_v18  ;;  %v7085_v44 = vunpack.i.h.bf16 %v9359_v25  ;;  %v4479_v57 = vmul.f32 %v9312_v51, %v8842_v31 }
 0x288   : > { %7442 = vrot.lane.b32.xlu1 %v7441_v48, %s8036_s23 }
 0x289   : > { %7422 = vrot.lane.b32.xlu0 %v7421_v63, %s8028_s21  ;;  %v9517_v63 = vld [vmem:[#allocation3 + $0x148] sm:$0xff]  ;;  %v7511_v31 = vpack.i.bf16 %v4480_v0, %v4479_v57  ;;  %v6990_v0 = vunpack.i.h.bf16 %v9185_v10 }
 0x28a   : > { %v9507_v38 = vpop.permute.xlu1 %7162  ;;  %v9509_v37 = vpop.permute.xlu0 %7222  ;;  %v4472_v48 = vmul.f32 %v9517_v63, %v8672_v27 }
 0x28b   : > { %12492 = vst [vmem:[#allocation9_spill] sm:$0xff] %v9507_v38  ;;  %12493 = vst [vmem:[#allocation20_spill] sm:$0xff] %v9509_v37  ;;  %v4466_v37 = vmul.f32 %v9171_v35, %v8672_v27 }
 0x28c   : > { %7457 = vrot.lane.b32.xlu1 %v7456_v45, %s8034_s12  ;;  %v7496_v45 = vpack.i.bf16 %v4475_v15, %v4472_v48  ;;  %v4474_v15 = vmul.f32 %v9319_v56, %v8956_v22 }
 0x28d   : > { %7427 = vrot.lane.b32.xlu0 %v7426_v11, %s8028_s21  ;;  %v7431_v11 = vpack.i.bf16 %v3627_v17, %v3626_v50  ;;  %v7436_v29 = vpack.i.bf16 %v4469_v54, %v4466_v37  ;;  %v4481_v50 = vmul.f32 %v8672_v27, %v12489_v55  ;;  %v12495_v17 = vunpack.i.l.bf16 %v9359_v25  ;;  %v9555_v54 = vld [vmem:[#allocation3 + $0x198] sm:$0xff] }
 0x28e   : > { %v9527_v47 = vpop.permute.xlu1 %7167  ;;  %v9529_v59 = vpop.permute.xlu0 %2342  ;;  %12498 = vst [vmem:[#allocation57_spill] sm:$0xff] %v9555_v54  ;;  %v4478_v55 = vmul.f32 %v9555_v54, %v8672_v27  ;;  %v12500_v25 = vunpack.i.l.bf16 %v9381_v52 }
 0x28f   : > { %12494 = vst [vmem:[#allocation8_spill] sm:$0xff] %v9527_v47  ;;  %v7170_v38 = vunpack.i.h.bf16 %v9527_v47  ;;  %v12218_v7 = vunpack.i.l.bf16 %v9527_v47  ;;  %v3087_v48 = vsel %vm3084_vm14, %v12495_v17, %v7085_v44  ;;  %v9563_v47 = vld [vmem:[#allocation3 + $0x150] sm:$0xff]  ;;  %v1481_v17 = vmul.f32 %v12488_v6, %v9095_v36 }
 0x290   : > { %7497 = vrot.lane.b32.xlu1 %v7496_v45, %s8030_s26  ;;  %v7516_v22 = vpack.i.bf16 %v4481_v50, %v4478_v55 }
 0x291   : > { %7432 = vrot.lane.b32.xlu0 %v7431_v11, %s8028_s21  ;;  %v3090_v45 = vsel %vm3084_vm14, %v12218_v7, %v7170_v38  ;;  %v4473_v38 = vmul.f32 %v9563_v47, %v9312_v51  ;;  %v12499_v7 = vld [vmem:[#allocation28_spill] sm:$0xff] }
 0x292   : > { %v9551_v11 = vpop.permute.xlu1 %7172  ;;  %v9553_v12 = vpop.permute.xlu0 %7232  ;;  %v6540_v37 = vpack.c.bf16 %v3090_v45, %v3087_v48  ;;  %v7000_v57 = vunpack.i.h.bf16 %v12499_v7  ;;  %v7095_v45 = vunpack.i.h.bf16 %v9401_v3 }
 0x293   : > { %12496 = vst [vmem:[#allocation18_spill] sm:$0xff] %v9551_v11  ;;  %12497 = vst [vmem:[#allocation56_spill] sm:$0xff] %v9553_v12  ;;  %v7175_v44 = vunpack.i.h.bf16 %v9551_v11  ;;  %v3093_v12 = vsel %vm3084_vm14, %v12500_v25, %v7090_v46  ;;  %v12501_v4 = vunpack.i.l.bf16 %v9551_v11  ;;  %v7446_v50 = vpack.i.bf16 %v4474_v15, %v4473_v38 }
 0x294   : > { %7512 = vrot.lane.b32.xlu1 %v7511_v31, %s8030_s26  ;;  %6541 = vmatprep.subr.bf16.mxu1 %v6540_v37  ;;  %v12504_v15 = vunpack.i.l.bf16 %v9401_v3  ;;  %v12508_v11 = vunpack.i.l.bf16 %v12499_v7 }
 0x295   : > { %7437 = vrot.lane.b32.xlu0 %v7436_v29, %s8030_s26  ;;  %v3096_v20 = vsel %vm3084_vm14, %v12501_v4, %v7175_v44  ;;  %6543 = vmatpush3.bf16.msra.mxu1 %v6540_v37  ;;  %v9591_v4 = vld [vmem:[#allocation3 + $0x170] sm:$0xff]  ;;  %v12505_v37 = vunpack.i.l.bf16 %v9185_v10 }
 0x296   : > { %v9581_v31 = vpop.permute.xlu1 %7177  ;;  %v9583_v29 = vpop.permute.xlu0 %7242  ;;  %v6544_v55 = vpack.c.bf16 %v3096_v20, %v3093_v12  ;;  %v1480_v46 = vmul.f32 %v9591_v4, %v12490_v33  ;;  %v3099_v20 = vsel %vm3084_vm14, %v12504_v15, %v7095_v45  ;;  %v3108_v3 = vsel %vm3084_vm14, %v12508_v11, %v7000_v57  ;;  %v9714_v10 = vld [vmem:[#allocation3 + $0x10] sm:$0xff] }
 0x297   : > { %12502 = vst [vmem:[#allocation58_spill] sm:$0xff] %v9581_v31  ;;  %12503 = vst [vmem:[#allocation59_spill] sm:$0xff] %v9583_v29  ;;  %v7180_v52 = vunpack.i.h.bf16 %v9581_v31  ;;  %v12226_v25 = vunpack.i.l.bf16 %v9581_v31  ;;  %v3105_v44 = vsel %vm3084_vm14, %v12505_v37, %v6990_v0  ;;  %v1497_v45 = vmul.f32 %v12488_v6, %v9149_v18  ;;  %v9742_v31 = vld [vmem:[#allocation3 + $0x60] sm:$0xff] }
 0x298   : > { %7517 = vrot.lane.b32.xlu1 %v7516_v22, %s8030_s26  ;;  %6545 = vmatprep.subr.bf16.mxu1 %v6544_v55  ;;  %v12230_v15 = vunpack.i.l.bf16 %v9417_v32  ;;  %v6552_v37 = vpack.c.bf16 %v3108_v3, %v3105_v44  ;;  %v1446_v6 = vmul.f32 %v8569_v42, %v8930_v43  ;;  %v7105_v3 = vunpack.i.h.bf16 %v9429_v21  ;;  %12526 = vst [vmem:[#allocation70_spill] sm:$0xff] %v9714_v10 }
 0x299   : > { %7447 = vrot.lane.b32.xlu0 %v7446_v50, %s8030_s26  ;;  %v3102_v12 = vsel %vm3084_vm14, %v12226_v25, %v7180_v52  ;;  %6547 = vmatpush3.bf16.msra.mxu1 %v6544_v55  ;;  %v7451_v50 = vpack.i.bf16 %v1481_v17, %v1480_v46  ;;  %v12509_v52 = vld [vmem:[#allocation22_spill] sm:$0xff]  ;;  %v7100_v55 = vunpack.i.h.bf16 %v9417_v32  ;;  %12530 = vst [vmem:[#allocation74_spill] sm:$0xff] %v9742_v31 }
 0x29a   : > { %v9604_v38 = vpop.permute.xlu1 %7182  ;;  %v9606_v22 = vpop.permute.xlu0 %7247  ;;  %v6548_v48 = vpack.c.bf16 %v3102_v12, %v3099_v20  ;;  %v1496_v0 = vmul.f32 %v12490_v33, %v12509_v52  ;;  %v1450_v33 = vmul.f32 %v8569_v42, %v9046_v26 }
 0x29b   : > { %12506 = vst [vmem:[#allocation60_spill] sm:$0xff] %v9604_v38  ;;  %12507 = vst [vmem:[#allocation61_spill] sm:$0xff] %v9606_v22  ;;  %v3111_v12 = vsel %vm3084_vm14, %v12230_v15, %v7100_v55  ;;  %v1458_v55 = vmul.f32 %v8569_v42, %v9061_v41  ;;  %v9694_v15 = vld [vmem:[#allocation3 + $0x88] sm:$0xff] }
 0x29c   : > { %6549 = vmatprep.subr.bf16.mxu1 %v6548_v48  ;;  %v7461_v11 = vpack.i.bf16 %v1497_v45, %v1496_v0  ;;  %v7466_v45 = vpack.i.bf16 %v1450_v33, %v1446_v6  ;;  %v1454_v0 = vmul.f32 %v8569_v42, %v8942_v34 }
 0x29d   : > { %7452 = vrot.lane.b32.xlu0 %v7451_v50, %s8034_s12  ;;  %6551 = vmatpush3.bf16.msra.mxu1 %v6548_v48  ;;  %v12228_v48 = vunpack.i.l.bf16 %v9429_v21 }
 0x29e   : > { %v9618_v17 = vpop.permute.xlu1 %7187  ;;  %v9620_v46 = vpop.permute.xlu0 %7257  ;;  %6553 = vmatprep.subr.bf16.mxu1 %v6552_v37  ;;  %v7471_v33 = vpack.i.bf16 %v1458_v55, %v1454_v0  ;;  %v1462_v0 = vmul.f32 %v8569_v42, %v8952_v39  ;;  %v1466_v55 = vmul.f32 %v8569_v42, %v12480_v19 }
 0x29f   : > { %12510 = vst [vmem:[#allocation22_spill] sm:$0xff] %v9618_v17  ;;  %12511 = vst [vmem:[#allocation62_spill] sm:$0xff] %v9620_v46  ;;  %v7190_v57 = vunpack.i.h.bf16 %v9618_v17  ;;  %v12227_v20 = vunpack.i.l.bf16 %v9618_v17 }
 0x2a1   : > { %7462 = vrot.lane.b32.xlu0 %v7461_v11, %s8034_s12  ;;  %v3114_v43 = vsel %vm3084_vm14, %v12227_v20, %v7190_v57  ;;  %6555 = vmatpush3.bf16.msra.mxu1 %v6552_v37  ;;  %v3117_v37 = vsel %vm3084_vm14, %v12228_v48, %v7105_v3  ;;  %v9661_v20 = vld [vmem:[#allocation3 + $0x38] sm:$0xff] }
 0x2a2   : > { %v9637_v44 = vpop.permute.xlu1 %7192  ;;  %v9639_v50 = vpop.permute.xlu0 %7267  ;;  %v6556_v52 = vpack.c.bf16 %v3114_v43, %v3111_v12  ;;  %v12516_v43 = vld [vmem:[#allocation24_spill] sm:$0xff]  ;;  %v12517_v3 = vld [vmem:[#allocation25_spill] sm:$0xff] }
 0x2a3   : > { %12512 = vst [vmem:[#allocation63_spill] sm:$0xff] %v9637_v44  ;;  %12513 = vst [vmem:[#allocation64_spill] sm:$0xff] %v9639_v50  ;;  %v7195_v11 = vunpack.i.h.bf16 %v9637_v44  ;;  %v12229_v25 = vunpack.i.l.bf16 %v9637_v44  ;;  %v4021_v48 = vmul.f32 %v9661_v20, %v12517_v3  ;;  %v4028_v39 = vmul.f32 %v12516_v43, %v9061_v41  ;;  %v12523_v44 = vld [vmem:[#allocation4_spill] sm:$0xff]  ;;  %v9746_v50 = vld [vmem:[#allocation3 + $0x80] sm:$0xff] }
 0x2a4   : > { %6557 = vmatprep.subr.bf16.mxu1 %v6556_v52  ;;  %v12522_v41 = vunpack.i.l.bf16 %v9357_v60  ;;  %12531 = vst [vmem:[#allocation75_spill] sm:$0xff] %v9746_v50 }
 0x2a5   : > { %7467 = vrot.lane.b32.xlu0 %v7466_v45, %s8034_s12  ;;  %v3120_v6 = vsel %vm3084_vm14, %v12229_v25, %v7195_v11  ;;  %6559 = vmatpush3.bf16.msra.mxu1 %v6556_v52  ;;  %v4022_v45 = vmul.f32 %v12516_v43, %v9046_v26  ;;  %v9674_v26 = vld [vmem:[%s12144_s2 + $0x4] ss:$8 sm:$0x7] }
 0x2a6   : > { %v9654_v34 = vpop.permute.xlu1 %7197  ;;  %v9656_v57 = vpop.permute.xlu0 %7272  ;;  %v6560_v12 = vpack.c.bf16 %v3120_v6, %v3117_v37  ;;  %v7110_v37 = vunpack.i.h.bf16 %v9357_v60  ;;  %v4027_v6 = vmul.f32 %v9694_v15, %v12517_v3  ;;  %v9708_v21 = vrot.slane %v9674_v26, %v12523_v44 }
 0x2a7   : > { %12514 = vst [vmem:[#allocation65_spill] sm:$0xff] %v9654_v34  ;;  %12515 = vst [vmem:[#allocation66_spill] sm:$0xff] %v9656_v57  ;;  %v7476_v25 = vpack.i.bf16 %v4022_v45, %v4021_v48  ;;  %v9689_v45 = vrot.slane %v9674_v26, %v8130_v8 }
 0x2a8   : > { %6561 = vmatprep.subr.bf16.mxu1 %v6560_v12  ;;  %v7486_v32 = vpack.i.bf16 %v4028_v39, %v4027_v6  ;;  %v3360_v22 = vmul.f32 %v9746_v50, %v9708_v21  ;;  %v3372_v46 = vmul.f32 %v9521_v62, %v9708_v21  ;;  %v3369_v23 = vmul.f32 %v9171_v35, %v9708_v21 }
 0x2a9   : > { %7472 = vrot.lane.b32.xlu0 %v7471_v33, %s8034_s12  ;;  %6563 = vmatpush3.bf16.msra.mxu1 %v6560_v12  ;;  %v7481_v12 = vpack.i.bf16 %v1466_v55, %v1462_v0  ;;  %v3355_v0 = vmul.f32 %v9661_v20, %v9689_v45  ;;  %v3123_v55 = vsel %vm3084_vm14, %v12522_v41, %v7110_v37  ;;  %v9720_v41 = vld [vmem:[#allocation3 + $0x30] sm:$0xff] }
 0x2aa   : > { %v9665_v11 = vpop.permute.xlu1 %7207  ;;  %v9667_v52 = vpop.permute.xlu0 %7282  ;;  %v3352_v60 = vmul.f32 %v9714_v10, %v9689_v45  ;;  %v4034_v37 = vmul.f32 %v12516_v43, %v12480_v19  ;;  %12527 = vst [vmem:[#allocation71_spill] sm:$0xff] %v9720_v41  ;;  %v3361_v39 = vmul.f32 %v9694_v15, %v9689_v45  ;;  %v5703_v19 = vld [vmem:[%s12147_s5 + $0x38] sm:$0xf] }
 0x2ab   : > { %12518 = vst [vmem:[#allocation24_spill] sm:$0xff] %v9665_v11  ;;  %12519 = vst [vmem:[#allocation25_spill] sm:$0xff] %v9667_v52  ;;  %v3373_v52 = vmul.f32 %v9471_v24, %v9689_v45 }
 0x2ad   : > { %7477 = vrot.lane.b32.xlu0 %v7476_v25, %s8035_s14 }
 0x2ae   : > { %v9681_v33 = vpop.permute.xlu1 %7217  ;;  %v9683_v48 = vpop.permute.xlu0 %7292 }
 0x2af   : > { %12520 = vst [vmem:[#allocation67_spill] sm:$0xff] %v9681_v33  ;;  %12521 = vst [vmem:[#allocation68_spill] sm:$0xff] %v9683_v48  ;;  %v7295_v25 = vunpack.i.h.bf16 %v9683_v48  ;;  %v12238_v42 = vunpack.i.l.bf16 %v9683_v48  ;;  %v9725_v48 = vld [vmem:[#allocation3 + $0xd8] sm:$0xff] }
 0x2b0   : > { %v4033_v6 = vmul.f32 %v9725_v48, %v12517_v3 }
 0x2b1   : > { %7482 = vrot.lane.b32.xlu0 %v7481_v12, %s8034_s12  ;;  %v3126_v8 = vsel %vm3084_vm14, %v12238_v42, %v7295_v25  ;;  %v3354_v25 = vmul.f32 %v9720_v41, %v9708_v21  ;;  %v6568_v42 = vpack.c.bf16 %v3355_v0, %v3352_v60 }
 0x2b2   : > { %v9710_v12 = vpop.permute.xlu1 %7227  ;;  %v9712_v17 = vpop.permute.xlu0 %7297  ;;  %v6564_v7 = vpack.c.bf16 %v3126_v8, %v3123_v55  ;;  %v9734_v55 = vld [vmem:[#allocation3 + $0x8] sm:$0xff]  ;;  %v7491_v0 = vpack.i.bf16 %v4034_v37, %v4033_v6  ;;  %v9758_v6 = vld [vmem:[#allocation3 + $0x58] sm:$0xff] }
 0x2b3   : > { %12524 = vst [vmem:[#allocation4_spill] sm:$0xff] %v9710_v12  ;;  %12525 = vst [vmem:[#allocation69_spill] sm:$0xff] %v9712_v17  ;;  %v12536_v17 = vld [vmem:[#allocation32_spill] sm:$0xff] }
 0x2b4   : > { %6565 = vmatprep.subr.bf16.mxu1 %v6564_v7  ;;  %12528 = vst [vmem:[#allocation72_spill] sm:$0xff] %v9734_v55  ;;  %12532 = vst [vmem:[#allocation76_spill] sm:$0xff] %v9758_v6 }
 0x2b5   : > { %7487 = vrot.lane.b32.xlu0 %v7486_v32, %s8035_s14  ;;  %6567 = vmatpush3.bf16.msra.mxu1 %v6564_v7  ;;  %v3351_v32 = vmul.f32 %v9734_v55, %v9708_v21  ;;  %v3358_v7 = vmul.f32 %v9742_v31, %v9689_v45 }
 0x2b6   : > { %v9738_v8 = vpop.permute.xlu1 %2340  ;;  %v9740_v60 = vpop.permute.xlu0 %7307  ;;  %6569 = vmatprep.subr.bf16.mxu1 %v6568_v42  ;;  %v7953_v42 = vld [vmem:[%s12144_s2 + $0x3] ss:$8 sm:$0x7] }
 0x2b7   : > { %12529 = vst [vmem:[#allocation73_spill] sm:$0xff] %v9740_v60  ;;  %v6570_v57 = vpack.c.bf16 %v3354_v25, %v3351_v32  ;;  %v6572_v29 = vpack.c.bf16 %v3361_v39, %v3358_v7  ;;  %v2835_v37 = vrot.slane %v7953_v42, %v12523_v44  ;;  %v3367_v25 = vmul.f32 %v9725_v48, %v9689_v45  ;;  %v9771_v44 = vld [vmem:[#allocation3 + $0xb0] sm:$0xff]  ;;  %v9777_v42 = vld [vmem:[#allocation3 + $0x180] sm:$0xff] }
 0x2b8   : > { %6069 = vmatmul.mubr.msk.f32.vlgmr.msra.gmra.mrb[0].mxu1 %vm1755_vm2, %v5703_v19  ;;  %v3357_v32 = vmul.f32 %v9758_v6, %v9708_v21  ;;  %v9765_v19 = vsel %vm2346_vm7, %v9738_v8, %v9529_v59  ;;  %12535 = vst [vmem:[#allocation79_spill] sm:$0xff] %v9771_v44  ;;  %v4045_v7 = vmul.f32 %v12517_v3, %v9095_v36 }
 0x2b9   : > { %7492 = vrot.lane.b32.xlu0 %v7491_v0, %s8035_s14  ;;  %6571 = vmatpush1.bf16.msra.mxu1 %v6570_v57  ;;  %v3364_v57 = vmul.f32 %v9771_v44, %v9689_v45  ;;  %v4046_v60 = vmul.f32 %v9777_v42, %v12516_v43  ;;  %v2358_v34 = vmul.f32 %v9720_v41, %v9765_v19 }
 0x2ba   : > { %v9767_v39 = vpop.permute.xlu1 %2344  ;;  %v9769_v0 = vpop.permute.xlu0 %7317  ;;  %6573 = vmatprep.subr.bf16.mxu1 %v6572_v29  ;;  %3466 = vmatprep.mubr.f32.mxu1 %v12536_v17  ;;  %v6574_v12 = vpack.c.bf16 %v3360_v22, %v3357_v32  ;;  %v3370_v32 = vmul.f32 %v9157_v49, %v9689_v45  ;;  %v1412_v41 = vmul.f32 %v12477_v9, %v9151_v2 }
 0x2bb   : > { %12533 = vst [vmem:[#allocation77_spill] sm:$0xff] %v9767_v39  ;;  %12534 = vst [vmem:[#allocation78_spill] sm:$0xff] %v9769_v0  ;;  %v9785_v29 = vsel %vm2346_vm7, %v9529_v59, %v9767_v39  ;;  %v9787_v0 = vld [vmem:[#allocation3 + $0xd0] sm:$0xff]  ;;  %v6576_v11 = vpack.c.bf16 %v3367_v25, %v3364_v57  ;;  %v3363_v59 = vmul.f32 %v9443_v58, %v9708_v21 }
 0x2bc   : > { %12537 = vst [vmem:[#allocation32_spill] sm:$0xff] %v9787_v0  ;;  %v3366_v33 = vmul.f32 %v9787_v0, %v9708_v21  ;;  %v2359_v22 = vmul.f32 %v9661_v20, %v9785_v29  ;;  %v7501_v25 = vpack.i.bf16 %v4046_v60, %v4045_v7  ;;  %v6580_v49 = vpack.c.bf16 %v3373_v52, %v3370_v32  ;;  %v9826_v52 = vld [vmem:[#allocation3 + $0x210] sm:$0xff] }
 0x2bd   : > { %2844 = vrot.lane.b32.xlu0 %v2835_v37, %s8028_s21  ;;  %6575 = vmatpush1.bf16.msra.mxu1 %v6574_v12  ;;  %v9810_v12 = vld [vmem:[#allocation3 + $0x1f8] sm:$0xff]  ;;  %v3379_v60 = vmul.f32 %v9689_v45, %v9095_v36  ;;  %12542 = vst [vmem:[#allocation84_spill] sm:$0xff] %v9826_v52  ;;  %v4487_v35 = vmul.f32 %v9826_v52, %v8672_v27 }
 0x2be   : > { %v9804_v38 = vpop.permute.xlu1 %7237  ;;  %v9806_v37 = vpop.permute.xlu0 %7327  ;;  %6577 = vmatprep.subr.bf16.mxu1 %v6576_v11  ;;  %v7526_v57 = vpack.i.bf16 %v2359_v22, %v2358_v34  ;;  %12540 = vst [vmem:[#allocation82_spill] sm:$0xff] %v9810_v12  ;;  %v4486_v39 = vmul.f32 %v9810_v12, %v9319_v56  ;;  %v6578_v40 = vpack.c.bf16 %v3366_v33, %v3363_v59  ;;  %v9820_v11 = vld [vmem:[#allocation3 + $0x1f0] sm:$0xff] }
 0x2bf   : > { %12538 = vst [vmem:[#allocation80_spill] sm:$0xff] %v9804_v38  ;;  %12539 = vst [vmem:[#allocation81_spill] sm:$0xff] %v9806_v37  ;;  %v1408_v34 = vmul.f32 %v9810_v12, %v12477_v9  ;;  %v4485_v2 = vmul.f32 %v9820_v11, %v9312_v51  ;;  %v2355_v33 = vmul.f32 %v9714_v10, %v9785_v29  ;;  %v9993_v10 = vld [vmem:[#allocation3 + $0xe0] sm:$0xff] }
 0x2c0   : > { %7527 = vrot.lane.b32.xlu1 %v7526_v57, %s8032_s16  ;;  %12541 = vst [vmem:[#allocation83_spill] sm:$0xff] %v9820_v11  ;;  %v3376_v36 = vmul.f32 %v9563_v47, %v9689_v45  ;;  %v2354_v37 = vmul.f32 %v9734_v55, %v9765_v19  ;;  %v3378_v38 = vmul.f32 %v9591_v4, %v9708_v21 }
 0x2c1   : > { %7502 = vrot.lane.b32.xlu0 %v7501_v25, %s8035_s14  ;;  %6579 = vmatpush1.bf16.msra.mxu1 %v6578_v40  ;;  %v7506_v59 = vpack.i.bf16 %v1412_v41, %v1408_v34  ;;  %v7536_v32 = vpack.i.bf16 %v4486_v39, %v4485_v2  ;;  %v6582_v25 = vpack.c.bf16 %v3372_v46, %v3369_v23  ;;  %v7961_v40 = vld [vmem:[#allocation3 + $0x1e8] sm:$0xff]  ;;  %v9849_v41 = vld [vmem:[#allocation3 + $0x1a0] sm:$0xff] }
 0x2c2   : > { %v9832_v7 = vpop.permute.xlu1 %7252  ;;  %v9834_v22 = vpop.permute.xlu0 %7332  ;;  %6581 = vmatprep.subr.bf16.mxu1 %v6580_v49  ;;  %v4484_v57 = vmul.f32 %v7961_v40, %v8672_v27  ;;  %v6584_v23 = vpack.c.bf16 %v3379_v60, %v3376_v36  ;;  %v3375_v46 = vmul.f32 %v9517_v63, %v9708_v21  ;;  %12545 = vst [vmem:[#allocation87_spill] sm:$0xff] %v9849_v41 }
 0x2c3   : > { %12543 = vst [vmem:[#allocation85_spill] sm:$0xff] %v9832_v7  ;;  %12544 = vst [vmem:[#allocation86_spill] sm:$0xff] %v9834_v22  ;;  %v3385_v7 = vmul.f32 %v9689_v45, %v9121_v5  ;;  %v3382_v27 = vmul.f32 %v9849_v41, %v9689_v45  ;;  %v7521_v49 = vpack.i.bf16 %v2355_v33, %v2354_v37 }
 0x2c4   : > { %7537 = vrot.lane.b32.xlu1 %v7536_v32, %s8030_s26  ;;  %v7541_v39 = vpack.i.bf16 %v4487_v35, %v4484_v57  ;;  %v2367_v34 = vmul.f32 %v9694_v15, %v9785_v29  ;;  %v2353_v2 = vmul.f32 %v12536_v17, %v9738_v8  ;;  %v9861_v32 = vld [vmem:[#allocation3 + $0x1c0] sm:$0xff]  ;;  %v9869_v37 = vmul.f32 %v9785_v29, %v9121_v5 }
 0x2c5   : > { %7507 = vrot.lane.b32.xlu0 %v7506_v59, %s8036_s23  ;;  %6583 = vmatpush1.bf16.msra.mxu1 %v6582_v25  ;;  %v9865_v36 = vmul.f32 %v9861_v32, %v9765_v19  ;;  %v9872_v35 = vmul.f32 %v7961_v40, %v9765_v19  ;;  %v9876_v17 = vmul.f32 %v9820_v11, %v9785_v29 }
 0x2c6   : > { %v9857_v59 = vpop.permute.xlu1 %7262  ;;  %v9859_v60 = vpop.permute.xlu0 %7347  ;;  %6585 = vmatprep.subr.bf16.mxu1 %v6584_v23  ;;  %12549 = vst [vmem:[#allocation91_spill] sm:$0xff] %v9869_v37  ;;  %v6586_v8 = vpack.c.bf16 %v3378_v38, %v3375_v46  ;;  %v6588_v33 = vpack.c.bf16 %v3385_v7, %v3382_v27  ;;  %v3384_v25 = vmul.f32 %v9861_v32, %v9708_v21  ;;  %v12552_v46 = vld [vmem:[#allocation5_spill] sm:$0xff] }
 0x2c7   : > { %12546 = vst [vmem:[#allocation88_spill] sm:$0xff] %v9857_v59  ;;  %12547 = vst [vmem:[#allocation89_spill] sm:$0xff] %v9859_v60  ;;  %v3391_v57 = vmul.f32 %v9689_v45, %v9149_v18  ;;  %v2366_v5 = vmul.f32 %v9746_v50, %v9765_v19  ;;  %v3381_v7 = vmul.f32 %v9555_v54, %v9708_v21  ;;  %v9959_v37 = vld [vmem:[#allocation3 + $0xb8] sm:$0xff] }
 0x2c8   : > { %12548 = vst [vmem:[#allocation90_spill] sm:$0xff] %v9865_v36  ;;  %12550 = vst [vmem:[#allocation92_spill] sm:$0xff] %v9872_v35  ;;  %7542 = vrot.lane.b32.xlu1 %v7541_v39, %s8030_s26  ;;  %v3388_v18 = vmul.f32 %v9820_v11, %v9689_v45  ;;  %v9896_v27 = vrot.slane %v9674_v26, %v12552_v46  ;;  %v9902_v60 = vpack.i.bf16 %v2353_v2, %v2353_v2  ;;  %v9910_v26 = vld [vmem:[#allocation3 + $0x18] sm:$0xff]  ;;  %v9933_v36 = vld [vmem:[#allocation3 + $0x40] sm:$0xff] }
 0x2c9   : > { %12551 = vst [vmem:[#allocation93_spill] sm:$0xff] %v9876_v17  ;;  %7522 = vrot.lane.b32.xlu0 %v7521_v49, %s8032_s16  ;;  %6587 = vmatpush1.bf16.msra.mxu1 %v6586_v8  ;;  %v7551_v23 = vpack.i.bf16 %v2367_v34, %v2366_v5  ;;  %v2371_v8 = vmul.f32 %v9771_v44, %v9785_v29  ;;  %12555 = vst [vmem:[#allocation95_spill] sm:$0xff] %v9910_v26  ;;  %v9945_v35 = vld [vmem:[#allocation3 + $0x1d0] sm:$0xff]  ;;  %v9963_v50 = vld [vmem:[#allocation3 + $0x218] sm:$0xff] }
 0x2ca   : > { %v9898_v39 = vpop.permute.xlu1 %7277  ;;  %v9900_v49 = vpop.permute.xlu0 %7352  ;;  %6589 = vmatprep.subr.bf16.mxu1 %v6588_v33  ;;  %v2363_v38 = vmul.f32 %v9742_v31, %v9785_v29  ;;  %v6590_v22 = vpack.c.bf16 %v3384_v25, %v3381_v7  ;;  %v3390_v45 = vmul.f32 %v9826_v52, %v9708_v21  ;;  %v3353_v46 = vmul.f32 %v9910_v26, %v9896_v27  ;;  %v12571_v31 = vld [vmem:[#allocation27_spill] sm:$0xff] }
 0x2cb   : > { %12553 = vst [vmem:[#allocation5_spill] sm:$0xff] %v9898_v39  ;;  %12554 = vst [vmem:[#allocation94_spill] sm:$0xff] %v9900_v49  ;;  %v3374_v34 = vmul.f32 %v9431_v16, %v9896_v27  ;;  %v6592_v2 = vpack.c.bf16 %v3391_v57, %v3388_v18  ;;  %v2370_v33 = vmul.f32 %v9443_v58, %v9765_v19  ;;  %v12557_v49 = vld [vmem:[#allocation29_spill] sm:$0xff]  ;;  %v9937_v39 = vld [vmem:[#allocation3 + $0x68] sm:$0xff] }
 0x2cc   : > { %7552 = vrot.lane.b32.xlu1 %v7551_v23, %s8032_s16  ;;  %v2362_v25 = vmul.f32 %v9758_v6, %v9765_v19  ;;  %v3387_v59 = vmul.f32 %v7961_v40, %v9708_v21  ;;  %v3371_v16 = vmul.f32 %v9439_v14, %v9896_v27  ;;  %v12558_v23 = vld [vmem:[#allocation33_spill] sm:$0xff]  ;;  %v3356_v7 = vmul.f32 %v9933_v36, %v9896_v27  ;;  %v9941_v14 = vld [vmem:[#allocation3 + $0x1c8] sm:$0xff] }
 0x2cd   : > { %7532 = vrot.lane.b32.xlu0 %v9902_v60, %s8032_s16  ;;  %6591 = vmatpush1.bf16.msra.mxu1 %v6590_v22  ;;  %v7561_v58 = vpack.i.bf16 %v2371_v8, %v2370_v33  ;;  %12561 = vst [vmem:[#allocation96_spill] sm:$0xff] %v9937_v39  ;;  %v3359_v21 = vmul.f32 %v9937_v39, %v9896_v27  ;;  %12562 = vst [vmem:[#allocation97_spill] sm:$0xff] %v9941_v14  ;;  %v12564_v8 = vld [vmem:[#allocation21_spill] sm:$0xff] }
 0x2ce   : > { %v9929_v17 = vpop.permute.xlu1 %7287  ;;  %v9931_v57 = vpop.permute.xlu0 %4868  ;;  %6593 = vmatprep.subr.bf16.mxu1 %v6592_v2  ;;  %v7546_v18 = vpack.i.bf16 %v2363_v38, %v2362_v25  ;;  %v6594_v22 = vpack.c.bf16 %v3390_v45, %v3387_v59  ;;  %v4051_v40 = vmul.f32 %v9941_v14, %v12517_v3  ;;  %12563 = vst [vmem:[#allocation98_spill] sm:$0xff] %v9945_v35  ;;  %v6980_v2 = vunpack.i.h.bf16 %v12564_v8  ;;  %v9955_v25 = vld [vmem:[#allocation3 + $0x90] sm:$0xff] }
 0x2cf   : > { %12559 = vst [vmem:[#allocation29_spill] sm:$0xff] %v9929_v17  ;;  %12560 = vst [vmem:[#allocation33_spill] sm:$0xff] %v9931_v57  ;;  %v4052_v38 = vmul.f32 %v9945_v35, %v12516_v43  ;;  %v6979_v33 = vunpack.i.l.bf16 %v12564_v8  ;;  %v6596_v59 = vpack.c.bf16 %v3356_v7, %v3353_v46  ;;  %v9953_v45 = vpack.c.bf16 %v3374_v34, %v3371_v16  ;;  %v7972_v46 = vld [vmem:[#allocation3 + $0x220] sm:$0xff] }
 0x2d0   : > { %7562 = vrot.lane.b32.xlu1 %v7561_v58, %s8032_s16  ;;  %12565 = vst [vmem:[#allocation21_spill] sm:$0xff] %v9955_v25  ;;  %v3362_v17 = vmul.f32 %v9955_v25, %v9896_v27  ;;  %12566 = vst [vmem:[#allocation99_spill] sm:$0xff] %v9959_v37  ;;  %v3365_v44 = vmul.f32 %v9959_v37, %v9896_v27  ;;  %v9967_v58 = vmul.f32 %v9963_v50, %v12517_v3 }
 0x2d1   : > { %7547 = vrot.lane.b32.xlu0 %v7546_v18, %s8032_s16  ;;  %6595 = vmatpush1.bf16.msra.mxu1 %v6594_v22  ;;  %v9970_v34 = vmul.f32 %v7972_v46, %v12516_v43  ;;  %v12567_v7 = vunpack.i.l.bf16 %v12557_v49  ;;  %v12568_v18 = vunpack.i.l.bf16 %v12558_v23  ;;  %v5709_v43 = vld [vmem:[%s12147_s5 + $0x40] sm:$0xff]  ;;  %v2375_v3 = vmul.f32 %v9725_v48, %v9785_v29  ;;  %12572 = vst [vmem:[#allocation27_spill] sm:$0xff] %v9993_v10 }
 0x2d2   : > { %v9982_v8 = vpop.permute.xlu1 %7302  ;;  %v9984_v6 = vpop.permute.xlu0 %7357  ;;  %6597 = vmatprep.subr.bf16.mxu1 %v6596_v59  ;;  %v7576_v55 = vpack.i.bf16 %v4052_v38, %v4051_v40  ;;  %v3380_v40 = vmul.f32 %v9777_v42, %v9896_v27  ;;  %v10019_v57 = vmul.f32 %v9591_v4, %v9111_v61  ;;  %v3386_v5 = vmul.f32 %v9945_v35, %v9896_v27 }
 0x2d3   : > { %v9975_v16 = vsel %vm2850_vm13, %v6980_v2, %v12567_v7  ;;  %v9980_v22 = vsel %vm2850_vm13, %v6979_v33, %v12568_v18  ;;  %12569 = vst [vmem:[#allocation100_spill] sm:$0xff] %v9982_v8  ;;  %12570 = vst [vmem:[#allocation101_spill] sm:$0xff] %v9984_v6  ;;  %v1403_v2 = vmul.f32 %v9941_v14, %v12571_v31  ;;  %v9997_v18 = vld [vmem:[#allocation3 + $0x178] sm:$0xff] }
 0x2d4   : > { %v6600_v7 = vpack.c.bf16 %v3362_v17, %v3359_v21  ;;  %v3368_v33 = vmul.f32 %v9993_v10, %v9896_v27  ;;  %v10001_v8 = vmul.f32 %v9997_v18, %v12571_v31  ;;  %7572 = vrot.lane.b32.xlu1 %v9902_v60, %s8032_s16  ;;  %v2374_v17 = vmul.f32 %v9787_v0, %v9765_v19 }
 0x2d5   : > { %7557 = vrot.lane.b32.xlu0 %v9902_v60, %s8032_s16  ;;  %v1402_v21 = vmul.f32 %v9861_v32, %v9111_v61  ;;  %5711 = vmatmul.mubr.msk.f32.vlgmr.msra.gmra.mrb[2].mxu1 %vm1755_vm2, %v5709_v43  ;;  %v7581_v11 = vpack.i.bf16 %v9970_v34, %v9967_v58  ;;  %v10032_v34 = vld [vmem:[#allocation2] sm:$0xff]  ;;  %v10099_v0 = vmul.f32 %v9826_v52, %v9111_v61 }
 0x2d6   : > { %v6604_v38 = vpack.c.bf16 %v3368_v33, %v3365_v44  ;;  %6599 = vmatpush3.bf16.msra.mxu1 %v6596_v59  ;;  %v10024_v32 = vpop.permute.xlu1 %7312  ;;  %v10026_v54 = vpop.permute.xlu0 %4872  ;;  %v7566_v41 = vpack.i.bf16 %v2375_v3, %v2374_v17  ;;  %v10028_v44 = vld [vmem:[#allocation3 + $0x158] sm:$0xff]  ;;  %3472 = vmatprep.mubr.f32.mxu1 %v10032_v34  ;;  %v7586_v59 = vpack.i.bf16 %v10001_v8, %v10019_v57  ;;  %v10042_v3 = vld [vmem:[#allocation3 + $0x1a8] sm:$0xff] }
 0x2d7   : > { %12573 = vst [vmem:[#allocation102_spill] sm:$0xff] %v10024_v32  ;;  %12574 = vst [vmem:[#allocation103_spill] sm:$0xff] %v10026_v54  ;;  %v7591_v53 = vpack.i.bf16 %v1403_v2, %v1402_v21  ;;  %v3377_v58 = vmul.f32 %v10028_v44, %v9896_v27  ;;  %v10038_v33 = vld [vmem:[%s12147_s5 + $0x48] sm:$0xf]  ;;  %6601 = vmatprep.subr.bf16.mxu1 %v6600_v7  ;;  %v3383_v2 = vmul.f32 %v10042_v3, %v9896_v27 }
 0x2d8   : > { %12575 = vst [vmem:[#allocation104_spill] sm:$0xff] %v10028_v44  ;;  %12576 = vst [vmem:[#allocation105_spill] sm:$0xff] %v10042_v3  ;;  %v10048_v17 = vmul.f32 %v9941_v14, %v9312_v51  ;;  %v10052_v21 = vmul.f32 %v9945_v35, %v9319_v56  ;;  %7577 = vrot.lane.b32.xlu1 %v7576_v55, %s8035_s14  ;;  %v3389_v8 = vmul.f32 %v9810_v12, %v9896_v27 }
 0x2d9   : > { %7567 = vrot.lane.b32.xlu0 %v7566_v41, %s8032_s16  ;;  %v10057_v57 = vpack.c.bf16 %v3380_v40, %v3377_v58  ;;  %v3392_v32 = vmul.f32 %v7972_v46, %v9896_v27  ;;  %v10062_v3 = vpack.c.bf16 %v3386_v5, %v3383_v2  ;;  %v10066_v44 = vmul.f32 %v9963_v50, %v9312_v51  ;;  %v12577_v41 = vld [vmem:[#allocation36_spill] sm:$0xff]  ;;  %v10082_v58 = vld [vmem:[#allocation3 + $0x100] sm:$0xff] }
 0x2da   : > { %v10069_v35 = vmul.f32 %v7972_v46, %v9319_v56  ;;  %5712 = vmatmul.mubr.msk.f32.gmra.mrb[4].mxu1 %vm1755_vm2, %v10038_v33  ;;  %v10075_v55 = vmul.f32 %v9963_v50, %v12571_v31  ;;  %v7010_v40 = vunpack.i.h.bf16 %v12577_v41  ;;  %v10078_v27 = vpop.permute.xlu1 %7322  ;;  %v10080_v5 = vpop.permute.xlu0 %7367  ;;  %12580 = vst [vmem:[#allocation107_spill] sm:$0xff] %v10082_v58  ;;  %v2379_v46 = vmul.f32 %v10082_v58, %v9785_v29  ;;  %v10112_v58 = vld [vmem:[#allocation3 + $0xf8] sm:$0xff] }
 0x2db   : > { %6603 = vmatpush3.bf16.msra.mxu1 %v6600_v7  ;;  %12578 = vst [vmem:[#allocation36_spill] sm:$0xff] %v10078_v27  ;;  %12579 = vst [vmem:[#allocation106_spill] sm:$0xff] %v10080_v5  ;;  %6099 = vmatprep.mubr.msk.f32.mxu1 %vm1755_vm2, %v5709_v43  ;;  %v10089_v2 = vmul.f32 %v9910_v26, %v12477_v9  ;;  %v10093_v31 = vmul.f32 %v9937_v39, %v12477_v9  ;;  %v7009_v27 = vunpack.i.l.bf16 %v12577_v41 }
 0x2dc   : > { %6605 = vmatprep.subr.bf16.mxu1 %v6604_v38  ;;  %v10103_v5 = vmul.f32 %v9933_v36, %v12477_v9  ;;  %v10107_v43 = vmul.f32 %v9955_v25, %v12477_v9  ;;  %7582 = vrot.lane.b32.xlu1 %v7581_v11, %s8035_s14  ;;  %12581 = vst [vmem:[#allocation108_spill] sm:$0xff] %v10112_v58  ;;  %v12582_v7 = vunpack.i.h.bf16 %v12558_v23  ;;  %v12583_v39 = vunpack.i.l.bf16 %v12558_v23 }
 0x2dd   : > { %7592 = vrot.lane.b32.xlu0 %v7591_v53, %s8036_s23  ;;  %v2378_v61 = vmul.f32 %v10112_v58, %v9765_v19  ;;  %v12584_v14 = vunpack.i.h.bf16 %v12557_v49  ;;  %v12585_v41 = vunpack.i.l.bf16 %v12557_v49  ;;  %v10130_v53 = vpack.c.bf16 %v3392_v32, %v3389_v8 }
 0x2de   : > { %v10121_v12 = vsel %vm2850_vm13, %v12583_v39, %v12582_v7  ;;  %v10138_v52 = vmul.f32 %v9661_v20, %v9312_v51  ;;  %v10140_v39 = vpop.permute.xlu1 %7337  ;;  %v2382_v20 = vmul.f32 %v9521_v62, %v9765_v19  ;;  %v10172_v8 = vmul.f32 %v9993_v10, %v12477_v9 }
 0x2df   : > { %v10128_v11 = vsel %vm2850_vm13, %v12585_v41, %v12584_v14  ;;  %6607 = vmatpush3.bf16.msra.mxu1 %v6604_v38  ;;  %12586 = vst [vmem:[#allocation109_spill] sm:$0xff] %v10140_v39  ;;  %v10142_v7 = vpop.permute.xlu0 %7372  ;;  %v7596_v54 = vpack.i.bf16 %v2379_v46, %v2378_v61  ;;  %v2383_v14 = vmul.f32 %v9471_v24, %v9785_v29  ;;  %v12590_v61 = vld [vmem:[#allocation15_spill] sm:$0xff] }
 0x2e0   : > { %12587 = vst [vmem:[#allocation110_spill] sm:$0xff] %v10142_v7  ;;  %6609 = vmatprep.subr.bf16.mxu1 %v9953_v45  ;;  %v10155_v38 = vmul.f32 %v9933_v36, %v9319_v56  ;;  %v10159_v46 = vmul.f32 %v9959_v37, %v12477_v9  ;;  %v10163_v24 = vmul.f32 %v9955_v25, %v9319_v56 }
 0x2e1   : > { %7587 = vrot.lane.b32.xlu1 %v7586_v59, %s8036_s23  ;;  %7597 = vrot.lane.b32.xlu0 %v7596_v54, %s8032_s16  ;;  %v10176_v32 = vmul.f32 %v9993_v10, %v9319_v56  ;;  %v10180_v58 = vmul.f32 %v9694_v15, %v9312_v51  ;;  %v10184_v59 = vmul.f32 %v9725_v48, %v9312_v51  ;;  %v12598_v48 = vunpack.i.h.bf16 %v12460_v30 }
 0x2e2   : > { %12588 = vst [vmem:[#allocation111_spill] sm:$0xff] %v10159_v46  ;;  %12589 = vst [vmem:[#allocation112_spill] sm:$0xff] %v10163_v24  ;;  %v10188_v54 = vmul.f32 %v9997_v18, %v9312_v51  ;;  %v10192_v9 = vmul.f32 %v9777_v42, %v9319_v56  ;;  %v10195_v62 = vpop.permute.xlu1 %7342  ;;  %v7601_v15 = vpack.i.bf16 %v2383_v14, %v2382_v20  ;;  %v12599_v51 = vunpack.i.h.bf16 %v12466_v28  ;;  %v12622_v24 = vld [vmem:[#allocation10_spill] sm:$0xff] }
 0x2e3   : > { %12591 = vst [vmem:[#allocation15_spill] sm:$0xff] %v10176_v32  ;;  %12592 = vst [vmem:[#allocation113_spill] sm:$0xff] %v10180_v58  ;;  %6611 = vmatpush3.bf16.msra.mxu1 %v9953_v45  ;;  %v10197_v41 = vpop.permute.xlu0 %7377  ;;  %v2387_v26 = vmul.f32 %v9563_v47, %v9785_v29  ;;  %v1691_v7 = vsel %vm1670_vm6, %v12598_v48, %v7009_v27  ;;  %v12600_v47 = vld [vmem:[#allocation16_spill] sm:$0xff]  ;;  %v2386_v28 = vmul.f32 %v9517_v63, %v9765_v19 }
 0x2e4   : > { %12593 = vst [vmem:[#allocation114_spill] sm:$0xff] %v10184_v59  ;;  %12594 = vst [vmem:[#allocation115_spill] sm:$0xff] %v10188_v54  ;;  %v1694_v39 = vsel %vm1670_vm6, %v12599_v51, %v7010_v40  ;;  %6613 = vmatprep.subr.bf16.mxu1 %v10057_v57  ;;  %v12601_v14 = vunpack.i.h.bf16 %v12558_v23  ;;  %v12602_v20 = vunpack.i.h.bf16 %v12557_v49  ;;  %v12604_v51 = vld [vmem:[#allocation34_spill] sm:$0xff]  ;;  %v7114_v45 = vunpack.i.l.bf16 %v9379_v13 }
 0x2e5   : > { %12595 = vst [vmem:[#allocation116_spill] sm:$0xff] %v10192_v9  ;;  %12596 = vst [vmem:[#allocation117_spill] sm:$0xff] %v10195_v62  ;;  %7602 = vrot.lane.b32.xlu1 %v7601_v15, %s8032_s16  ;;  %7607 = vrot.lane.b32.xlu0 %v9902_v60, %s8032_s16  ;;  %v7030_v30 = vunpack.i.h.bf16 %v12604_v51  ;;  %v10234_v42 = vpack.c.bf16 %v1694_v39, %v1691_v7  ;;  %v7029_v63 = vunpack.i.l.bf16 %v12604_v51  ;;  %v7359_v40 = vunpack.i.l.bf16 %v9984_v6  ;;  %v12608_v15 = vld [vmem:[#allocation35_spill] sm:$0xff]  ;;  %v12609_v51 = vld [vmem:[#allocation38_spill] sm:$0xff] }
 0x2e6   : > { %12597 = vst [vmem:[#allocation118_spill] sm:$0xff] %v10197_v41  ;;  %v10228_v48 = vpack.c.bf16 %v12602_v20, %v12601_v14  ;;  %v10240_v49 = vpop.permute.xlu1 %7362  ;;  %v7611_v14 = vpack.i.bf16 %v2387_v26, %v2386_v28  ;;  %v12607_v20 = vld [vmem:[#allocation41_spill] sm:$0xff]  ;;  %v7039_v7 = vunpack.i.l.bf16 %v12608_v15  ;;  %v12612_v26 = vpack.i.bf16 %v10052_v21, %v10048_v17  ;;  %v12613_v39 = vld [vmem:[#allocation42_spill] sm:$0xff] }
 0x2e7   : > { %12605 = vst [vmem:[#allocation34_spill] sm:$0xff] %v10234_v42  ;;  %6615 = vmatpush3.bf16.msra.mxu1 %v10057_v57  ;;  %v10242_v23 = vpop.permute.xlu0 %7382  ;;  %v7035_v27 = vunpack.i.h.bf16 %v12607_v20  ;;  %v12611_v57 = vld [vmem:[#allocation43_spill] sm:$0xff]  ;;  %v7059_v41 = vunpack.i.l.bf16 %v12613_v39  ;;  %v3757_v56 = vsel %vm2850_vm13, %v7029_v63, %v7114_v45  ;;  %v7364_v10 = vunpack.i.l.bf16 %v10240_v49  ;;  %v12617_v42 = vld [vmem:[#allocation14_spill] sm:$0xff] }
 0x2e8   : > { %12603 = vst [vmem:[#allocation16_spill] sm:$0xff] %v10228_v48  ;;  %12606 = vst [vmem:[#allocation119_spill] sm:$0xff] %v10242_v23  ;;  %6617 = vmatprep.subr.bf16.mxu1 %v10062_v3  ;;  %v7054_v28 = vunpack.i.l.bf16 %v12611_v57  ;;  %v12614_v23 = vld [vmem:[#allocation45_spill] sm:$0xff]  ;;  %v12616_v17 = vunpack.i.h.bf16 %v9984_v6  ;;  %v7124_v63 = vunpack.i.l.bf16 %v9399_v1  ;;  %v7129_v9 = vunpack.i.l.bf16 %v12617_v42 }
 0x2e9   : > { %7612 = vrot.lane.b32.xlu1 %v7611_v14, %s8032_s16  ;;  %7662 = vrot.lane.b32.xlu0 %v12612_v26, %s8030_s26  ;;  %v7069_v25 = vunpack.i.l.bf16 %v12614_v23  ;;  %v2391_v26 = vmul.f32 %v9997_v18, %v9785_v29  ;;  %v12619_v18 = vpack.i.bf16 %v10069_v35, %v10066_v44  ;;  %v2390_v37 = vmul.f32 %v9591_v4, %v9765_v19  ;;  %v12621_v6 = vld [vmem:[#allocation49_spill] sm:$0xff] }
 0x2ea   : > { %v10265_v14 = vpop.permute.xlu1 %4870  ;;  %v3760_v21 = vsel %vm2850_vm13, %v7359_v40, %v12616_v17  ;;  %v12620_v17 = vunpack.i.h.bf16 %v9379_v13  ;;  %v7134_v59 = vunpack.i.l.bf16 %v12621_v6  ;;  %v3759_v62 = vsel %vm2850_vm13, %v7030_v30, %v7359_v40 }
 0x2eb   : > { %6619 = vmatpush3.bf16.msra.mxu1 %v10062_v3  ;;  %v10267_v48 = vpop.permute.xlu0 %7392  ;;  %v12618_v3 = vld [vmem:[#allocation51_spill] sm:$0xff]  ;;  %v7139_v46 = vunpack.i.l.bf16 %v12622_v24  ;;  %v3765_v30 = vsel %vm2850_vm13, %v7039_v7, %v7124_v63  ;;  %v6626_v7 = vpack.c.bf16 %v3759_v62, %v3757_v56  ;;  %v12643_v56 = vld [vmem:[#allocation13_spill] sm:$0xff] }
 0x2ec   : > { %12615 = vst [vmem:[#allocation41_spill] sm:$0xff] %v10267_v48  ;;  %6621 = vmatprep.subr.bf16.mxu1 %v10130_v53  ;;  %v7119_v48 = vunpack.i.l.bf16 %v12618_v3  ;;  %v3758_v54 = vsel %vm2850_vm13, %v7114_v45, %v12620_v17  ;;  %v7671_v45 = vpack.i.bf16 %v2391_v26, %v2390_v37  ;;  %v12626_v17 = vld [vmem:[#allocation87_spill] sm:$0xff]  ;;  %v12326_v26 = vunpack.i.h.bf16 %v12622_v24 }
 0x2ed   : > { %7617 = vrot.lane.b32.xlu1 %v9902_v60, %s8032_s16  ;;  %7667 = vrot.lane.b32.xlu0 %v12619_v18, %s8030_s26  ;;  %v6624_v58 = vpack.c.bf16 %v3760_v21, %v3758_v54  ;;  %v12625_v18 = vunpack.i.h.bf16 %v10240_v49  ;;  %v2395_v32 = vmul.f32 %v12626_v17, %v9785_v29  ;;  %v10308_v54 = vsel %vm2850_vm13, %v7054_v28, %v7129_v9 }
 0x2ee   : > { %v10297_v35 = vpop.permute.xlu1 %7387  ;;  %v12628_v21 = vunpack.i.h.bf16 %v12617_v42 }
 0x2ef   : > { %6623 = vmatpush3.bf16.msra.mxu1 %v10130_v53  ;;  %12623 = vst [vmem:[#allocation35_spill] sm:$0xff] %v10297_v35  ;;  %v10299_v44 = vpop.permute.xlu0 %7397  ;;  %v3764_v4 = vsel %vm2850_vm13, %v7364_v10, %v12625_v18  ;;  %v12627_v53 = vunpack.i.h.bf16 %v9399_v1  ;;  %v12629_v18 = vpack.i.bf16 %v10075_v55, %v10099_v0  ;;  %v12632_v55 = vunpack.i.h.bf16 %v12621_v6 }
 0x2f0   : > { %12624 = vst [vmem:[#allocation38_spill] sm:$0xff] %v10299_v44  ;;  %6625 = vmatprep.subr.bf16.mxu1 %v6624_v58  ;;  %v10316_v37 = vsel %vm2850_vm13, %v7129_v9, %v12628_v21  ;;  %v12630_v58 = vunpack.i.h.bf16 %v12618_v3  ;;  %v10330_v9 = vsel %vm2850_vm13, %v7059_v41, %v7134_v59  ;;  %v12633_v21 = vunpack.i.l.bf16 %v12607_v20  ;;  %v12660_v44 = vld [vmem:[#allocation23_spill] sm:$0xff] }
 0x2f1   : > { %v3766_v40 = vsel %vm2850_vm13, %v7124_v63, %v12627_v53  ;;  %7622 = vrot.lane.b32.xlu1 %v12629_v18, %s8036_s23  ;;  %7672 = vrot.lane.b32.xlu0 %v7671_v45, %s8032_s16  ;;  %v12631_v63 = vld [vmem:[#allocation57_spill] sm:$0xff]  ;;  %v3763_v53 = vsel %vm2850_vm13, %v7035_v27, %v7364_v10  ;;  %v10338_v62 = vsel %vm2850_vm13, %v7134_v59, %v12632_v55  ;;  %v12636_v18 = vld [vmem:[#allocation52_spill] sm:$0xff]  ;;  %v12645_v55 = vunpack.i.l.bf16 %v12600_v47 }
 0x2f2   : > { %v3762_v28 = vsel %vm2850_vm13, %v7119_v48, %v12630_v58  ;;  %v2394_v17 = vmul.f32 %v12631_v63, %v9765_v19  ;;  %6100 = vmatmul.mubr.msk.f32.vlgmr.msra.gmra.mrb[0].mxu1 %vm1755_vm2, %v10038_v33  ;;  %v10342_v45 = vsel %vm2850_vm13, %v7069_v25, %v7139_v46  ;;  %v3761_v41 = vsel %vm2850_vm13, %v12633_v21, %v7119_v48  ;;  %v10347_v10 = vpop.permute.xlu1 %7402 }
 0x2f3   : > { %v6628_v0 = vpack.c.bf16 %v3764_v4, %v3762_v28  ;;  %6627 = vmatpush1.bf16.msra.mxu1 %v6626_v7  ;;  %12634 = vst [vmem:[#allocation43_spill] sm:$0xff] %v10347_v10  ;;  %v10349_v27 = vpop.permute.xlu0 %7407  ;;  %3897 = vmatprep.mubr.f32.mxu1 %v10032_v34  ;;  %v12635_v4 = vld [vmem:[#allocation26_spill] sm:$0xff]  ;;  %v7149_v58 = vunpack.i.l.bf16 %v12636_v18  ;;  %v12328_v48 = vunpack.i.h.bf16 %v12636_v18  ;;  %v12637_v7 = vpack.i.bf16 %v10103_v5, %v10089_v2 }
 0x2f4   : > { %v7676_v33 = vpack.i.bf16 %v2395_v32, %v2394_v17  ;;  %v7144_v59 = vunpack.i.l.bf16 %v12635_v4  ;;  %v12327_v28 = vunpack.i.h.bf16 %v10349_v27  ;;  %v7409_v25 = vunpack.i.l.bf16 %v10349_v27  ;;  %v12638_v17 = vld [vmem:[#allocation53_spill] sm:$0xff]  ;;  %v12640_v2 = vld [vmem:[#allocation54_spill] sm:$0xff] }
 0x2f5   : > { %6629 = vmatprep.subr.bf16.mxu1 %v6628_v0  ;;  %v7145_v20 = vunpack.i.h.bf16 %v12635_v4  ;;  %7627 = vrot.lane.b32.xlu1 %v12637_v7, %s8036_s23  ;;  %v6630_v32 = vpack.c.bf16 %v3763_v53, %v3761_v41  ;;  %v10366_v63 = vsel %vm2850_vm13, %v7139_v46, %v12326_v26  ;;  %v7154_v0 = vunpack.i.l.bf16 %v12638_v17 }
 0x2f6   : > { %7677 = vrot.lane.b32.xlu0 %v7676_v33, %s8032_s16  ;;  %v12639_v21 = vunpack.i.h.bf16 %v12608_v15  ;;  %v3768_v5 = vsel %vm2850_vm13, %v7409_v25, %v12327_v28  ;;  %v7204_v33 = vunpack.i.l.bf16 %v12640_v2  ;;  %v10377_v53 = vpop.permute.xlu1 %7417  ;;  %v2407_v26 = vmul.f32 %v9963_v50, %v9785_v29 }
 0x2f7   : > { %6631 = vmatpush1.bf16.msra.mxu1 %v6630_v32  ;;  %12641 = vst [vmem:[#allocation42_spill] sm:$0xff] %v10377_v53  ;;  %v10379_v41 = vpop.permute.xlu0 %7412  ;;  %v6632_v46 = vpack.c.bf16 %v3768_v5, %v3766_v40  ;;  %v12644_v15 = vunpack.i.l.bf16 %v12643_v56  ;;  %v12646_v32 = vld [vmem:[#allocation33_spill] sm:$0xff]  ;;  %v12647_v40 = vld [vmem:[#allocation103_spill] sm:$0xff]  ;;  %v12648_v29 = vpack.i.bf16 %v10107_v43, %v10093_v31  ;;  %v10413_v5 = vsel %vm1670_vm6, %v7144_v59, %v7145_v20 }
 0x2f8   : > { %v3767_v4 = vsel %vm2850_vm13, %v12639_v21, %v7409_v25  ;;  %12642 = vst [vmem:[#allocation45_spill] sm:$0xff] %v10379_v41  ;;  %v10391_v25 = vsel %vm1670_vm6, %v12645_v55, %v7149_v58  ;;  %v10396_v28 = vsel %vm2082_vm8, %v12646_v32, %v10265_v14  ;;  %v12649_v55 = vld [vmem:[#allocation84_spill] sm:$0xff]  ;;  %v12651_v31 = vld [vmem:[#allocation77_spill] sm:$0xff]  ;;  %v12652_v43 = vld [vmem:[#allocation95_spill] sm:$0xff] }
 0x2f9   : > { %v6634_v7 = vpack.c.bf16 %v3767_v4, %v3765_v30  ;;  %v10386_v21 = vsel %vm1670_vm6, %v12644_v15, %v7144_v59  ;;  %v10401_v30 = vsel %vm2082_vm8, %v10265_v14, %v12647_v40  ;;  %7632 = vrot.lane.b32.xlu1 %v12648_v29, %s8036_s23  ;;  %v2406_v4 = vmul.f32 %v12649_v55, %v9765_v19  ;;  %v12658_v41 = vld [vmem:[#allocation98_spill] sm:$0xff] }
 0x2fa   : > { %7687 = vrot.lane.b32.xlu0 %v9902_v60, %s8032_s16  ;;  %v10418_v14 = vsel %vm1670_vm6, %v7149_v58, %v12328_v48  ;;  %v12650_v15 = vunpack.i.l.bf16 %v12590_v61  ;;  %6633 = vmatprep.subr.bf16.mxu1 %v6632_v46  ;;  %v2356_v29 = vmul.f32 %v12652_v43, %v12651_v31  ;;  %v2360_v19 = vmul.f32 %v9933_v36, %v12651_v31  ;;  %v10434_v58 = vpop.permute.xlu1 %7442  ;;  %v12656_v46 = vld [vmem:[#allocation97_spill] sm:$0xff] }
 0x2fb   : > { %v12653_v59 = vunpack.i.h.bf16 %v12638_v17  ;;  %6635 = vmatpush1.bf16.msra.mxu1 %v6634_v7  ;;  %12654 = vst [vmem:[#allocation14_spill] sm:$0xff] %v10434_v58  ;;  %v10436_v48 = vpop.permute.xlu0 %7422  ;;  %v7696_v50 = vpack.i.bf16 %v2407_v26, %v2406_v4  ;;  %v10443_v53 = vmul.f32 %v12656_v46, %v10396_v28  ;;  %v10447_v10 = vmul.f32 %v12658_v41, %v10401_v30 }
 0x2fc   : > { %v10423_v40 = vsel %vm1670_vm6, %v12650_v15, %v7154_v0  ;;  %v10439_v15 = vsel %vm1670_vm6, %v7145_v20, %v7204_v33  ;;  %v7424_v58 = vunpack.i.l.bf16 %v10436_v48  ;;  %v12661_v26 = vpack.c.bf16 %v10128_v11, %v10121_v12  ;;  %v12662_v20 = vld [vmem:[#allocation55_spill] sm:$0xff]  ;;  %v12680_v33 = vld [vmem:[#allocation72_spill] sm:$0xff] }
 0x2fd   : > { %v10432_v55 = vsel %vm1670_vm6, %v7154_v0, %v12653_v59  ;;  %12655 = vst [vmem:[#allocation51_spill] sm:$0xff] %v10439_v15  ;;  %12657 = vst [vmem:[#allocation49_spill] sm:$0xff] %v10443_v53  ;;  %v12334_v59 = vunpack.i.h.bf16 %v10436_v48  ;;  %v12663_v41 = vpack.i.bf16 %v10155_v38, %v10138_v52  ;;  %v12664_v0 = vld [vmem:[#allocation83_spill] sm:$0xff]  ;;  %v12666_v12 = vunpack.i.h.bf16 %v12611_v57  ;;  %v12667_v52 = vld [vmem:[#allocation82_spill] sm:$0xff] }
 0x2fe   : > { %12659 = vst [vmem:[#allocation10_spill] sm:$0xff] %v10447_v10  ;;  %6637 = vmatprep.subr.bf16.mxu1 %v12661_v26  ;;  %7697 = vrot.lane.b32.xlu0 %v7696_v50, %s8032_s16  ;;  %v10467_v7 = vmul.f32 %v12664_v0, %v10396_v28  ;;  %v7706_v26 = vpack.i.bf16 %v2360_v19, %v2356_v29  ;;  %v12670_v19 = vld [vmem:[#allocation70_spill] sm:$0xff]  ;;  %v12672_v46 = vunpack.i.l.bf16 %v12609_v51 }
 0x2ff   : > { %7637 = vrot.lane.b32.xlu1 %v12663_v41, %s8030_s26  ;;  %v3775_v11 = vsel %vm2850_vm13, %v12666_v12, %v7424_v58  ;;  %v3776_v4 = vsel %vm2850_vm13, %v7424_v58, %v12334_v59  ;;  %v10477_v38 = vmul.f32 %v12667_v52, %v10401_v30  ;;  %v12669_v50 = vpack.c.bf16 %v9975_v16, %v9980_v22  ;;  %v10482_v41 = vpop.permute.xlu1 %7457  ;;  %v10484_v0 = vpop.permute.xlu0 %7427  ;;  %v12674_v22 = vld [vmem:[#allocation9_spill] sm:$0xff] }
 0x300   : > { %12665 = vst [vmem:[#allocation87_spill] sm:$0xff] %v10467_v7  ;;  %v6640_v57 = vpack.c.bf16 %v3776_v4, %v10316_v37  ;;  %v6642_v29 = vpack.c.bf16 %v3775_v11, %v10308_v54  ;;  %v4880_v12 = vmul.f32 %v12670_v19, %v10396_v28  ;;  %v4881_v58 = vmul.f32 %v12652_v43, %v10401_v30  ;;  %v12675_v4 = vld [vmem:[#allocation20_spill] sm:$0xff]  ;;  %v12677_v43 = vld [vmem:[#allocation111_spill] sm:$0xff]  ;;  %v12683_v7 = vld [vmem:[#allocation62_spill] sm:$0xff] }
 0x301   : > { %12668 = vst [vmem:[#allocation57_spill] sm:$0xff] %v10477_v38  ;;  %6639 = vmatpush1.bf16.msra.mxu1 %v12669_v50  ;;  %v12671_v52 = vunpack.i.l.bf16 %v12660_v44  ;;  %v12339_v59 = vunpack.i.h.bf16 %v10484_v0  ;;  %v7429_v37 = vunpack.i.l.bf16 %v10484_v0  ;;  %v7164_v54 = vunpack.i.l.bf16 %v12674_v22  ;;  %v12676_v19 = vld [vmem:[#allocation60_spill] sm:$0xff]  ;;  %v12684_v38 = vld [vmem:[#allocation65_spill] sm:$0xff] }
 0x302   : > { %v7224_v11 = vunpack.i.l.bf16 %v12675_v4  ;;  %v12678_v35 = vpack.i.bf16 %v10172_v8, %v12677_v43  ;;  %7707 = vrot.lane.b32.xlu0 %v7706_v26, %s8032_s16  ;;  %6641 = vmatprep.subr.bf16.mxu1 %v6640_v57  ;;  %v4879_v10 = vmul.f32 %v12680_v33, %v12646_v32  ;;  %v12681_v8 = vld [vmem:[#allocation71_spill] sm:$0xff]  ;;  %v7184_v26 = vunpack.i.l.bf16 %v12676_v19  ;;  %v12686_v4 = vld [vmem:[#allocation25_spill] sm:$0xff] }
 0x303   : > { %v10497_v16 = vsel %vm2346_vm7, %v12672_v46, %v12671_v52  ;;  %v12679_v52 = vunpack.i.h.bf16 %v12613_v39  ;;  %v3780_v53 = vsel %vm2850_vm13, %v7429_v37, %v12339_v59  ;;  %v10523_v43 = vpop.permute.xlu1 %7497  ;;  %v10525_v46 = vpop.permute.xlu0 %7432  ;;  %v7716_v39 = vpack.i.bf16 %v4881_v58, %v4880_v12 }
 0x304   : > { %12673 = vst [vmem:[#allocation26_spill] sm:$0xff] %v10497_v16  ;;  %7642 = vrot.lane.b32.xlu1 %v12678_v35, %s8036_s23  ;;  %v4882_v35 = vmul.f32 %v12681_v8, %v12646_v32  ;;  %12682 = vst [vmem:[#allocation52_spill] sm:$0xff] %v10523_v43  ;;  %v6644_v57 = vpack.c.bf16 %v3780_v53, %v10338_v62  ;;  %v12342_v33 = vunpack.i.h.bf16 %v10525_v46  ;;  %v7434_v8 = vunpack.i.l.bf16 %v10525_v46  ;;  %v12687_v62 = vld [vmem:[#allocation112_spill] sm:$0xff]  ;;  %v12688_v53 = vld [vmem:[#allocation113_spill] sm:$0xff] }
 0x305   : > { %v3779_v50 = vsel %vm2850_vm13, %v12679_v52, %v7429_v37  ;;  %6643 = vmatpush1.bf16.msra.mxu1 %v6642_v29  ;;  %v7199_v15 = vunpack.i.l.bf16 %v12684_v38  ;;  %v12685_v29 = vld [vmem:[#allocation24_spill] sm:$0xff] }
 0x306   : > { %v6646_v52 = vpack.c.bf16 %v3779_v50, %v10330_v9  ;;  %v7209_v16 = vunpack.i.l.bf16 %v12685_v29  ;;  %v12689_v9 = vpack.i.bf16 %v12687_v62, %v12688_v53  ;;  %7717 = vrot.lane.b32.xlu0 %v7716_v39, %s8033_s13  ;;  %v12690_v50 = vunpack.i.h.bf16 %v12614_v23  ;;  %6645 = vmatprep.subr.bf16.mxu1 %v6644_v57  ;;  %v12693_v53 = vld [vmem:[#allocation74_spill] sm:$0xff] }
 0x307   : > { %v7726_v37 = vpack.i.bf16 %v4882_v35, %v4879_v10  ;;  %v3784_v17 = vsel %vm2850_vm13, %v7434_v8, %v12342_v33  ;;  %v10549_v12 = vpop.permute.xlu1 %7512  ;;  %v10551_v38 = vpop.permute.xlu0 %7437  ;;  %v4886_v23 = vmul.f32 %v12693_v53, %v10396_v28  ;;  %v12695_v10 = vld [vmem:[#allocation40_spill] sm:$0xff] }
 0x308   : > { %7647 = vrot.lane.b32.xlu1 %v12689_v9, %s8030_s26  ;;  %v3783_v59 = vsel %vm2850_vm13, %v12690_v50, %v7434_v8  ;;  %12691 = vst [vmem:[#allocation54_spill] sm:$0xff] %v10549_v12  ;;  %12692 = vst [vmem:[#allocation13_spill] sm:$0xff] %v10551_v38  ;;  %v6648_v62 = vpack.c.bf16 %v3784_v17, %v10366_v63  ;;  %v12694_v9 = vld [vmem:[#allocation96_spill] sm:$0xff]  ;;  %v12696_v35 = vunpack.i.l.bf16 %v12695_v10  ;;  %v12699_v8 = vunpack.i.l.bf16 %v12660_v44  ;;  %v12704_v38 = vld [vmem:[#allocation15_spill] sm:$0xff] }
 0x309   : > { %6647 = vmatpush1.bf16.msra.mxu1 %v6646_v52  ;;  %v6650_v39 = vpack.c.bf16 %v3783_v59, %v10342_v45  ;;  %v4887_v57 = vmul.f32 %v12694_v9, %v10401_v30  ;;  %v12698_v52 = vunpack.i.h.bf16 %v12660_v44  ;;  %v12700_v45 = vunpack.i.h.bf16 %v12674_v22  ;;  %v12705_v44 = vld [vmem:[#allocation114_spill] sm:$0xff] }
 0x30a   : > { %v10562_v50 = vsel %vm2346_vm7, %v12696_v35, %v7164_v54  ;;  %v12701_v17 = vunpack.i.h.bf16 %v12662_v20  ;;  %v12702_v59 = vunpack.i.l.bf16 %v12662_v20  ;;  %v12703_v35 = vld [vmem:[#allocation67_spill] sm:$0xff]  ;;  %7727 = vrot.lane.b32.xlu0 %v7726_v37, %s8033_s13  ;;  %6649 = vmatprep.subr.bf16.mxu1 %v6648_v62  ;;  %v12713_v37 = vld [vmem:[#allocation101_spill] sm:$0xff] }
 0x30b   : > { %12697 = vst [vmem:[#allocation33_spill] sm:$0xff] %v10562_v50  ;;  %v10569_v33 = vsel %vm2346_vm7, %v12699_v8, %v12698_v52  ;;  %v10574_v63 = vsel %vm2346_vm7, %v7164_v54, %v12700_v45  ;;  %v7219_v58 = vunpack.i.l.bf16 %v12703_v35  ;;  %v12706_v50 = vpack.i.bf16 %v12704_v38, %v12705_v44 }
 0x30c   : > { %v10581_v53 = vsel %vm2346_vm7, %v12702_v59, %v12701_v17  ;;  %v12707_v52 = vunpack.i.h.bf16 %v12676_v19  ;;  %v12708_v8 = vunpack.i.h.bf16 %v12636_v18  ;;  %v12709_v17 = vunpack.i.h.bf16 %v12683_v7 }
 0x30d   : > { %7652 = vrot.lane.b32.xlu1 %v12706_v50, %s8030_s26  ;;  %v12710_v59 = vunpack.i.l.bf16 %v12683_v7  ;;  %v10607_v44 = vsel %vm2346_vm7, %v7199_v15, %v7184_v26  ;;  %v12712_v38 = vunpack.i.h.bf16 %v9379_v13  ;;  %v12714_v50 = vunpack.i.h.bf16 %v12713_v37  ;;  %6651 = vmatpush1.bf16.msra.mxu1 %v6650_v39  ;;  %v10628_v13 = vpop.permute.xlu0 %7447 }
 0x30e   : > { %v10592_v54 = vsel %vm2346_vm7, %v7184_v26, %v12707_v52  ;;  %v10597_v45 = vsel %vm1670_vm6, %v12708_v8, %v7224_v11  ;;  %v12715_v18 = vunpack.i.h.bf16 %v12685_v29  ;;  %v12716_v8 = vunpack.i.h.bf16 %v12686_v4  ;;  %v10626_v26 = vpop.permute.xlu1 %7517  ;;  %12720 = vst [vmem:[#allocation95_spill] sm:$0xff] %v10628_v13  ;;  %v12723_v29 = vld [vmem:[#allocation116_spill] sm:$0xff] }
 0x30f   : > { %v10604_v22 = vsel %vm2082_vm8, %v12710_v59, %v12709_v17  ;;  %v6652_v52 = vpack.c.bf16 %v12714_v50, %v12712_v38  ;;  %v12717_v19 = vunpack.i.l.bf16 %v12686_v4  ;;  %v7220_v15 = vunpack.i.h.bf16 %v12703_v35  ;;  %12719 = vst [vmem:[#allocation77_spill] sm:$0xff] %v10626_v26  ;;  %v5716_v59 = vld [vmem:[%s12147_s5 + $0x50] sm:$0xff]  ;;  %v12721_v38 = vld [vmem:[#allocation76_spill] sm:$0xff]  ;;  %v12722_v50 = vld [vmem:[#allocation75_spill] sm:$0xff] }
 0x310   : > { %12711 = vst [vmem:[#allocation103_spill] sm:$0xff] %v10604_v22  ;;  %v10616_v11 = vsel %vm2346_vm7, %v7209_v16, %v12715_v18  ;;  %v7736_v62 = vpack.i.bf16 %v4887_v57, %v4886_v23  ;;  %v4885_v37 = vmul.f32 %v12721_v38, %v12646_v32  ;;  %v4888_v18 = vmul.f32 %v12722_v50, %v12646_v32  ;;  %v12724_v38 = vld [vmem:[#allocation115_spill] sm:$0xff] }
 0x311   : > { %v10623_v17 = vsel %vm2082_vm8, %v12717_v19, %v12716_v8  ;;  %v7499_v19 = vunpack.i.l.bf16 %v10523_v43  ;;  %v7519_v39 = vunpack.i.l.bf16 %v10626_v26  ;;  %6653 = vmatprep.subr.bf16.mxu1 %v6652_v52  ;;  %v6965_v23 = vunpack.i.h.bf16 %v12600_v47  ;;  %5718 = vmatmul.mubr.msk.f32.vlgmr.msra.gmra.mrb[2].mxu1 %vm1755_vm2, %v5716_v59 }
 0x312   : > { %12718 = vst [vmem:[#allocation84_spill] sm:$0xff] %v10623_v17  ;;  %v10643_v57 = vsel %vm2346_vm7, %v7219_v58, %v7209_v16  ;;  %v12725_v17 = vpack.i.bf16 %v12723_v29, %v12724_v38  ;;  %7737 = vrot.lane.b32.xlu0 %v7736_v62, %s8033_s13  ;;  %v12726_v50 = vunpack.i.h.bf16 %v12618_v3  ;;  %v12727_v35 = vunpack.i.h.bf16 %v10240_v49  ;;  %v12732_v3 = vld [vmem:[#allocation79_spill] sm:$0xff]  ;;  %6655 = vmatpush3.bf16.msra.mxu1 %v6652_v52  ;;  %v12736_v52 = vld [vmem:[#allocation69_spill] sm:$0xff] }
 0x313   : > { %v12728_v47 = vunpack.i.l.bf16 %v10549_v12  ;;  %v12730_v58 = vunpack.i.l.bf16 %v10628_v13  ;;  %v12733_v49 = vld [vmem:[#allocation99_spill] sm:$0xff]  ;;  %3903 = vmatprep.mubr.f32.mxu1 %v10032_v34  ;;  %v12742_v26 = vunpack.i.h.bf16 %v12643_v56  ;;  %v12744_v22 = vunpack.i.h.bf16 %v10349_v27 }
 0x314   : > { %7657 = vrot.lane.b32.xlu1 %v12725_v17, %s8030_s26  ;;  %v6656_v43 = vpack.c.bf16 %v12727_v35, %v12726_v50  ;;  %v4892_v17 = vmul.f32 %v12732_v3, %v10396_v28  ;;  %v4893_v62 = vmul.f32 %v12733_v49, %v10401_v30  ;;  %v12734_v35 = vunpack.i.l.bf16 %v12662_v20  ;;  %v12735_v3 = vld [vmem:[#allocation4_spill] sm:$0xff]  ;;  %v10697_v20 = vld [vmem:[#allocation3 + $0xa8] sm:$0xff] }
 0x315   : > { %v10659_v16 = vsel %vm1436_vm12, %v7519_v39, %v12728_v47  ;;  %v10664_v29 = vsel %vm1436_vm12, %v7499_v19, %v12730_v58  ;;  %v7459_v50 = vunpack.i.l.bf16 %v10482_v41  ;;  %v10678_v19 = vpop.permute.xlu0 %7452  ;;  %v7746_v47 = vpack.i.bf16 %v4888_v18, %v4885_v37  ;;  %v10684_v58 = vld [vmem:[%s12147_s5 + $0x58] sm:$0xf]  ;;  %12740 = vst [vmem:[#allocation83_spill] sm:$0xff] %v10697_v20 }
 0x316   : > { %12729 = vst [vmem:[#allocation97_spill] sm:$0xff] %v10659_v16  ;;  %12731 = vst [vmem:[#allocation98_spill] sm:$0xff] %v10664_v29  ;;  %v10674_v38 = vsel %vm2346_vm7, %v7220_v15, %v12734_v35  ;;  %v7229_v15 = vunpack.i.l.bf16 %v12735_v3  ;;  %v7454_v39 = vunpack.i.l.bf16 %v10678_v19  ;;  %6657 = vmatprep.subr.bf16.mxu1 %v6656_v43  ;;  %v12737_v18 = vld [vmem:[#allocation91_spill] sm:$0xff]  ;;  %v12738_v29 = vld [vmem:[#allocation90_spill] sm:$0xff]  ;;  %v4891_v8 = vmul.f32 %v10697_v20, %v12646_v32 }
 0x317   : > { %v12739_v13 = vpack.i.bf16 %v12737_v18, %v12738_v29  ;;  %7747 = vrot.lane.b32.xlu0 %v7746_v47, %s8033_s13  ;;  %v12741_v35 = vld [vmem:[#allocation32_spill] sm:$0xff]  ;;  %v12743_v37 = vunpack.i.h.bf16 %v9399_v1  ;;  %v12745_v47 = vunpack.i.h.bf16 %v10678_v19  ;;  %5719 = vmatmul.mubr.msk.f32.gmra.mrb[4].mxu1 %vm1755_vm2, %v10684_v58  ;;  %v12747_v27 = vunpack.i.h.bf16 %v10482_v41 }
 0x318   : > { %v4894_v16 = vmul.f32 %v12741_v35, %v12646_v32  ;;  %v1698_v12 = vsel %vm1670_vm6, %v12742_v26, %v7454_v39  ;;  %v12746_v20 = vld [vmem:[#allocation56_spill] sm:$0xff]  ;;  %6659 = vmatpush3.bf16.msra.mxu1 %v6656_v43  ;;  %6130 = vmatprep.mubr.msk.f32.mxu1 %vm1755_vm2, %v5716_v59  ;;  %v12753_v26 = vunpack.i.h.bf16 %v12736_v52 }
 0x319   : > { %7682 = vrot.lane.b32.xlu1 %v12739_v13, %s8032_s16  ;;  %v6660_v29 = vpack.c.bf16 %v12744_v22, %v12743_v37  ;;  %v7756_v13 = vpack.i.bf16 %v4893_v62, %v4892_v17  ;;  %v1699_v18 = vsel %vm1670_vm6, %v7454_v39, %v12745_v47  ;;  %v7234_v4 = vunpack.i.l.bf16 %v12746_v20  ;;  %v10717_v56 = vpop.permute.xlu0 %7462  ;;  %v12749_v39 = vld [vmem:[#allocation93_spill] sm:$0xff]  ;;  %v12750_v37 = vld [vmem:[#allocation92_spill] sm:$0xff] }
 0x31a   : > { %v6362_v35 = vpack.c.bf16 %v1698_v12, %v10386_v21  ;;  %v6360_v1 = vpack.c.bf16 %v1699_v18, %v10413_v5  ;;  %v1705_v22 = vsel %vm1670_vm6, %v7459_v50, %v12747_v27  ;;  %v7464_v17 = vunpack.i.l.bf16 %v10717_v56  ;;  %v12748_v21 = vld [vmem:[#allocation21_spill] sm:$0xff] }
 0x31b   : > { %6661 = vmatprep.subr.bf16.mxu1 %v6660_v29  ;;  %v2364_v62 = vmul.f32 %v12694_v9, %v12651_v31  ;;  %v2368_v43 = vmul.f32 %v12748_v21, %v12651_v31  ;;  %v6970_v12 = vunpack.i.h.bf16 %v12590_v61  ;;  %v10732_v5 = vsel %vm2346_vm7, %v7234_v4, %v7229_v15  ;;  %7757 = vrot.lane.b32.xlu0 %v7756_v13, %s8033_s13 }
 0x31c   : > { %v12751_v59 = vpack.i.bf16 %v12749_v39, %v12750_v37  ;;  %v12752_v9 = vunpack.i.h.bf16 %v12735_v3  ;;  %v1704_v61 = vsel %vm1670_vm6, %v6965_v23, %v7459_v50  ;;  %6361 = vmatprep.subr.bf16.mxu0 %v6360_v1  ;;  %v6364_v4 = vpack.c.bf16 %v1705_v22, %v10418_v14  ;;  %v12756_v37 = vld [vmem:[#allocation73_spill] sm:$0xff]  ;;  %6663 = vmatpush3.bf16.msra.mxu1 %v6660_v29  ;;  %v12758_v50 = vld [vmem:[#allocation107_spill] sm:$0xff] }
 0x31d   : > { %v7766_v27 = vpack.i.bf16 %v4894_v16, %v4891_v8  ;;  %v12754_v39 = vunpack.i.l.bf16 %v12736_v52  ;;  %6363 = vmatpush1.bf16.msra.mxu0 %v6362_v35  ;;  %v7468_v47 = vpop.permute.xlu0 %7467  ;;  %v4898_v14 = vmul.f32 %v12758_v50, %v10396_v28  ;;  %v7981_v8 = vld [vmem:[#allocation3 + $0x108] sm:$0xff]  ;;  %v12760_v35 = vld [vmem:[#allocation108_spill] sm:$0xff]  ;;  %v7982_v50 = vld [vmem:[#allocation3 + $0x38] sm:$0xff] }
 0x31e   : > { %7692 = vrot.lane.b32.xlu1 %v12751_v59, %s8032_s16  ;;  %v10744_v18 = vsel %vm2346_vm7, %v7229_v15, %v12752_v9  ;;  %v7309_v59 = vunpack.i.l.bf16 %v12756_v37  ;;  %v12757_v15 = vunpack.i.h.bf16 %v10717_v56  ;;  %v4899_v16 = vmul.f32 %v7981_v8, %v10401_v30  ;;  %6365 = vmatprep.subr.bf16.mxu0 %v6364_v4 }
 0x31f   : > { %v10753_v13 = vsel %vm2082_vm8, %v12754_v39, %v12753_v26  ;;  %v7470_v1 = vunpack.i.h.bf16 %v7468_v47  ;;  %v7469_v22 = vunpack.i.l.bf16 %v7468_v47  ;;  %v12759_v26 = vld [vmem:[#allocation16_spill] sm:$0xff]  ;;  %v7711_v9 = vpack.i.bf16 %v2368_v43, %v2364_v62  ;;  %7767 = vrot.lane.b32.xlu0 %v7766_v27, %s8033_s13  ;;  %v10771_v47 = vld [vmem:[#allocation3 + $0x120] sm:$0xff] }
 0x320   : > { %12755 = vst [vmem:[#allocation82_spill] sm:$0xff] %v10753_v13  ;;  %v1711_v23 = vsel %vm1670_vm6, %v7464_v17, %v12757_v15  ;;  %6665 = vmatprep.subr.bf16.mxu1 %v12759_v26  ;;  %v4897_v29 = vmul.f32 %v12760_v35, %v12646_v32  ;;  %v6366_v15 = vpack.c.bf16 %v1704_v61, %v10391_v25  ;;  %12761 = vst [vmem:[#allocation70_spill] sm:$0xff] %v10771_v47  ;;  %v12764_v13 = vld [vmem:[#allocation37_spill] sm:$0xff] }
 0x321   : > { %v4883_v3 = vmul.f32 %v7982_v50, %v10396_v28  ;;  %v4900_v62 = vmul.f32 %v10771_v47, %v12646_v32  ;;  %v1710_v43 = vsel %vm1670_vm6, %v6970_v12, %v7464_v17  ;;  %v6368_v4 = vpack.c.bf16 %v1711_v23, %v10432_v55  ;;  %6667 = vmatpush3.bf16.msra.mxu1 %v12759_v26  ;;  %v7473_v27 = vpop.permute.xlu0 %7472  ;;  %v12766_v55 = vld [vmem:[#allocation44_spill] sm:$0xff] }
 0x322   : > { %7702 = vrot.lane.b32.xlu1 %v9902_v60, %s8032_s16  ;;  %v12762_v35 = vunpack.i.h.bf16 %v12617_v42  ;;  %v12763_v60 = vunpack.i.h.bf16 %v10436_v48  ;;  %v4884_v25 = vmul.f32 %v9933_v36, %v10401_v30  ;;  %6367 = vmatpush1.bf16.msra.mxu0 %v6366_v15  ;;  %v7776_v50 = vpack.i.bf16 %v4899_v16, %v4898_v14 }
 0x323   : > { %v12765_v47 = vunpack.i.h.bf16 %v12764_v13  ;;  %v12767_v12 = vunpack.i.h.bf16 %v12766_v55  ;;  %v12768_v48 = vunpack.i.l.bf16 %v12736_v52  ;;  %v7475_v36 = vunpack.i.h.bf16 %v7473_v27  ;;  %6369 = vmatprep.subr.bf16.mxu0 %v6368_v4  ;;  %v12772_v55 = vld [vmem:[#allocation88_spill] sm:$0xff]  ;;  %v12790_v13 = vld [vmem:[#allocation59_spill] sm:$0xff] }
 0x324   : > { %v6668_v39 = vpack.c.bf16 %v12763_v60, %v12762_v35  ;;  %v7474_v35 = vunpack.i.l.bf16 %v7473_v27  ;;  %v2372_v14 = vmul.f32 %v12733_v49, %v12651_v31  ;;  %v6370_v16 = vpack.c.bf16 %v1710_v43, %v10423_v40  ;;  %7777 = vrot.lane.b32.xlu0 %v7776_v50, %s8033_s13  ;;  %v7984_v49 = vld [vmem:[#allocation3 + $0x150] sm:$0xff] }
 0x325   : > { %v1673_v17 = vsel %vm1670_vm6, %v12765_v47, %v7469_v22  ;;  %v1676_v42 = vsel %vm1670_vm6, %v12767_v12, %v7470_v1  ;;  %v10794_v23 = vsel %vm2082_vm8, %v7309_v59, %v12768_v48  ;;  %v7786_v1 = vpack.i.bf16 %v4900_v62, %v4897_v29  ;;  %v12769_v22 = vld [vmem:[#allocation27_spill] sm:$0xff]  ;;  %v10815_v29 = vld [vmem:[%s12147_s5 + $0x10] sm:$0xff]  ;;  %v12775_v43 = vld [vmem:[#allocation12_spill] sm:$0xff] }
 0x326   : > { %6669 = vmatprep.subr.bf16.mxu1 %v6668_v39  ;;  %7712 = vrot.lane.b32.xlu1 %v7711_v9, %s8032_s16  ;;  %v2376_v59 = vmul.f32 %v12769_v22, %v12651_v31  ;;  %v6372_v26 = vpack.c.bf16 %v1676_v42, %v1673_v17  ;;  %v12770_v15 = vunpack.i.h.bf16 %v12621_v6  ;;  %v12771_v47 = vunpack.i.h.bf16 %v10484_v0  ;;  %v10810_v9 = vpop.permute.xlu0 %7477  ;;  %v12773_v62 = vld [vmem:[#allocation39_spill] sm:$0xff]  ;;  %v12777_v50 = vld [vmem:[#allocation104_spill] sm:$0xff] }
 0x327   : > { %v7721_v60 = vpack.i.bf16 %v4884_v25, %v4883_v3  ;;  %v4904_v27 = vmul.f32 %v7984_v49, %v10396_v28  ;;  %v7265_v40 = vunpack.i.h.bf16 %v12772_v55  ;;  %6371 = vmatpush1.bf16.msra.mxu0 %v6370_v16  ;;  %6671 = vmatpush3.bf16.msra.mxu1 %v6668_v39  ;;  %v12774_v6 = vunpack.i.h.bf16 %v12773_v62  ;;  %v12778_v16 = vld [vmem:[#allocation85_spill] sm:$0xff]  ;;  %v10838_v49 = vld [vmem:[#allocation3 + $0x130] sm:$0xff] }
 0x328   : > { %v6672_v4 = vpack.c.bf16 %v12771_v47, %v12770_v15  ;;  %v12776_v3 = vunpack.i.h.bf16 %v12775_v43  ;;  %v4905_v17 = vmul.f32 %v12777_v50, %v10401_v30  ;;  %v7264_v39 = vunpack.i.l.bf16 %v12772_v55  ;;  %6373 = vmatprep.subr.bf16.mxu0 %v6372_v26  ;;  %7787 = vrot.lane.b32.xlu0 %v7786_v1, %s8033_s13  ;;  %v10834_v15 = vld [vmem:[#allocation3 + $0x148] sm:$0xff] }
 0x329   : > { %v1679_v0 = vsel %vm1670_vm6, %v12774_v6, %v7474_v35  ;;  %v12360_v12 = vunpack.i.h.bf16 %v10810_v9  ;;  %v7479_v42 = vunpack.i.l.bf16 %v10810_v9  ;;  %v10829_v48 = vmul.f32 %v7981_v8, %v12651_v31  ;;  %v10851_v6 = vld [vmem:[#allocation3 + $0x170] sm:$0xff] }
 0x32a   : > { %v1682_v25 = vsel %vm1670_vm6, %v12776_v3, %v7475_v36  ;;  %6673 = vmatprep.subr.bf16.mxu1 %v6672_v4  ;;  %7722 = vrot.lane.b32.xlu1 %v7721_v60, %s8033_s13  ;;  %v7731_v36 = vpack.i.bf16 %v2376_v59, %v2372_v14  ;;  %v4903_v47 = vmul.f32 %v10834_v15, %v12646_v32  ;;  %v12779_v60 = vunpack.i.h.bf16 %v12622_v24  ;;  %v7987_v59 = vld [vmem:[#allocation3 + $0x88] sm:$0xff]  ;;  %v12781_v3 = vld [vmem:[#allocation20_spill] sm:$0xff]  ;;  %v7483_v61 = vpop.permute.xlu0 %7482 }
 0x32b   : > { %v10842_v55 = vmul.f32 %v10838_v49, %v12651_v31  ;;  %5686 = vmatmul.mubr.msk.f32.vlgmr.msra.gmra.mrb[8].mxu0 %vm1755_vm2, %v10815_v29  ;;  %v6376_v8 = vpack.c.bf16 %v1682_v25, %v1679_v0  ;;  %v12780_v1 = vunpack.i.h.bf16 %v10525_v46  ;;  %v4889_v62 = vmul.f32 %v7987_v59, %v10396_v28  ;;  %6675 = vmatpush3.bf16.msra.mxu1 %v6672_v4  ;;  %v12784_v59 = vld [vmem:[#allocation105_spill] sm:$0xff] }
 0x32c   : > { %v4906_v43 = vmul.f32 %v10851_v6, %v12646_v32  ;;  %6375 = vmatpush3.bf16.msra.mxu0 %v6372_v26  ;;  %v7796_v35 = vpack.i.bf16 %v4905_v17, %v4904_v27  ;;  %v4191_v24 = vsel %vm2346_vm7, %v7479_v42, %v12360_v12  ;;  %v4890_v46 = vmul.f32 %v12748_v21, %v10401_v30  ;;  %v7989_v17 = vld [vmem:[#allocation3 + $0x1a0] sm:$0xff] }
 0x32d   : > { %v6676_v14 = vpack.c.bf16 %v12780_v1, %v12779_v60  ;;  %v12782_v0 = vunpack.i.l.bf16 %v12778_v16  ;;  %v12783_v60 = vunpack.i.l.bf16 %v12683_v7  ;;  %v7485_v26 = vunpack.i.h.bf16 %v7483_v61  ;;  %6377 = vmatprep.subr.bf16.mxu0 %v6376_v8  ;;  %1832 = vmatprep.mubr.f32.mxu0 %v10032_v34 }
 0x32e   : > { %v7484_v4 = vunpack.i.l.bf16 %v7483_v61  ;;  %7732 = vrot.lane.b32.xlu1 %v7731_v36, %s8032_s16  ;;  %7797 = vrot.lane.b32.xlu0 %v7796_v35, %s8033_s13  ;;  %v7751_v21 = vpack.i.bf16 %v10842_v55, %v10829_v48  ;;  %v10882_v61 = vld [vmem:[%s12147_s5 + $0x18] sm:$0xf]  ;;  %v6680_v35 = vpack.c.bf16 %v4191_v24, %v10569_v33  ;;  %v12788_v55 = vld [vmem:[#allocation46_spill] sm:$0xff]  ;;  %v10896_v7 = vpop.permute.xlu0 %7487 }
 0x32f   : > { %v10864_v25 = vsel %vm2082_vm8, %v7264_v39, %v12782_v0  ;;  %v10869_v1 = vsel %vm2082_vm8, %v7265_v40, %v12783_v60  ;;  %6677 = vmatprep.subr.bf16.mxu1 %v6676_v14  ;;  %v4910_v39 = vmul.f32 %v7989_v17, %v10396_v28  ;;  %v4911_v40 = vmul.f32 %v12784_v59, %v10401_v30  ;;  %v12786_v60 = vld [vmem:[#allocation31_spill] sm:$0xff] }
 0x330   : > { %v12785_v0 = vunpack.i.h.bf16 %v12609_v51  ;;  %v12787_v12 = vunpack.i.h.bf16 %v12786_v60  ;;  %v12789_v17 = vunpack.i.h.bf16 %v12788_v55  ;;  %6379 = vmatpush3.bf16.msra.mxu0 %v6376_v8  ;;  %6679 = vmatpush3.bf16.msra.mxu1 %v6676_v14  ;;  %v7741_v51 = vpack.i.bf16 %v4890_v46, %v4889_v62  ;;  %v12792_v62 = vld [vmem:[#allocation26_spill] sm:$0xff]  ;;  %v7992_v46 = vld [vmem:[#allocation3 + $0xd8] sm:$0xff] }
 0x331   : > { %v12363_v33 = vunpack.i.h.bf16 %v10896_v7  ;;  %v7489_v24 = vunpack.i.l.bf16 %v10896_v7  ;;  %6681 = vmatprep.subr.bf16.mxu1 %v6680_v35  ;;  %5687 = vmatmul.mubr.msk.f32.gmra.mrb[10].mxu0 %vm1755_vm2, %v10882_v61  ;;  %v4896_v35 = vmul.f32 %v12769_v22, %v10401_v30  ;;  %v12793_v60 = vld [vmem:[#allocation65_spill] sm:$0xff]  ;;  %v12794_v55 = vunpack.i.h.bf16 %v12695_v10 }
 0x332   : > { %v4190_v36 = vsel %vm2346_vm7, %v12785_v0, %v7479_v42  ;;  %v1685_v48 = vsel %vm1670_vm6, %v12787_v12, %v7484_v4  ;;  %v1688_v27 = vsel %vm1670_vm6, %v12789_v17, %v7485_v26  ;;  %v7806_v42 = vpack.i.bf16 %v4906_v43, %v4903_v47  ;;  %v10900_v12 = vld [vmem:[#allocation3 + $0x198] sm:$0xff]  ;;  %v10904_v4 = vld [vmem:[#allocation3 + $0x1c0] sm:$0xff]  ;;  %v12791_v47 = vld [vmem:[#allocation80_spill] sm:$0xff]  ;;  %7742 = vrot.lane.b32.xlu1 %v7741_v51, %s8033_s13  ;;  %v10928_v22 = vpop.permute.xlu0 %7492 }
 0x333   : > { %v6380_v0 = vpack.c.bf16 %v1688_v27, %v1685_v48  ;;  %v4909_v26 = vmul.f32 %v10900_v12, %v12646_v32  ;;  %v4912_v8 = vmul.f32 %v10904_v4, %v12646_v32  ;;  %v7239_v14 = vunpack.i.l.bf16 %v12791_v47  ;;  %6131 = vmatmul.mubr.msk.f32.vlgmr.msra.gmra.mrb[0].mxu1 %vm1755_vm2, %v10684_v58  ;;  %5975 = vmatprep.mubr.msk.f32.mxu0 %vm1755_vm2, %v10815_v29 }
 0x334   : > { %v6682_v43 = vpack.c.bf16 %v4190_v36, %v12792_v62  ;;  %7807 = vrot.lane.b32.xlu0 %v7806_v42, %s8033_s13  ;;  %v4895_v27 = vmul.f32 %v7992_v46, %v10396_v28  ;;  %v7200_v48 = vunpack.i.h.bf16 %v12793_v60  ;;  %v4194_v17 = vsel %vm2346_vm7, %v12794_v55, %v7489_v24  ;;  %v12795_v62 = vld [vmem:[#allocation33_spill] sm:$0xff]  ;;  %4328 = vmatprep.mubr.f32.mxu1 %v10032_v34 }
 0x335   : > { %6381 = vmatprep.subr.bf16.mxu0 %v6380_v0  ;;  %v7816_v36 = vpack.i.bf16 %v4911_v40, %v4910_v39  ;;  %v4195_v51 = vsel %vm2346_vm7, %v7489_v24, %v12363_v33  ;;  %v12376_v42 = vunpack.i.h.bf16 %v12778_v16  ;;  %v6686_v46 = vpack.c.bf16 %v4194_v17, %v12795_v62  ;;  %v12798_v24 = vld [vmem:[#allocation34_spill] sm:$0xff]  ;;  %v12801_v33 = vld [vmem:[#allocation51_spill] sm:$0xff] }
 0x336   : > { %6383 = vmatpush3.bf16.msra.mxu0 %v6380_v0  ;;  %6683 = vmatpush1.bf16.msra.mxu1 %v6682_v43  ;;  %v6684_v10 = vpack.c.bf16 %v4195_v51, %v10574_v63  ;;  %v12796_v60 = vunpack.i.h.bf16 %v12640_v2  ;;  %v12797_v55 = vunpack.i.h.bf16 %v10678_v19  ;;  %v12379_v39 = vunpack.i.h.bf16 %v10928_v22  ;;  %v10941_v43 = vld [vmem:[#allocation3 + $0x180] sm:$0xff]  ;;  %v12799_v51 = vld [vmem:[#allocation53_spill] sm:$0xff] }
 0x337   : > { %v7494_v40 = vunpack.i.l.bf16 %v10928_v22  ;;  %6385 = vmatprep.subr.bf16.mxu0 %v12798_v24  ;;  %v2388_v0 = vmul.f32 %v12777_v50, %v12651_v31  ;;  %v2392_v63 = vmul.f32 %v10941_v43, %v12651_v31  ;;  %v7310_v2 = vunpack.i.h.bf16 %v12756_v37  ;;  %7752 = vrot.lane.b32.xlu1 %v7751_v21, %s8032_s16  ;;  %v12802_v21 = vld [vmem:[#allocation5_spill] sm:$0xff] }
 0x338   : > { %v1700_v58 = vsel %vm1670_vm6, %v12797_v55, %v12796_v60  ;;  %7817 = vrot.lane.b32.xlu0 %v7816_v36, %s8033_s13  ;;  %v7761_v19 = vpack.i.bf16 %v4896_v35, %v4895_v27  ;;  %v7826_v17 = vpack.i.bf16 %v4912_v8, %v4909_v26  ;;  %v12800_v62 = vunpack.i.h.bf16 %v12799_v51  ;;  %6685 = vmatprep.subr.bf16.mxu1 %v6684_v10  ;;  %v2845_v8 = vpop.permute.xlu0 %2844  ;;  %v7994_v36 = vld [vmem:[#allocation3 + $0x128] sm:$0xff] }
 0x339   : > { %v7240_v60 = vunpack.i.h.bf16 %v12791_v47  ;;  %v4198_v55 = vsel %vm2346_vm7, %v7200_v48, %v7494_v40  ;;  %v6388_v52 = vpack.c.bf16 %v1700_v58, %v12801_v33  ;;  %v4199_v29 = vsel %vm2346_vm7, %v7494_v40, %v12379_v39  ;;  %v10988_v40 = vld [vmem:[#allocation3 + $0x220] sm:$0xff] }
 0x33a   : > { %v1709_v50 = vsel %vm1670_vm6, %v12800_v62, %v7239_v14  ;;  %v12374_v27 = vunpack.i.h.bf16 %v12802_v21  ;;  %v6690_v26 = vpack.c.bf16 %v4198_v55, %v10607_v44  ;;  %6387 = vmatpush3.bf16.msra.mxu0 %v12798_v24  ;;  %6687 = vmatpush1.bf16.msra.mxu1 %v6686_v46  ;;  %v6688_v47 = vpack.c.bf16 %v4199_v29, %v10592_v54  ;;  %v7997_v62 = vld [vmem:[#allocation3 + $0x1d0] sm:$0xff]  ;;  %v11001_v29 = vpop.permute.xlu1 %7527 }
 0x33b   : > { %v12803_v14 = vunpack.i.h.bf16 %v12781_v3  ;;  %v12804_v33 = vunpack.i.h.bf16 %v10482_v41  ;;  %6389 = vmatprep.subr.bf16.mxu0 %v6388_v52  ;;  %v2857_v48 = vmul.f32 %v10032_v34, %v2845_v8  ;;  %v4901_v10 = vmul.f32 %v7994_v36, %v10396_v28  ;;  %7762 = vrot.lane.b32.xlu1 %v7761_v19, %s8033_s13  ;;  %v7995_v3 = vld [vmem:[#allocation3 + $0x218] sm:$0xff] }
 0x33c   : > { %v12805_v44 = vunpack.i.l.bf16 %v12778_v16  ;;  %v10980_v54 = vmul.f32 %v12784_v59, %v12651_v31  ;;  %v7279_v41 = vunpack.i.l.bf16 %v12802_v21  ;;  %7827 = vrot.lane.b32.xlu0 %v7826_v17, %s8033_s13  ;;  %v4902_v34 = vmul.f32 %v10838_v49, %v10401_v30  ;;  %6689 = vmatprep.subr.bf16.mxu1 %v6688_v47  ;;  %v12806_v17 = vld [vmem:[#allocation29_spill] sm:$0xff] }
 0x33d   : > { %v1706_v35 = vsel %vm1670_vm6, %v12804_v33, %v12803_v14  ;;  %v4919_v58 = vmul.f32 %v7995_v3, %v10396_v28  ;;  %v4920_v24 = vmul.f32 %v10988_v40, %v10401_v30  ;;  %v10993_v51 = vpack.i.bf16 %v2857_v48, %v2857_v48  ;;  %v11003_v14 = vpop.permute.xlu0 %7502 }
 0x33e   : > { %v10976_v46 = vsel %vm2082_vm8, %v12805_v44, %v12376_v42  ;;  %v6392_v59 = vpack.c.bf16 %v1706_v35, %v10597_v45  ;;  %v10996_v19 = vmul.f32 %v7997_v62, %v12651_v31  ;;  %v6402_v49 = vpack.c.bf16 %v10869_v1, %v10864_v25  ;;  %6391 = vmatpush3.bf16.msra.mxu0 %v6388_v52  ;;  %v12808_v35 = vld [vmem:[#allocation7_spill] sm:$0xff]  ;;  %v12809_v44 = vld [vmem:[#allocation100_spill] sm:$0xff]  ;;  %v12822_v1 = vld [vmem:[#allocation82_spill] sm:$0xff] }
 0x33f   : > { %v7290_v55 = vunpack.i.h.bf16 %v12806_v17  ;;  %6691 = vmatpush1.bf16.msra.mxu1 %v6690_v26  ;;  %v7771_v47 = vpack.i.bf16 %v2392_v63, %v2388_v0  ;;  %v12807_v45 = vunpack.i.h.bf16 %v10717_v56  ;;  %v11010_v48 = vsel %vm2850_vm13, %v2845_v8, %v12808_v35 }
 0x340   : > { %v7289_v36 = vunpack.i.l.bf16 %v12806_v17  ;;  %v7304_v3 = vunpack.i.l.bf16 %v12809_v44  ;;  %v12378_v52 = vunpack.i.h.bf16 %v11003_v14  ;;  %v7504_v26 = vunpack.i.l.bf16 %v11003_v14  ;;  %6393 = vmatprep.subr.bf16.mxu0 %v6392_v59  ;;  %7837 = vrot.lane.b32.xlu0 %v10993_v51, %s8029_s25 }
 0x341   : > { %v1712_v33 = vsel %vm1670_vm6, %v12807_v45, %v7240_v60  ;;  %v12810_v0 = vpack.c.bf16 %v10581_v53, %v10616_v11  ;;  %v12369_v56 = vunpack.i.h.bf16 %v12809_v44  ;;  %7772 = vrot.lane.b32.xlu1 %v7771_v47, %s8032_s16  ;;  %v7781_v63 = vpack.i.bf16 %v4902_v34, %v4901_v10  ;;  %v7998_v47 = vld [vmem:[#allocation3 + $0x58] sm:$0xff] }
 0x342   : > { %v7846_v60 = vpack.i.bf16 %v4920_v24, %v4919_v58  ;;  %v11026_v8 = vsel %vm2082_vm8, %v7279_v41, %v12374_v27  ;;  %v12811_v62 = vunpack.i.h.bf16 %v12746_v20  ;;  %v6396_v53 = vpack.c.bf16 %v1712_v33, %v1709_v50  ;;  %6395 = vmatpush3.bf16.msra.mxu0 %v6392_v59  ;;  %v11040_v20 = vpop.permute.xlu1 %7537  ;;  %v11042_v24 = vpop.permute.xlu0 %7507  ;;  %v7999_v33 = vld [vmem:[#allocation3 + $0x80] sm:$0xff] }
 0x343   : > { %6693 = vmatprep.subr.bf16.mxu1 %v12810_v0  ;;  %v4207_v11 = vsel %vm2346_vm7, %v7504_v26, %v12378_v52  ;;  %v2866_v45 = vmul.f32 %v7998_v47, %v11010_v48  ;;  %v7244_v10 = vunpack.i.l.bf16 %v12790_v13  ;;  %v12812_v58 = vpack.c.bf16 %v10674_v38, %v10643_v57  ;;  %v12813_v0 = vld [vmem:[#allocation25_spill] sm:$0xff]  ;;  %v12815_v38 = vld [vmem:[#allocation103_spill] sm:$0xff]  ;;  %v12816_v59 = vld [vmem:[#allocation78_spill] sm:$0xff] }
 0x344   : > { %v4206_v17 = vsel %vm2346_vm7, %v12811_v62, %v7504_v26  ;;  %v6696_v50 = vpack.c.bf16 %v4207_v11, %v10744_v18  ;;  %v2870_v35 = vmul.f32 %v7999_v33, %v11010_v48  ;;  %v11047_v26 = vsel %vm2082_vm8, %v7289_v36, %v7279_v41  ;;  %6397 = vmatprep.subr.bf16.mxu0 %v6396_v53 }
 0x345   : > { %v6698_v34 = vpack.c.bf16 %v4206_v17, %v10732_v5  ;;  %6695 = vmatpush1.bf16.msra.mxu1 %v12812_v58  ;;  %v12814_v62 = vunpack.i.l.bf16 %v12813_v0  ;;  %v11057_v57 = vsel %vm2082_vm8, %v7310_v2, %v7304_v3  ;;  %v6400_v18 = vpack.c.bf16 %v12815_v38, %v10976_v46  ;;  %7782 = vrot.lane.b32.xlu1 %v7781_v63, %s8033_s13  ;;  %v12817_v46 = vld [vmem:[#allocation84_spill] sm:$0xff] }
 0x346   : > { %v12370_v17 = vunpack.i.h.bf16 %v12816_v59  ;;  %7847 = vrot.lane.b32.xlu0 %v7846_v60, %s8033_s13  ;;  %v7791_v41 = vpack.i.bf16 %v10996_v19, %v10980_v54  ;;  %v4908_v37 = vmul.f32 %v10941_v43, %v10401_v30  ;;  %v12365_v2 = vunpack.i.h.bf16 %v11001_v29  ;;  %6697 = vmatprep.subr.bf16.mxu1 %v6696_v50  ;;  %v12818_v60 = vld [vmem:[#allocation102_spill] sm:$0xff]  ;;  %v11079_v19 = vpop.permute.xlu0 %7522  ;;  %v12819_v43 = vld [vmem:[#allocation83_spill] sm:$0xff]  ;;  %v8001_v50 = vld [vmem:[#allocation3 + $0xd0] sm:$0xff] }
 0x347   : > { %v11052_v5 = vsel %vm2082_vm8, %v7290_v55, %v12814_v62  ;;  %v8000_v55 = vld [vmem:[#allocation3 + $0x178] sm:$0xff]  ;;  %v7529_v11 = vunpack.i.l.bf16 %v11001_v29  ;;  %v6404_v47 = vpack.c.bf16 %v12817_v46, %v11026_v8  ;;  %v2099_v63 = vsel %vm2082_vm8, %v7304_v3, %v12369_v56  ;;  %6399 = vmatpush3.bf16.msra.mxu0 %v6396_v53 }
 0x348   : > { %v4907_v36 = vmul.f32 %v8000_v55, %v10396_v28  ;;  %v12372_v54 = vunpack.i.h.bf16 %v12818_v60  ;;  %v11077_v28 = vpop.permute.xlu1 %7542  ;;  %v7856_v30 = vpack.i.bf16 %v2870_v35, %v2866_v45  ;;  %v2874_v58 = vmul.f32 %v12819_v43, %v11010_v48  ;;  %6401 = vmatprep.subr.bf16.mxu0 %v6400_v18  ;;  %v8002_v35 = vld [vmem:[#allocation3 + $0x1f8] sm:$0xff]  ;;  %v12821_v43 = vld [vmem:[#allocation70_spill] sm:$0xff] }
 0x349   : > { %6699 = vmatpush1.bf16.msra.mxu1 %v6698_v34  ;;  %v2878_v33 = vmul.f32 %v8001_v50, %v11010_v48  ;;  %v12364_v8 = vunpack.i.l.bf16 %v11040_v20  ;;  %v7544_v62 = vunpack.i.l.bf16 %v11077_v28  ;;  %v12368_v3 = vunpack.i.h.bf16 %v11079_v19  ;;  %7792 = vrot.lane.b32.xlu1 %v7791_v41, %s8032_s16  ;;  %v8003_v18 = vld [vmem:[#allocation3 + $0xf8] sm:$0xff] }
 0x34a   : > { %v7524_v53 = vunpack.i.l.bf16 %v11079_v19  ;;  %v7314_v34 = vunpack.i.l.bf16 %v12818_v60  ;;  %7857 = vrot.lane.b32.xlu0 %v7856_v30, %s8029_s25  ;;  %v7801_v45 = vpack.i.bf16 %v4908_v37, %v4907_v36  ;;  %v2404_v38 = vmul.f32 %v8002_v35, %v12651_v31  ;;  %5976 = vmatmul.mubr.msk.f32.vlgmr.msra.gmra.mrb[12].mxu0 %vm1755_vm2, %v10882_v61  ;;  %v7533_v37 = vpop.permute.xlu0 %7532 }
 0x34b   : > { %v2408_v55 = vmul.f32 %v10988_v40, %v12651_v31  ;;  %v11097_v46 = vsel %vm1436_vm12, %v7544_v62, %v12364_v8  ;;  %v2882_v41 = vmul.f32 %v8003_v18, %v11010_v48  ;;  %v11110_v31 = vsel %vm2580_vm15, %v7529_v11, %v12365_v2  ;;  %6403 = vmatpush1.bf16.msra.mxu0 %v6402_v49  ;;  %v11120_v62 = vld [vmem:[#allocation2] sm:$0xff] }
 0x34c   : > { %12820 = vst [vmem:[#allocation111_spill] sm:$0xff] %v11097_v46  ;;  %v11105_v36 = vsel %vm2580_vm15, %v7524_v53, %v12368_v3  ;;  %v7319_v40 = vunpack.i.l.bf16 %v12816_v59  ;;  %v11116_v61 = vpop.permute.xlu1 %7552  ;;  %v7866_v30 = vpack.i.bf16 %v2878_v33, %v2874_v58  ;;  %v2886_v50 = vmul.f32 %v12821_v43, %v11010_v48  ;;  %2237 = vmatprep.mubr.f32.mxu0 %v11120_v62  ;;  %v12823_v2 = vld [vmem:[#allocation36_spill] sm:$0xff] }
 0x34d   : > { %v7535_v18 = vunpack.i.h.bf16 %v7533_v37  ;;  %v7534_v8 = vunpack.i.l.bf16 %v7533_v37  ;;  %6405 = vmatprep.subr.bf16.mxu0 %v6404_v47  ;;  %v6406_v25 = vpack.c.bf16 %v11052_v5, %v11047_v26  ;;  %v6408_v49 = vpack.c.bf16 %v2099_v63, %v12822_v1  ;;  %7802 = vrot.lane.b32.xlu1 %v7801_v45, %s8033_s13 }
 0x34e   : > { %v7325_v58 = vunpack.i.h.bf16 %v12823_v2  ;;  %v7324_v33 = vunpack.i.l.bf16 %v12823_v2  ;;  %7867 = vrot.lane.b32.xlu0 %v7866_v30, %s8029_s25  ;;  %v7811_v43 = vpack.i.bf16 %v2408_v55, %v2404_v38  ;;  %v2102_v35 = vsel %vm2082_vm8, %v7314_v34, %v12372_v54  ;;  %v11147_v45 = vpop.permute.xlu0 %7547 }
 0x34f   : > { %v12367_v47 = vunpack.i.h.bf16 %v11116_v61  ;;  %v7554_v37 = vunpack.i.l.bf16 %v11116_v61  ;;  %v11138_v26 = vsel %vm2580_vm15, %v7535_v18, %v7529_v11  ;;  %v11141_v5 = vsel %vm2580_vm15, %v7534_v8, %v7524_v53  ;;  %6407 = vmatpush1.bf16.msra.mxu0 %v6406_v25  ;;  %v12824_v25 = vld [vmem:[#allocation61_spill] sm:$0xff] }
 0x350   : > { %v11145_v63 = vpop.permute.xlu1 %7562  ;;  %v7876_v38 = vpack.i.bf16 %v2886_v50, %v2882_v41  ;;  %v2890_v55 = vmul.f32 %v10834_v15, %v11010_v48  ;;  %v2894_v30 = vmul.f32 %v10851_v6, %v11010_v48  ;;  %v12366_v11 = vunpack.i.h.bf16 %v11147_v45  ;;  %6409 = vmatprep.subr.bf16.mxu0 %v6408_v49 }
 0x351   : > { %v7549_v8 = vunpack.i.l.bf16 %v11147_v45  ;;  %v6410_v53 = vpack.c.bf16 %v11057_v57, %v10794_v23  ;;  %v2105_v18 = vsel %vm2082_vm8, %v7319_v40, %v12370_v17  ;;  %v7250_v41 = vunpack.i.h.bf16 %v12824_v25  ;;  %7812 = vrot.lane.b32.xlu1 %v7811_v43, %s8032_s16 }
 0x352   : > { %v2101_v50 = vsel %vm2082_vm8, %v7324_v33, %v7314_v34  ;;  %v2104_v15 = vsel %vm2082_vm8, %v7325_v58, %v7319_v40  ;;  %7877 = vrot.lane.b32.xlu0 %v7876_v38, %s8029_s25  ;;  %v6412_v6 = vpack.c.bf16 %v2105_v18, %v2102_v35  ;;  %v2898_v1 = vmul.f32 %v10900_v12, %v11010_v48  ;;  %v7558_v49 = vpop.permute.xlu0 %7557  ;;  %v8005_v58 = vld [vmem:[#allocation3 + $0x8] sm:$0xff]  ;;  %v8006_v33 = vld [vmem:[#allocation3 + $0x30] sm:$0xff] }
 0x353   : > { %v2902_v23 = vmul.f32 %v10904_v4, %v11010_v48  ;;  %v11172_v57 = vsel %vm2580_vm15, %v7549_v8, %v12366_v11  ;;  %v11177_v34 = vsel %vm2580_vm15, %v7554_v37, %v12367_v47  ;;  %6411 = vmatpush1.bf16.msra.mxu0 %v6410_v53  ;;  %v7886_v35 = vpack.i.bf16 %v2894_v30, %v2890_v55  ;;  %v12825_v47 = vld [vmem:[#allocation64_spill] sm:$0xff]  ;;  %v12826_v30 = vld [vmem:[#allocation10_spill] sm:$0xff] }
 0x354   : > { %v7573_v40 = vpop.permute.xlu1 %7572  ;;  %v2858_v12 = vmul.f32 %v8005_v58, %v11010_v48  ;;  %v2862_v4 = vmul.f32 %v8006_v33, %v11010_v48  ;;  %v12371_v38 = vunpack.i.l.bf16 %v11145_v63  ;;  %v7560_v11 = vunpack.i.h.bf16 %v7558_v49  ;;  %6413 = vmatprep.subr.bf16.mxu0 %v6412_v6  ;;  %v12827_v58 = vld [vmem:[#allocation49_spill] sm:$0xff] }
 0x355   : > { %v7574_v18 = vunpack.i.l.bf16 %v7573_v40  ;;  %v7559_v2 = vunpack.i.l.bf16 %v7558_v49  ;;  %v7249_v53 = vunpack.i.l.bf16 %v12824_v25  ;;  %v12375_v3 = vunpack.i.h.bf16 %v12825_v47 }
 0x356   : > { %v7269_v55 = vunpack.i.l.bf16 %v12825_v47  ;;  %v12828_v56 = vpack.i.bf16 %v12826_v30, %v12827_v58  ;;  %7887 = vrot.lane.b32.xlu0 %v7886_v35, %s8029_s25  ;;  %v6414_v33 = vpack.c.bf16 %v2104_v15, %v2101_v50  ;;  %v11198_v6 = vsel %vm2580_vm15, %v7560_v11, %v7554_v37  ;;  %v11207_v35 = vpop.permute.xlu0 %7567  ;;  %v8007_v15 = vld [vmem:[#allocation3 + $0x1e8] sm:$0xff]  ;;  %v8008_v30 = vld [vmem:[#allocation3 + $0x210] sm:$0xff]  ;;  %v12830_v58 = vld [vmem:[#allocation66_spill] sm:$0xff] }
 0x357   : > { %v11195_v43 = vsel %vm2580_vm15, %v7574_v18, %v12371_v38  ;;  %v11201_v25 = vsel %vm2580_vm15, %v7559_v2, %v7549_v8  ;;  %v7896_v49 = vpack.i.bf16 %v2902_v23, %v2898_v1  ;;  %v7831_v50 = vpack.i.bf16 %v2862_v4, %v2858_v12  ;;  %v12834_v38 = vld [vmem:[#allocation86_spill] sm:$0xff] }
 0x358   : > { %7822 = vrot.lane.b32.xlu1 %v12828_v56, %s8033_s13  ;;  %12829 = vst [vmem:[#allocation72_spill] sm:$0xff] %v11195_v43  ;;  %6415 = vmatpush1.bf16.msra.mxu0 %v6414_v33  ;;  %v11205_v56 = vpop.permute.xlu1 %7577  ;;  %v2906_v18 = vmul.f32 %v8007_v15, %v11010_v48  ;;  %v2910_v37 = vmul.f32 %v8008_v30, %v11010_v48  ;;  %v7575_v11 = vunpack.i.h.bf16 %v7573_v40  ;;  %v12373_v1 = vunpack.i.l.bf16 %v11207_v35 }
 0x359   : > { %v12377_v2 = vunpack.i.h.bf16 %v11205_v56  ;;  %v7579_v8 = vunpack.i.l.bf16 %v11205_v56  ;;  %v4208_v23 = vsel %vm2346_vm7, %v7249_v53, %v7244_v10  ;;  %v7274_v33 = vunpack.i.l.bf16 %v12830_v58 }
 0x35a   : > { %7897 = vrot.lane.b32.xlu0 %v7896_v49, %s8029_s25  ;;  %v12831_v12 = vunpack.i.h.bf16 %v12790_v13  ;;  %v4915_v40 = vmul.f32 %v8007_v15, %v12646_v32  ;;  %v11230_v53 = vsel %vm2580_vm15, %v7575_v11, %v12373_v1  ;;  %v11240_v15 = vpop.permute.xlu0 %7592  ;;  %v7275_v54 = vunpack.i.h.bf16 %v12830_v58 }
 0x35b   : > { %v4210_v4 = vsel %vm2346_vm7, %v7250_v41, %v7579_v8  ;;  %12832 = vst [vmem:[#allocation71_spill] sm:$0xff] %v11230_v53  ;;  %v4211_v49 = vsel %vm2346_vm7, %v7579_v8, %v12377_v2  ;;  %v7906_v41 = vpack.i.bf16 %v2910_v37, %v2906_v18  ;;  %v12833_v8 = vld [vmem:[#allocation81_spill] sm:$0xff]  ;;  %v7334_v27 = vunpack.i.l.bf16 %v12834_v38  ;;  %v12836_v37 = vld [vmem:[#allocation87_spill] sm:$0xff] }
 0x35c   : > { %7832 = vrot.lane.b32.xlu1 %v7831_v50, %s8029_s25  ;;  %v4209_v48 = vsel %vm2346_vm7, %v7244_v10, %v12831_v12  ;;  %v4918_v50 = vmul.f32 %v8008_v30, %v12646_v32  ;;  %v6702_v17 = vpack.c.bf16 %v4210_v4, %v4208_v23  ;;  %v11238_v10 = vpop.permute.xlu1 %7582  ;;  %v4213_v32 = vsel %vm2346_vm7, %v7269_v55, %v12375_v3  ;;  %v12835_v18 = vld [vmem:[#allocation57_spill] sm:$0xff] }
 0x35d   : > { %v6700_v12 = vpack.c.bf16 %v4211_v49, %v4209_v48  ;;  %v12385_v11 = vunpack.i.h.bf16 %v11238_v10  ;;  %v7584_v1 = vunpack.i.l.bf16 %v11238_v10  ;;  %v4212_v30 = vsel %vm2346_vm7, %v7274_v33, %v7269_v55 }
 0x35e   : > { %v12383_v23 = vunpack.i.h.bf16 %v12833_v8  ;;  %v7329_v4 = vunpack.i.l.bf16 %v12833_v8  ;;  %7907 = vrot.lane.b32.xlu0 %v7906_v41, %s8029_s25  ;;  %v12837_v58 = vpack.i.bf16 %v12835_v18, %v12836_v37  ;;  %v12380_v49 = vunpack.i.h.bf16 %v11240_v15  ;;  %v11266_v2 = vpop.permute.xlu0 %7597 }
 0x35f   : > { %v4214_v48 = vsel %vm2346_vm7, %v7275_v54, %v7584_v1  ;;  %v7594_v3 = vunpack.i.l.bf16 %v11240_v15  ;;  %6701 = vmatprep.subr.bf16.mxu1 %v6700_v12  ;;  %v4215_v55 = vsel %vm2346_vm7, %v7584_v1, %v12385_v11  ;;  %v7335_v33 = vunpack.i.h.bf16 %v12834_v38  ;;  %v12838_v54 = vld [vmem:[#allocation109_spill] sm:$0xff]  ;;  %v12839_v38 = vld [vmem:[#allocation23_spill] sm:$0xff] }
 0x360   : > { %7842 = vrot.lane.b32.xlu1 %v12837_v58, %s8033_s13  ;;  %v6706_v42 = vpack.c.bf16 %v4214_v48, %v4212_v30  ;;  %6703 = vmatpush1.bf16.msra.mxu1 %v6702_v17  ;;  %v11264_v41 = vpop.permute.xlu1 %7587  ;;  %v7851_v18 = vpack.i.bf16 %v4918_v50, %v4915_v40  ;;  %v6704_v37 = vpack.c.bf16 %v4215_v55, %v4213_v32  ;;  %v12381_v58 = vunpack.i.h.bf16 %v12838_v54  ;;  %v12842_v55 = vld [vmem:[#allocation117_spill] sm:$0xff] }
 0x361   : > { %v7339_v52 = vunpack.i.l.bf16 %v12838_v54  ;;  %v12384_v12 = vunpack.i.h.bf16 %v11264_v41  ;;  %v7589_v39 = vunpack.i.l.bf16 %v11264_v41  ;;  %v2107_v1 = vsel %vm2082_vm8, %v7334_v27, %v7329_v4 }
 0x362   : > { %6705 = vmatprep.subr.bf16.mxu1 %v6704_v37  ;;  %v2108_v17 = vsel %vm2082_vm8, %v7329_v4, %v12383_v23  ;;  %v12840_v40 = vunpack.i.h.bf16 %v12839_v38  ;;  %v12841_v50 = vunpack.i.h.bf16 %v10810_v9  ;;  %v2117_v27 = vsel %vm2082_vm8, %v7594_v3, %v12380_v49  ;;  %v11292_v9 = vpop.permute.xlu0 %7607 }
 0x363   : > { %v2110_v30 = vsel %vm2082_vm8, %v7335_v33, %v7589_v39  ;;  %v2111_v48 = vsel %vm2082_vm8, %v7589_v39, %v12384_v12  ;;  %v7344_v37 = vunpack.i.l.bf16 %v12842_v55  ;;  %v5723_v33 = vld [vmem:[%s12147_s5 + $0x60] sm:$0xff]  ;;  %v2114_v39 = vsel %vm2082_vm8, %v7339_v52, %v12381_v58 }
 0x364   : > { %7852 = vrot.lane.b32.xlu1 %v7851_v18, %s8033_s13  ;;  %v6708_v32 = vpack.c.bf16 %v12841_v50, %v12840_v40  ;;  %v7345_v18 = vunpack.i.h.bf16 %v12842_v55  ;;  %v6418_v4 = vpack.c.bf16 %v2110_v30, %v2107_v1  ;;  %6707 = vmatpush1.bf16.msra.mxu1 %v6706_v42  ;;  %v11290_v38 = vpop.permute.xlu1 %7602  ;;  %v6416_v40 = vpack.c.bf16 %v2111_v48, %v2108_v17  ;;  %v12843_v1 = vld [vmem:[#allocation9_spill] sm:$0xff] }
 0x365   : > { %v6420_v42 = vpack.c.bf16 %v2117_v27, %v2114_v39  ;;  %v12844_v30 = vunpack.i.h.bf16 %v12843_v1  ;;  %v12845_v17 = vunpack.i.h.bf16 %v10896_v7  ;;  %v2113_v55 = vsel %vm2082_vm8, %v7344_v37, %v7339_v52  ;;  %v12847_v27 = vld [vmem:[#allocation77_spill] sm:$0xff]  ;;  %v12848_v52 = vld [vmem:[#allocation60_spill] sm:$0xff] }
 0x366   : > { %6709 = vmatprep.subr.bf16.mxu1 %v6708_v32  ;;  %v2116_v50 = vsel %vm2082_vm8, %v7345_v18, %v7594_v3  ;;  %6417 = vmatprep.subr.bf16.mxu0 %v6416_v40  ;;  %v11311_v58 = vpop.permute.xlu0 %7662  ;;  %v11316_v3 = vld [vmem:[%s12147_s5 + $0x68] sm:$0xf]  ;;  %v7520_v18 = vunpack.i.h.bf16 %v12847_v27  ;;  %v12850_v37 = vunpack.i.h.bf16 %v10928_v22  ;;  %v7545_v22 = vunpack.i.h.bf16 %v11077_v28  ;;  %v12858_v28 = vld [vmem:[#allocation55_spill] sm:$0xff] }
 0x367   : > { %v6712_v48 = vpack.c.bf16 %v12845_v17, %v12844_v30  ;;  %6419 = vmatpush1.bf16.msra.mxu0 %v6418_v4  ;;  %5725 = vmatmul.mubr.msk.f32.vlgmr.msra.gmra.mrb[2].mxu1 %vm1755_vm2, %v5723_v33  ;;  %v6422_v7 = vpack.c.bf16 %v2116_v50, %v2113_v55  ;;  %v12382_v4 = vunpack.i.l.bf16 %v11311_v58  ;;  %v12851_v50 = vld [vmem:[#allocation97_spill] sm:$0xff]  ;;  %v12853_v55 = vld [vmem:[#allocation94_spill] sm:$0xff] }
 0x368   : > { %7862 = vrot.lane.b32.xlu1 %v10993_v51, %s8029_s25  ;;  %6711 = vmatpush3.bf16.msra.mxu1 %v6708_v32  ;;  %v11309_v49 = vpop.permute.xlu1 %7612  ;;  %v12849_v32 = vunpack.i.h.bf16 %v12848_v52  ;;  %v7354_v27 = vunpack.i.l.bf16 %v12853_v55  ;;  %v7355_v11 = vunpack.i.h.bf16 %v12853_v55 }
 0x369   : > { %12846 = vst [vmem:[#allocation112_spill] sm:$0xff] %v11309_v49  ;;  %6421 = vmatprep.subr.bf16.mxu0 %v6420_v42  ;;  %6713 = vmatprep.subr.bf16.mxu1 %v6712_v48  ;;  %v11330_v39 = vsel %vm1436_vm12, %v7520_v18, %v12382_v4  ;;  %v12854_v18 = vld [vmem:[#allocation89_spill] sm:$0xff]  ;;  %v12884_v49 = vld [vmem:[#allocation38_spill] sm:$0xff] }
 0x36a   : > { %4334 = vmatprep.mubr.f32.mxu1 %v11120_v62  ;;  %v6716_v40 = vpack.c.bf16 %v12850_v37, %v12849_v32  ;;  %v11338_v30 = vpop.permute.xlu0 %7667  ;;  %v12859_v37 = vunpack.i.h.bf16 %v12858_v28 }
 0x36b   : > { %6423 = vmatpush1.bf16.msra.mxu0 %v6422_v7  ;;  %5726 = vmatmul.mubr.msk.f32.gmra.mrb[4].mxu1 %vm1755_vm2, %v11316_v3  ;;  %v12386_v17 = vunpack.i.l.bf16 %v11338_v30 }
 0x36c   : > { %7872 = vrot.lane.b32.xlu1 %v10993_v51, %s8029_s25  ;;  %6715 = vmatpush3.bf16.msra.mxu1 %v6712_v48  ;;  %v11336_v1 = vpop.permute.xlu1 %7617  ;;  %v7349_v48 = vunpack.i.l.bf16 %v12854_v18 }
 0x36d   : > { %12852 = vst [vmem:[#allocation113_spill] sm:$0xff] %v11336_v1  ;;  %6161 = vmatprep.mubr.msk.f32.mxu1 %vm1755_vm2, %v5723_v33  ;;  %6717 = vmatprep.subr.bf16.mxu1 %v6716_v40  ;;  %v11351_v52 = vsel %vm1436_vm12, %v7545_v22, %v12386_v17  ;;  %v12856_v33 = vld [vmem:[#allocation24_spill] sm:$0xff]  ;;  %v12863_v17 = vunpack.i.h.bf16 %v12854_v18 }
 0x36e   : > { %12855 = vst [vmem:[#allocation74_spill] sm:$0xff] %v11351_v52  ;;  %v12857_v32 = vunpack.i.h.bf16 %v12856_v33  ;;  %v11361_v12 = vpop.permute.xlu0 %7672  ;;  %v2119_v33 = vsel %vm2082_vm8, %v7354_v27, %v7349_v48 }
 0x36f   : > { %v2120_v55 = vsel %vm2082_vm8, %v7349_v48, %v12863_v17  ;;  %v12868_v48 = vld [vmem:[#allocation62_spill] sm:$0xff] }
 0x370   : > { %7882 = vrot.lane.b32.xlu1 %v10993_v51, %s8029_s25  ;;  %v6720_v42 = vpack.c.bf16 %v12859_v37, %v12857_v32  ;;  %6719 = vmatpush3.bf16.msra.mxu1 %v6716_v40  ;;  %v11359_v23 = vpop.permute.xlu1 %7622  ;;  %v12860_v32 = vld [vmem:[#allocation4_spill] sm:$0xff]  ;;  %v12862_v40 = vunpack.i.h.bf16 %v11003_v14  ;;  %v12865_v14 = vunpack.i.h.bf16 %v12790_v13 }
 0x371   : > { %v12392_v7 = vunpack.i.h.bf16 %v11359_v23  ;;  %v7624_v22 = vunpack.i.l.bf16 %v11359_v23  ;;  %v12861_v28 = vunpack.i.h.bf16 %v12860_v32  ;;  %v1413_v13 = vld [vmem:[%s12147_s5] sm:$0xff] }
 0x372   : > { %6721 = vmatprep.subr.bf16.mxu1 %v6720_v42  ;;  %v11380_v53 = vpop.permute.xlu0 %7677 }
 0x373   : > { %v6724_v37 = vpack.c.bf16 %v12862_v40, %v12861_v28  ;;  %v2122_v4 = vsel %vm2082_vm8, %v7355_v11, %v7624_v22  ;;  %v2123_v1 = vsel %vm2082_vm8, %v7624_v22, %v12392_v7  ;;  %12864 = vst [vmem:[#allocation96_spill] sm:$0xff] %v11380_v53  ;;  %v12866_v11 = vunpack.i.h.bf16 %v11205_v56  ;;  %v12878_v7 = vld [vmem:[#allocation119_spill] sm:$0xff] }
 0x374   : > { %7892 = vrot.lane.b32.xlu1 %v10993_v51, %s8029_s25  ;;  %v6426_v43 = vpack.c.bf16 %v2122_v4, %v2119_v33  ;;  %6723 = vmatpush3.bf16.msra.mxu1 %v6720_v42  ;;  %v7628_v27 = vpop.permute.xlu1 %7627  ;;  %v6424_v46 = vpack.c.bf16 %v2123_v1, %v2120_v55  ;;  %v12867_v4 = vunpack.i.h.bf16 %v12778_v16  ;;  %v12869_v22 = vunpack.i.h.bf16 %v12868_v48  ;;  %v12872_v55 = vld [vmem:[#allocation110_spill] sm:$0xff] }
 0x375   : > { %v7630_v32 = vunpack.i.h.bf16 %v7628_v27  ;;  %v7629_v52 = vunpack.i.l.bf16 %v7628_v27  ;;  %6725 = vmatprep.subr.bf16.mxu1 %v6724_v37  ;;  %v6728_v17 = vpack.c.bf16 %v12866_v11, %v12865_v14  ;;  %v7374_v27 = vunpack.i.l.bf16 %v12872_v55  ;;  %v12873_v14 = vld [vmem:[#allocation118_spill] sm:$0xff] }
 0x376   : > { %6425 = vmatprep.subr.bf16.mxu0 %v6424_v46  ;;  %v11394_v28 = vpop.permute.xlu0 %7687  ;;  %v12874_v11 = vunpack.i.h.bf16 %v12825_v47  ;;  %v12876_v48 = vunpack.i.h.bf16 %v12802_v21  ;;  %v7375_v21 = vunpack.i.h.bf16 %v12872_v55 }
 0x377   : > { %6427 = vmatpush1.bf16.msra.mxu0 %v6426_v43  ;;  %v2085_v42 = vsel %vm2082_vm8, %v12867_v4, %v7629_v52  ;;  %v2088_v1 = vsel %vm2082_vm8, %v12869_v22, %v7630_v32  ;;  %12870 = vst [vmem:[#allocation40_spill] sm:$0xff] %v11394_v28  ;;  %v12871_v43 = vld [vmem:[#allocation106_spill] sm:$0xff]  ;;  %v12875_v4 = vunpack.i.h.bf16 %v11238_v10 }
 0x378   : > { %7902 = vrot.lane.b32.xlu1 %v10993_v51, %s8029_s25  ;;  %6727 = vmatpush3.bf16.msra.mxu1 %v6724_v37  ;;  %v7633_v33 = vpop.permute.xlu1 %7632  ;;  %v6428_v40 = vpack.c.bf16 %v2088_v1, %v2085_v42  ;;  %v12393_v16 = vunpack.i.h.bf16 %v12871_v43  ;;  %v7369_v52 = vunpack.i.l.bf16 %v12871_v43  ;;  %v7379_v37 = vunpack.i.l.bf16 %v12873_v14 }
 0x379   : > { %v7635_v46 = vunpack.i.h.bf16 %v7633_v33  ;;  %v7634_v56 = vunpack.i.l.bf16 %v7633_v33  ;;  %6729 = vmatprep.subr.bf16.mxu1 %v6728_v17  ;;  %v6732_v42 = vpack.c.bf16 %v12875_v4, %v12874_v11  ;;  %v12877_v1 = vunpack.i.h.bf16 %v12813_v0  ;;  %v11425_v11 = vld [vmem:[%s12147_s5 + $0x8] sm:$0xf] }
 0x37a   : > { %6429 = vmatprep.subr.bf16.mxu0 %v6428_v40  ;;  %5690 = vmatmul.mubr.msk.f32.vlgmr.msra.gmra.mrb[8].mxu0 %vm1755_vm2, %v1413_v13  ;;  %v11420_v47 = vpop.permute.xlu0 %7697  ;;  %v4620_v55 = vsel %vm1436_vm12, %v7369_v52, %v12393_v16 }
 0x37b   : > { %v2091_v22 = vsel %vm2082_vm8, %v12876_v48, %v7634_v56  ;;  %v2094_v33 = vsel %vm2082_vm8, %v12877_v1, %v7635_v46  ;;  %6431 = vmatpush3.bf16.msra.mxu0 %v6428_v40  ;;  %12880 = vst [vmem:[#allocation15_spill] sm:$0xff] %v11420_v47  ;;  %2243 = vmatprep.mubr.f32.mxu0 %v11120_v62  ;;  %v12881_v40 = vld [vmem:[#allocation35_spill] sm:$0xff]  ;;  %v12882_v1 = vunpack.i.h.bf16 %v12873_v14 }
 0x37c   : > { %7912 = vrot.lane.b32.xlu1 %v10993_v51, %s8029_s25  ;;  %v7384_v51 = vunpack.i.l.bf16 %v12878_v7  ;;  %6731 = vmatpush3.bf16.msra.mxu1 %v6728_v17  ;;  %v11418_v32 = vpop.permute.xlu1 %7637  ;;  %v6432_v10 = vpack.c.bf16 %v2094_v33, %v2091_v22  ;;  %v4619_v17 = vsel %vm1436_vm12, %v7374_v27, %v7369_v52  ;;  %v7390_v56 = vunpack.i.h.bf16 %v12881_v40  ;;  %s6907_s25 = smul.u32 48, %s12982_s18 }
 0x37d   : > { %12879 = vst [vmem:[#allocation67_spill] sm:$0xff] %v11418_v32  ;;  %v12396_v0 = vunpack.i.h.bf16 %v11418_v32  ;;  %v7639_v46 = vunpack.i.l.bf16 %v11418_v32  ;;  %6733 = vmatprep.subr.bf16.mxu1 %v6732_v42  ;;  %v7389_v4 = vunpack.i.l.bf16 %v12881_v40  ;;  %v4624_v33 = vsel %vm1436_vm12, %v7379_v37, %v12882_v1  ;;  %v12883_v1 = vld [vmem:[#allocation41_spill] sm:$0xff] }
 0x37e   : > { %6433 = vmatprep.subr.bf16.mxu0 %v6432_v10  ;;  %5691 = vmatmul.mubr.msk.f32.gmra.mrb[10].mxu0 %vm1755_vm2, %v11425_v11  ;;  %v7385_v27 = vunpack.i.h.bf16 %v12878_v7  ;;  %v11448_v40 = vsel %vm1436_vm12, %v7384_v51, %v7379_v37  ;;  %v7708_v16 = vpop.permute.xlu0 %7707  ;;  %v12403_v14 = vunpack.i.h.bf16 %v12883_v1  ;;  %v7399_v32 = vunpack.i.l.bf16 %v12884_v49  ;;  %s386_s14 = scalar_lea.vmem %s12153_s11, %s6907_s25 }
 0x37f   : > { %v4621_v48 = vsel %vm1436_vm12, %v7375_v21, %v7639_v46  ;;  %v4622_v22 = vsel %vm1436_vm12, %v7639_v46, %v12396_v0  ;;  %6435 = vmatpush3.bf16.msra.mxu0 %v6432_v10  ;;  %v7710_v0 = vunpack.i.h.bf16 %v7708_v16  ;;  %v7709_v53 = vunpack.i.l.bf16 %v7708_v16  ;;  %6006 = vmatprep.mubr.msk.f32.mxu0 %vm1755_vm2, %v1413_v13  ;;  %v12887_v10 = vld [vmem:[#allocation69_spill] sm:$0xff] }
 0x380   : > { %v6738_v21 = vpack.c.bf16 %v4621_v48, %v4619_v17  ;;  %6735 = vmatpush3.bf16.msra.mxu1 %v6732_v42  ;;  %v7643_v52 = vpop.permute.xlu1 %7642  ;;  %v6736_v47 = vpack.c.bf16 %v4622_v22, %v4620_v55  ;;  %v12885_v7 = vunpack.i.h.bf16 %v12818_v60  ;;  %v12886_v42 = vunpack.i.h.bf16 %v12816_v59 }
 0x381   : > { %v7645_v28 = vunpack.i.h.bf16 %v7643_v52  ;;  %v7644_v46 = vunpack.i.l.bf16 %v7643_v52  ;;  %v12888_v16 = vunpack.i.h.bf16 %v12887_v10  ;;  %v12889_v17 = vunpack.i.h.bf16 %v12809_v44 }
 0x382   : > { %6737 = vmatprep.subr.bf16.mxu1 %v6736_v47  ;;  %v2103_v37 = vsel %vm2082_vm8, %v12885_v7, %v7389_v4  ;;  %v2106_v51 = vsel %vm2082_vm8, %v12886_v42, %v7390_v56  ;;  %v12890_v47 = vunpack.i.h.bf16 %v11079_v19  ;;  %v12891_v4 = vunpack.i.h.bf16 %v11001_v29  ;;  %v11477_v22 = vpop.permute.xlu0 %7717  ;;  %v12892_v19 = vld [vmem:[#allocation43_spill] sm:$0xff]  ;;  %v12894_v7 = vld [vmem:[#allocation14_spill] sm:$0xff] }
 0x383   : > { %6162 = vmatmul.mubr.msk.f32.vlgmr.msra.gmra.mrb[0].mxu1 %vm1755_vm2, %v11316_v3  ;;  %v2097_v13 = vsel %vm2082_vm8, %v12888_v16, %v7644_v46  ;;  %v2100_v48 = vsel %vm2082_vm8, %v12889_v17, %v7645_v28  ;;  %v7394_v56 = vunpack.i.l.bf16 %v12883_v1  ;;  %v7400_v3 = vunpack.i.h.bf16 %v12884_v49 }
 0x384   : > { %v2583_v60 = vsel %vm2580_vm15, %v12890_v47, %v7709_v53  ;;  %v2586_v59 = vsel %vm2580_vm15, %v12891_v4, %v7710_v0  ;;  %6739 = vmatpush1.bf16.msra.mxu1 %v6738_v21  ;;  %v11475_v55 = vpop.permute.xlu1 %7647  ;;  %v6436_v44 = vpack.c.bf16 %v2100_v48, %v2097_v13  ;;  %4759 = vmatprep.mubr.f32.mxu1 %v11120_v62  ;;  %v7405_v53 = vunpack.i.h.bf16 %v12892_v19  ;;  %v12893_v21 = vld [vmem:[#allocation45_spill] sm:$0xff] }
 0x385   : > { %v11480_v28 = vpack.c.bf16 %v2586_v59, %v2583_v60  ;;  %v7404_v29 = vunpack.i.l.bf16 %v12892_v19  ;;  %v12401_v0 = vunpack.i.h.bf16 %v11475_v55  ;;  %v7649_v52 = vunpack.i.l.bf16 %v11475_v55 }
 0x386   : > { %v4627_v49 = vsel %vm1436_vm12, %v7399_v32, %v7394_v56  ;;  %v12402_v46 = vunpack.i.h.bf16 %v12893_v21  ;;  %v7444_v42 = vunpack.i.l.bf16 %v12894_v7  ;;  %6437 = vmatprep.subr.bf16.mxu0 %v6436_v44  ;;  %v6440_v10 = vpack.c.bf16 %v2106_v51, %v2103_v37  ;;  %v12896_v32 = vld [vmem:[#allocation42_spill] sm:$0xff]  ;;  %v11502_v51 = vpop.permute.xlu0 %7727 }
 0x387   : > { %v7414_v16 = vunpack.i.l.bf16 %v12893_v21  ;;  %v4625_v13 = vsel %vm1436_vm12, %v7385_v27, %v7649_v52  ;;  %6439 = vmatpush3.bf16.msra.mxu0 %v6436_v44  ;;  %v4626_v17 = vsel %vm1436_vm12, %v7649_v52, %v12401_v0  ;;  %v12895_v48 = vunpack.i.h.bf16 %v11264_v41 }
 0x388   : > { %v7419_v4 = vunpack.i.l.bf16 %v12896_v32  ;;  %v6742_v59 = vpack.c.bf16 %v4625_v13, %v11448_v40  ;;  %v11500_v37 = vpop.permute.xlu1 %7652  ;;  %6441 = vmatprep.subr.bf16.mxu0 %v6440_v10  ;;  %v6740_v27 = vpack.c.bf16 %v4626_v17, %v4624_v33  ;;  %v7445_v44 = vunpack.i.h.bf16 %v12894_v7  ;;  %v12900_v17 = vld [vmem:[#allocation13_spill] sm:$0xff] }
 0x389   : > { %v2112_v47 = vsel %vm2082_vm8, %v12895_v48, %v7405_v53  ;;  %v7654_v41 = vunpack.i.l.bf16 %v11500_v37  ;;  %v12897_v53 = vunpack.i.h.bf16 %v12833_v8  ;;  %v12898_v48 = vld [vmem:[#allocation52_spill] sm:$0xff]  ;;  %v4628_v13 = vsel %vm1436_vm12, %v7394_v56, %v12403_v14 }
 0x38a   : > { %v7500_v0 = vunpack.i.h.bf16 %v12898_v48  ;;  %6741 = vmatprep.subr.bf16.mxu1 %v6740_v27  ;;  %v12899_v33 = vunpack.i.h.bf16 %v12838_v54  ;;  %v7440_v60 = vunpack.i.h.bf16 %v12900_v17  ;;  %v12901_v8 = vunpack.i.h.bf16 %v11240_v15 }
 0x38b   : > { %v2109_v52 = vsel %vm2082_vm8, %v12897_v53, %v7404_v29  ;;  %v4629_v19 = vsel %vm1436_vm12, %v7400_v3, %v7654_v41  ;;  %6443 = vmatpush3.bf16.msra.mxu0 %v6440_v10  ;;  %6743 = vmatpush1.bf16.msra.mxu1 %v6742_v59  ;;  %v7439_v56 = vunpack.i.l.bf16 %v12900_v17  ;;  %v7510_v54 = vunpack.i.h.bf16 %v11042_v24 }
 0x38c   : > { %v6444_v40 = vpack.c.bf16 %v2112_v47, %v2109_v52  ;;  %v2115_v7 = vsel %vm2082_vm8, %v12899_v33, %v7444_v42  ;;  %v2118_v29 = vsel %vm2082_vm8, %v12901_v8, %v7445_v44  ;;  %v4632_v47 = vsel %vm1436_vm12, %v7414_v16, %v12402_v46  ;;  %v11527_v27 = vpop.permute.xlu1 %7657  ;;  %v11529_v42 = vpop.permute.xlu0 %7737  ;;  %v12905_v46 = vld [vmem:[#allocation95_spill] sm:$0xff] }
 0x38d   : > { %12902 = vst [vmem:[#allocation114_spill] sm:$0xff] %v11529_v42  ;;  %v12903_v3 = vunpack.i.h.bf16 %v11500_v37  ;;  %v12904_v15 = vunpack.i.h.bf16 %v12896_v32  ;;  %v7509_v44 = vunpack.i.l.bf16 %v11042_v24  ;;  %v6746_v53 = vpack.c.bf16 %v4629_v19, %v4627_v49  ;;  %v12907_v49 = vld [vmem:[#allocation98_spill] sm:$0xff] }
 0x38e   : > { %6445 = vmatprep.subr.bf16.mxu0 %v6444_v40  ;;  %v7660_v52 = vunpack.i.h.bf16 %v11527_v27  ;;  %v7659_v48 = vunpack.i.l.bf16 %v11527_v27  ;;  %v6448_v17 = vpack.c.bf16 %v2118_v29, %v2115_v7  ;;  %v4633_v8 = vsel %vm1436_vm12, %v7440_v60, %v7419_v4  ;;  %v12909_v7 = vld [vmem:[#allocation54_spill] sm:$0xff] }
 0x38f   : > { %v4630_v10 = vsel %vm1436_vm12, %v7654_v41, %v12903_v3  ;;  %v4634_v59 = vsel %vm1436_vm12, %v7419_v4, %v12904_v15  ;;  %v7450_v14 = vunpack.i.h.bf16 %v12905_v46  ;;  %6447 = vmatpush3.bf16.msra.mxu0 %v6444_v40  ;;  %v12906_v41 = vunpack.i.h.bf16 %v11359_v23 }
 0x390   : > { %v6744_v33 = vpack.c.bf16 %v4630_v10, %v4628_v13  ;;  %v4637_v42 = vsel %vm1436_vm12, %v7500_v0, %v7659_v48  ;;  %v4631_v24 = vsel %vm1436_vm12, %v7439_v56, %v7414_v16  ;;  %v11548_v15 = vpop.permute.xlu1 %7682  ;;  %v11550_v13 = vpop.permute.xlu0 %7747  ;;  %6449 = vmatprep.subr.bf16.mxu0 %v6448_v17  ;;  %v6748_v60 = vpack.c.bf16 %v4634_v59, %v4632_v47 }
 0x391   : > { %v2124_v3 = vsel %vm2082_vm8, %v12906_v41, %v7510_v54  ;;  %v6754_v19 = vpack.c.bf16 %v4637_v42, %v12907_v49  ;;  %v7665_v4 = vunpack.i.h.bf16 %v11311_v58  ;;  %v12908_v0 = vunpack.i.h.bf16 %v12854_v18 }
 0x392   : > { %6745 = vmatprep.subr.bf16.mxu1 %v6744_v33  ;;  %v4638_v16 = vsel %vm1436_vm12, %v7659_v48, %v7660_v52  ;;  %v7515_v29 = vunpack.i.h.bf16 %v12909_v7  ;;  %v6750_v56 = vpack.c.bf16 %v4633_v8, %v4631_v24  ;;  %v12910_v47 = vunpack.i.l.bf16 %v12905_v46  ;;  %v5695_v46 = vld [vmem:[%s12147_s5 + $0x20] sm:$0xff] }
 0x393   : > { %6747 = vmatpush1.bf16.msra.mxu1 %v6746_v53  ;;  %v2121_v23 = vsel %vm2082_vm8, %v12908_v0, %v7509_v44  ;;  %6451 = vmatpush3.bf16.msra.mxu0 %v6448_v17  ;;  %v12409_v59 = vunpack.i.h.bf16 %v11338_v30  ;;  %v12911_v44 = vunpack.i.l.bf16 %v11311_v58  ;;  %v7540_v48 = vunpack.i.h.bf16 %v11040_v20 }
 0x394   : > { %6749 = vmatprep.subr.bf16.mxu1 %v6748_v60  ;;  %v6452_v40 = vpack.c.bf16 %v2124_v3, %v2121_v23  ;;  %v4636_v54 = vsel %vm1436_vm12, %v12910_v47, %v7450_v14  ;;  %v11565_v42 = vpop.permute.xlu1 %7692  ;;  %v11567_v18 = vpop.permute.xlu0 %7757  ;;  %v7570_v33 = vunpack.i.h.bf16 %v11207_v35  ;;  %v12912_v17 = vunpack.i.l.bf16 %v12909_v7 }
 0x395   : > { %v6752_v10 = vpack.c.bf16 %v4638_v16, %v4636_v54  ;;  %v4642_v53 = vsel %vm1436_vm12, %v12911_v44, %v7665_v4  ;;  %v7565_v41 = vunpack.i.h.bf16 %v11145_v63  ;;  %v12913_v49 = vpack.c.bf16 %v11110_v31, %v11105_v36 }
 0x396   : > { %6453 = vmatprep.subr.bf16.mxu0 %v6452_v40  ;;  %v4640_v8 = vsel %vm1436_vm12, %v12912_v17, %v7515_v29  ;;  %v12914_v0 = vunpack.i.l.bf16 %v11338_v30  ;;  %v12405_v16 = vunpack.i.h.bf16 %v11290_v38  ;;  %v12915_v36 = vpack.c.bf16 %v11138_v26, %v11141_v5 }
 0x397   : > { %6751 = vmatpush1.bf16.msra.mxu1 %v6750_v56  ;;  %6455 = vmatpush3.bf16.msra.mxu0 %v6452_v40  ;;  %v6756_v60 = vpack.c.bf16 %v4642_v53, %v4640_v8  ;;  %v7604_v40 = vunpack.i.l.bf16 %v11290_v38  ;;  %v12916_v31 = vunpack.i.l.bf16 %v11040_v20  ;;  %v12917_v56 = vunpack.i.l.bf16 %v11207_v35 }
 0x398   : > { %6753 = vmatprep.subr.bf16.mxu1 %v6752_v10  ;;  %v11583_v3 = vpop.permute.xlu1 %7702  ;;  %v11585_v24 = vpop.permute.xlu0 %7767  ;;  %6457 = vmatprep.subr.bf16.mxu0 %v12913_v49  ;;  %v4646_v23 = vsel %vm1436_vm12, %v12914_v0, %v12409_v59  ;;  %v12918_v26 = vpack.c.bf16 %v11177_v34, %v11172_v57  ;;  %v12919_v10 = vunpack.i.l.bf16 %v11145_v63  ;;  %v12408_v53 = vunpack.i.h.bf16 %v11266_v2 }
 0x399   : > { %v2597_v47 = vsel %vm2580_vm15, %v12917_v56, %v7570_v33  ;;  %v7599_v17 = vunpack.i.l.bf16 %v11266_v2  ;;  %v12920_v8 = vpack.c.bf16 %v11330_v39, %v12851_v50  ;;  %v7610_v57 = vunpack.i.h.bf16 %v11292_v9 }
 0x39a   : > { %6007 = vmatmul.mubr.msk.f32.vlgmr.msra.gmra.mrb[12].mxu0 %vm1755_vm2, %v11425_v11  ;;  %v2594_v44 = vsel %vm2580_vm15, %v12919_v10, %v7565_v41  ;;  %v7609_v34 = vunpack.i.l.bf16 %v11292_v9  ;;  %v12921_v39 = vpack.c.bf16 %v11198_v6, %v11201_v25  ;;  %v12922_v50 = vunpack.i.h.bf16 %v11147_v45  ;;  %v12927_v25 = vld [vmem:[#allocation112_spill] sm:$0xff] }
 0x39b   : > { %6755 = vmatpush1.bf16.msra.mxu1 %v6754_v19  ;;  %6459 = vmatpush1.bf16.msra.mxu0 %v12915_v36  ;;  %v4644_v19 = vsel %vm1436_vm12, %v12916_v31, %v7540_v48  ;;  %v6464_v0 = vpack.c.bf16 %v2597_v47, %v2594_v44  ;;  %v12406_v36 = vunpack.i.h.bf16 %v11361_v12  ;;  %v7674_v31 = vunpack.i.l.bf16 %v11361_v12 }
 0x39c   : > { %6757 = vmatprep.subr.bf16.mxu1 %v6756_v60  ;;  %2735 = vmatprep.mubr.f32.mxu0 %v11120_v62  ;;  %v7713_v54 = vpop.permute.xlu1 %7712  ;;  %v11613_v11 = vpop.permute.xlu0 %7777  ;;  %v6760_v5 = vpack.c.bf16 %v4646_v23, %v4644_v19  ;;  %v2603_v23 = vsel %vm2580_vm15, %v7604_v40, %v12405_v16  ;;  %v12923_v9 = vunpack.i.h.bf16 %v11116_v61  ;;  %v12924_v47 = vunpack.i.h.bf16 %v12871_v43  ;;  %v12929_v61 = vld [vmem:[#allocation111_spill] sm:$0xff]  ;;  %v5730_v43 = vld [vmem:[%s12147_s5 + $0x70] sm:$0xff] }
 0x39d   : > { %6461 = vmatprep.subr.bf16.mxu0 %v12918_v26  ;;  %v7715_v49 = vunpack.i.h.bf16 %v7713_v54  ;;  %v7714_v60 = vunpack.i.l.bf16 %v7713_v54  ;;  %v12925_v54 = vld [vmem:[#allocation67_spill] sm:$0xff]  ;;  %v12407_v45 = vunpack.i.h.bf16 %v12927_v25  ;;  %v12940_v59 = vunpack.i.h.bf16 %v12883_v1 }
 0x39e   : > { %v12926_v26 = vunpack.i.h.bf16 %v12925_v54  ;;  %v12932_v54 = vld [vmem:[#allocation72_spill] sm:$0xff]  ;;  %v7720_v27 = vunpack.i.h.bf16 %v11477_v22  ;;  %v7730_v63 = vunpack.i.h.bf16 %v11502_v51 }
 0x39f   : > { %6759 = vmatpush1.bf16.msra.mxu1 %v12920_v8  ;;  %6463 = vmatpush1.bf16.msra.mxu0 %v12921_v39  ;;  %v2589_v19 = vsel %vm2580_vm15, %v12922_v50, %v7714_v60  ;;  %v2592_v56 = vsel %vm2580_vm15, %v12923_v9, %v7715_v49  ;;  %v7614_v8 = vunpack.i.l.bf16 %v12927_v25  ;;  %v12928_v60 = vld [vmem:[#allocation74_spill] sm:$0xff]  ;;  %v2600_v49 = vsel %vm2580_vm15, %v7599_v17, %v12408_v53 }
 0x3a0   : > { %6761 = vmatprep.subr.bf16.mxu1 %v6760_v5  ;;  %v6764_v5 = vpack.c.bf16 %v12926_v26, %v12924_v47  ;;  %v11648_v10 = vpop.permute.xlu1 %7722  ;;  %v11650_v44 = vpop.permute.xlu0 %7787  ;;  %6465 = vmatprep.subr.bf16.mxu0 %v6464_v0  ;;  %v11652_v6 = vpack.c.bf16 %v2592_v56, %v2589_v19  ;;  %v12930_v39 = vpack.c.bf16 %v12928_v60, %v12929_v61  ;;  %v12410_v9 = vunpack.i.h.bf16 %v11548_v15  ;;  %v12931_v47 = vld [vmem:[#allocation71_spill] sm:$0xff]  ;;  %v12934_v61 = vld [vmem:[#allocation113_spill] sm:$0xff] }
 0x3a1   : > { %v2602_v0 = vsel %vm2580_vm15, %v7610_v57, %v7604_v40  ;;  %v2599_v50 = vsel %vm2580_vm15, %v7609_v34, %v7599_v17  ;;  %v6468_v19 = vpack.c.bf16 %v2603_v23, %v2600_v49  ;;  %v7684_v56 = vunpack.i.l.bf16 %v11548_v15  ;;  %v12935_v57 = vld [vmem:[#allocation118_spill] sm:$0xff] }
 0x3a2   : > { %v12933_v26 = vpack.c.bf16 %v12931_v47, %v12932_v54  ;;  %v2609_v60 = vsel %vm2580_vm15, %v7674_v31, %v12406_v36  ;;  %v7619_v40 = vunpack.i.l.bf16 %v12934_v61  ;;  %v12936_v17 = vunpack.i.h.bf16 %v12935_v57  ;;  %v12938_v54 = vld [vmem:[#allocation96_spill] sm:$0xff] }
 0x3a3   : > { %6763 = vmatpush1.bf16.msra.mxu1 %v12930_v39  ;;  %v7620_v39 = vunpack.i.h.bf16 %v12934_v61  ;;  %v12937_v34 = vunpack.i.h.bf16 %v11475_v55  ;;  %v6470_v47 = vpack.c.bf16 %v2602_v0, %v2599_v50  ;;  %v7679_v36 = vunpack.i.l.bf16 %v12938_v54  ;;  %v11695_v55 = vld [vmem:[%s12147_s5 + $0x78] sm:$0xf] }
 0x3a4   : > { %6765 = vmatprep.subr.bf16.mxu1 %v6764_v5  ;;  %6467 = vmatpush1.bf16.msra.mxu0 %v12933_v26  ;;  %v11682_v49 = vpop.permute.xlu1 %7732  ;;  %v11684_v16 = vpop.permute.xlu0 %7797  ;;  %v7680_v26 = vunpack.i.h.bf16 %v12938_v54  ;;  %v2606_v61 = vsel %vm2580_vm15, %v7614_v8, %v12407_v45  ;;  %v7695_v50 = vunpack.i.h.bf16 %v11565_v42 }
 0x3a5   : > { %v6768_v23 = vpack.c.bf16 %v12937_v34, %v12936_v17  ;;  %6469 = vmatprep.subr.bf16.mxu0 %v6468_v19  ;;  %v2608_v57 = vsel %vm2580_vm15, %v7620_v39, %v7674_v31  ;;  %v6472_v0 = vpack.c.bf16 %v2609_v60, %v2606_v61  ;;  %v7694_v19 = vunpack.i.l.bf16 %v11565_v42  ;;  %v12939_v34 = vld [vmem:[#allocation40_spill] sm:$0xff] }
 0x3a6   : > { %5732 = vmatmul.mubr.msk.f32.vlgmr.msra.gmra.mrb[2].mxu1 %vm1755_vm2, %v5730_v43  ;;  %v2605_v17 = vsel %vm2580_vm15, %v7619_v40, %v7614_v8  ;;  %v7690_v45 = vunpack.i.h.bf16 %v12939_v34  ;;  %v7689_v53 = vunpack.i.l.bf16 %v12939_v34  ;;  %v12941_v31 = vunpack.i.h.bf16 %v11500_v37 }
 0x3a7   : > { %6767 = vmatpush3.bf16.msra.mxu1 %v6764_v5  ;;  %4765 = vmatprep.mubr.f32.mxu1 %v11120_v62  ;;  %v2615_v5 = vsel %vm2580_vm15, %v7684_v56, %v12410_v9  ;;  %v12942_v9 = vld [vmem:[#allocation15_spill] sm:$0xff]  ;;  %v2612_v1 = vsel %vm2580_vm15, %v7679_v36, %v7680_v26 }
 0x3a8   : > { %6769 = vmatprep.subr.bf16.mxu1 %v6768_v23  ;;  %6471 = vmatpush1.bf16.msra.mxu0 %v6470_v47  ;;  %v6772_v60 = vpack.c.bf16 %v12941_v31, %v12940_v59  ;;  %v11710_v39 = vpop.permute.xlu1 %7742  ;;  %v11712_v61 = vpop.permute.xlu0 %7807  ;;  %v6474_v47 = vpack.c.bf16 %v2608_v57, %v2605_v17  ;;  %v7700_v8 = vunpack.i.h.bf16 %v12942_v9  ;;  %v7699_v40 = vunpack.i.l.bf16 %v12942_v9 }
 0x3a9   : > { %6473 = vmatprep.subr.bf16.mxu0 %v6472_v0  ;;  %v2614_v37 = vsel %vm2580_vm15, %v7690_v45, %v7684_v56  ;;  %v7705_v59 = vunpack.i.h.bf16 %v11583_v3  ;;  %v7704_v0 = vunpack.i.l.bf16 %v11583_v3  ;;  %v6476_v34 = vpack.c.bf16 %v2615_v5, %v2612_v1 }
 0x3aa   : > { %5733 = vmatmul.mubr.msk.f32.gmra.mrb[4].mxu1 %vm1755_vm2, %v11695_v55  ;;  %v2618_v57 = vsel %vm2580_vm15, %v7694_v19, %v7695_v50  ;;  %v12944_v45 = vunpack.i.h.bf16 %v12896_v32  ;;  %v2621_v5 = vsel %vm2580_vm15, %v7699_v40, %v7700_v8  ;;  %v7735_v1 = vunpack.i.h.bf16 %v11682_v49 }
 0x3ab   : > { %6771 = vmatpush3.bf16.msra.mxu1 %v6768_v23  ;;  %6192 = vmatprep.mubr.msk.f32.mxu1 %vm1755_vm2, %v5730_v43  ;;  %v2611_v23 = vsel %vm2580_vm15, %v7689_v53, %v7679_v36  ;;  %v12943_v43 = vunpack.i.h.bf16 %v12893_v21  ;;  %v2620_v53 = vsel %vm2580_vm15, %v7705_v59, %v7699_v40  ;;  %v6480_v36 = vpack.c.bf16 %v2621_v5, %v2618_v57 }
 0x3ac   : > { %6773 = vmatprep.subr.bf16.mxu1 %v6772_v60  ;;  %6475 = vmatpush1.bf16.msra.mxu0 %v6474_v47  ;;  %v11729_v17 = vpop.permute.xlu1 %7752  ;;  %v6478_v31 = vpack.c.bf16 %v2614_v37, %v2611_v23  ;;  %v11735_v3 = vpop.permute.xlu0 %7817  ;;  %v2617_v47 = vsel %vm2580_vm15, %v7704_v0, %v7694_v19  ;;  %v6780_v21 = vpack.c.bf16 %v7660_v52, %v7450_v14  ;;  %v7734_v19 = vunpack.i.l.bf16 %v11682_v49 }
 0x3ad   : > { %6477 = vmatprep.subr.bf16.mxu0 %v6476_v34  ;;  %v6776_v56 = vpack.c.bf16 %v12944_v45, %v12943_v43  ;;  %v6784_v14 = vpack.c.bf16 %v7665_v4, %v7515_v29  ;;  %v7719_v52 = vunpack.i.l.bf16 %v11477_v22  ;;  %v7729_v49 = vunpack.i.l.bf16 %v11502_v51  ;;  %v12945_v34 = vld [vmem:[#allocation114_spill] sm:$0xff]  ;;  %v11783_v43 = vld [vmem:[%s12147_s5 + $0x28] sm:$0xf] }
 0x3ae   : > { %v7725_v59 = vunpack.i.h.bf16 %v11648_v10  ;;  %v7724_v0 = vunpack.i.l.bf16 %v11648_v10  ;;  %v7740_v7 = vunpack.i.h.bf16 %v12945_v34  ;;  %v7739_v58 = vunpack.i.l.bf16 %v12945_v34  ;;  %v11998_v34 = vld [vmem:[%s12147_s5 + $0x88] sm:$0xf] }
 0x3af   : > { %6775 = vmatpush3.bf16.msra.mxu1 %v6772_v60  ;;  %v6482_v60 = vpack.c.bf16 %v2620_v53, %v2617_v47  ;;  %v7755_v4 = vunpack.i.h.bf16 %v11729_v17  ;;  %v7754_v29 = vunpack.i.l.bf16 %v11729_v17  ;;  %v2595_v57 = vsel %vm2580_vm15, %v7565_v41, %v7734_v19 }
 0x3b0   : > { %6777 = vmatprep.subr.bf16.mxu1 %v6776_v56  ;;  %6479 = vmatpush1.bf16.msra.mxu0 %v6478_v31  ;;  %v11746_v32 = vpop.permute.xlu1 %7762  ;;  %v11750_v37 = vpop.permute.xlu0 %7827  ;;  %v2598_v23 = vsel %vm2580_vm15, %v7570_v33, %v7735_v1  ;;  %v12946_v17 = vunpack.i.h.bf16 %v11338_v30  ;;  %v5050_v35 = vsel %vm1350_vm0, %v7729_v49, %v7719_v52  ;;  %v7745_v33 = vunpack.i.h.bf16 %v11710_v39 }
 0x3b1   : > { %6481 = vmatprep.subr.bf16.mxu0 %v6480_v36  ;;  %v7744_v41 = vunpack.i.l.bf16 %v11710_v39  ;;  %v5053_v30 = vsel %vm1350_vm0, %v7724_v0, %v7725_v59  ;;  %v7750_v51 = vunpack.i.h.bf16 %v11550_v13  ;;  %v5055_v31 = vsel %vm1350_vm0, %v7739_v58, %v7740_v7  ;;  %v12964_v39 = vld [vmem:[#allocation30_spill] sm:$0xff] }
 0x3b2   : > { %v12947_v53 = vunpack.i.h.bf16 %v11266_v2  ;;  %v7749_v1 = vunpack.i.l.bf16 %v11550_v13  ;;  %v7760_v19 = vunpack.i.h.bf16 %v11567_v18  ;;  %v7765_v2 = vunpack.i.h.bf16 %v11746_v32 }
 0x3b3   : > { %6779 = vmatpush3.bf16.msra.mxu1 %v6776_v56  ;;  %v6492_v56 = vpack.c.bf16 %v2598_v23, %v2595_v57  ;;  %v7764_v49 = vunpack.i.l.bf16 %v11746_v32  ;;  %v7780_v13 = vunpack.i.h.bf16 %v11613_v11 }
 0x3b4   : > { %6781 = vmatprep.subr.bf16.mxu1 %v6780_v21  ;;  %6483 = vmatpush1.bf16.msra.mxu0 %v6482_v60  ;;  %v11761_v40 = vpop.permute.xlu1 %7772  ;;  %v11799_v20 = vpop.permute.xlu0 %7837  ;;  %v2601_v36 = vsel %vm2580_vm15, %v12947_v53, %v7754_v29 }
 0x3b5   : > { %6485 = vmatprep.subr.bf16.mxu0 %v11480_v28  ;;  %v7775_v5 = vunpack.i.h.bf16 %v11761_v40  ;;  %v7774_v47 = vunpack.i.l.bf16 %v11761_v40 }
 0x3b7   : > { %6783 = vmatpush3.bf16.msra.mxu1 %v6780_v21  ;;  %5697 = vmatmul.mubr.msk.f32.vlgmr.msra.gmra.mrb[8].mxu0 %vm1755_vm2, %v5695_v46  ;;  %v12948_v21 = vunpack.i.h.bf16 %v11290_v38  ;;  %v5057_v38 = vsel %vm1350_vm0, %v7744_v41, %v7745_v33 }
 0x3b8   : > { %6785 = vmatprep.subr.bf16.mxu1 %v6784_v14  ;;  %6487 = vmatpush3.bf16.msra.mxu0 %v11480_v28  ;;  %v6788_v28 = vpack.c.bf16 %v12946_v17, %v7540_v48  ;;  %v11790_v45 = vpop.permute.xlu1 %7782  ;;  %v5052_v48 = vsel %vm1350_vm0, %v7730_v63, %v7724_v0  ;;  %v11834_v29 = vpop.permute.xlu0 %7847  ;;  %v12949_v17 = vunpack.i.h.bf16 %v12927_v25  ;;  %v12950_v63 = vunpack.i.h.bf16 %v11361_v12 }
 0x3b9   : > { %2741 = vmatprep.mubr.f32.mxu0 %v11120_v62  ;;  %6489 = vmatprep.subr.bf16.mxu0 %v11652_v6  ;;  %v5051_v62 = vsel %vm1350_vm0, %v7719_v52, %v7720_v27  ;;  %v2604_v60 = vsel %vm2580_vm15, %v12948_v21, %v7755_v4  ;;  %v6794_v0 = vpack.c.bf16 %v5052_v48, %v5050_v35  ;;  %v7785_v53 = vunpack.i.h.bf16 %v11790_v45 }
 0x3ba   : > { %v6792_v40 = vpack.c.bf16 %v5053_v30, %v5051_v62  ;;  %v6496_v4 = vpack.c.bf16 %v2604_v60, %v2601_v36  ;;  %v2610_v62 = vsel %vm2580_vm15, %v12950_v63, %v7775_v5  ;;  %v5056_v30 = vsel %vm1350_vm0, %v7750_v51, %v7744_v41 }
 0x3bb   : > { %6787 = vmatpush3.bf16.msra.mxu1 %v6784_v14  ;;  %5698 = vmatmul.mubr.msk.f32.gmra.mrb[10].mxu0 %vm1755_vm2, %v11783_v43  ;;  %v7759_v14 = vunpack.i.l.bf16 %v11567_v18  ;;  %v7784_v35 = vunpack.i.l.bf16 %v11790_v45  ;;  %v5054_v25 = vsel %vm1350_vm0, %v7749_v1, %v7739_v58  ;;  %v7770_v12 = vunpack.i.h.bf16 %v11585_v24  ;;  %v12970_v18 = vld [vmem:[#allocation22_spill] sm:$0xff] }
 0x3bc   : > { %6789 = vmatprep.subr.bf16.mxu1 %v6788_v28  ;;  %6491 = vmatpush3.bf16.msra.mxu0 %v11652_v6  ;;  %v7793_v52 = vpop.permute.xlu1 %7792  ;;  %v7769_v6 = vunpack.i.l.bf16 %v11585_v24  ;;  %v5061_v51 = vsel %vm1350_vm0, %v7764_v49, %v7765_v2  ;;  %v7789_v5 = vunpack.i.l.bf16 %v11650_v44  ;;  %v7800_v58 = vunpack.i.h.bf16 %v11684_v16  ;;  %v11879_v54 = vpop.permute.xlu0 %7857 }
 0x3bd   : > { %6037 = vmatprep.mubr.msk.f32.mxu0 %vm1755_vm2, %v5695_v46  ;;  %6493 = vmatprep.subr.bf16.mxu0 %v6492_v56  ;;  %v7779_v46 = vunpack.i.l.bf16 %v11613_v11  ;;  %v7795_v57 = vunpack.i.h.bf16 %v7793_v52  ;;  %v7794_v23 = vunpack.i.l.bf16 %v7793_v52  ;;  %v5059_v41 = vsel %vm1350_vm0, %v7759_v14, %v7760_v19 }
 0x3be   : > { %v6798_v36 = vpack.c.bf16 %v5056_v30, %v5054_v25  ;;  %v12951_v60 = vunpack.i.h.bf16 %v11548_v15  ;;  %v7819_v30 = vunpack.i.l.bf16 %v11735_v3 }
 0x3bf   : > { %6791 = vmatpush3.bf16.msra.mxu1 %v6788_v28  ;;  %v2607_v28 = vsel %vm2580_vm15, %v12949_v17, %v7774_v47  ;;  %v7799_v47 = vunpack.i.l.bf16 %v11684_v16  ;;  %v2613_v21 = vsel %vm2580_vm15, %v7680_v26, %v7794_v23  ;;  %v7809_v23 = vunpack.i.l.bf16 %v11712_v61 }
 0x3c0   : > { %6793 = vmatprep.subr.bf16.mxu1 %v6792_v40  ;;  %6495 = vmatpush3.bf16.msra.mxu0 %v6492_v56  ;;  %v11847_v48 = vpop.permute.xlu1 %7802  ;;  %v6796_v56 = vpack.c.bf16 %v5057_v38, %v5055_v31  ;;  %v5058_v31 = vsel %vm1350_vm0, %v7769_v6, %v7759_v14  ;;  %v6500_v24 = vpack.c.bf16 %v2610_v62, %v2607_v28 }
 0x3c1   : > { %6497 = vmatprep.subr.bf16.mxu0 %v6496_v4  ;;  %v2616_v1 = vsel %vm2580_vm15, %v12951_v60, %v7795_v57  ;;  %v5060_v14 = vsel %vm1350_vm0, %v7770_v12, %v7764_v49  ;;  %v6800_v40 = vpack.c.bf16 %v5061_v51, %v5059_v41  ;;  %v5063_v6 = vsel %vm1350_vm0, %v7779_v46, %v7780_v13 }
 0x3c2   : > { %6193 = vmatmul.mubr.msk.f32.vlgmr.msra.gmra.mrb[0].mxu1 %vm1755_vm2, %v11695_v55  ;;  %v11859_v55 = vld [vmem:[#allocation2] sm:$0xff]  ;;  %v5065_v38 = vsel %vm1350_vm0, %v7784_v35, %v7785_v53  ;;  %v7805_v26 = vunpack.i.h.bf16 %v11847_v48  ;;  %v7804_v15 = vunpack.i.l.bf16 %v11847_v48  ;;  %v5062_v57 = vsel %vm1350_vm0, %v7789_v5, %v7779_v46 }
 0x3c3   : > { %6795 = vmatpush1.bf16.msra.mxu1 %v6794_v0  ;;  %5190 = vmatprep.mubr.f32.mxu1 %v11859_v55  ;;  %v6504_v17 = vpack.c.bf16 %v2616_v1, %v2613_v21  ;;  %v6802_v28 = vpack.c.bf16 %v5060_v14, %v5058_v31  ;;  %v7820_v46 = vunpack.i.h.bf16 %v11735_v3  ;;  %v6804_v42 = vpack.c.bf16 %v5065_v38, %v5063_v6  ;;  %v11912_v21 = vpop.permute.xlu0 %7867 }
 0x3c4   : > { %6797 = vmatprep.subr.bf16.mxu1 %v6796_v56  ;;  %6499 = vmatpush3.bf16.msra.mxu0 %v6496_v4  ;;  %v7813_v52 = vpop.permute.xlu1 %7812  ;;  %v7790_v4 = vunpack.i.h.bf16 %v11650_v44  ;;  %v5067_v44 = vsel %vm1350_vm0, %v7799_v47, %v7800_v58  ;;  %v5069_v12 = vsel %vm1350_vm0, %v7804_v15, %v7805_v26  ;;  %v5066_v41 = vsel %vm1350_vm0, %v7809_v23, %v7799_v47 }
 0x3c5   : > { %6501 = vmatprep.subr.bf16.mxu0 %v6500_v24  ;;  %v7815_v0 = vunpack.i.h.bf16 %v7813_v52  ;;  %v7814_v49 = vunpack.i.l.bf16 %v7813_v52  ;;  %v7860_v51 = vunpack.i.h.bf16 %v11879_v54  ;;  %v7840_v5 = vunpack.i.h.bf16 %v11799_v20 }
 0x3c6   : > { %v5064_v56 = vsel %vm1350_vm0, %v7790_v4, %v7784_v35  ;;  %v7859_v35 = vunpack.i.l.bf16 %v11879_v54  ;;  %v7830_v60 = vunpack.i.h.bf16 %v11750_v37  ;;  %v7829_v47 = vunpack.i.l.bf16 %v11750_v37  ;;  %v12952_v37 = vld [vmem:[#allocation11_spill] sm:$0xff] }
 0x3c7   : > { %6799 = vmatpush1.bf16.msra.mxu1 %v6798_v36  ;;  %v2619_v63 = vsel %vm2580_vm15, %v7695_v50, %v7814_v49  ;;  %v2622_v62 = vsel %vm2580_vm15, %v7700_v8, %v7815_v0  ;;  %v7810_v50 = vunpack.i.h.bf16 %v11712_v61  ;;  %v7839_v61 = vunpack.i.l.bf16 %v11799_v20 }
 0x3c8   : > { %6801 = vmatprep.subr.bf16.mxu1 %v6800_v40  ;;  %6503 = vmatpush3.bf16.msra.mxu0 %v6500_v24  ;;  %v6508_v31 = vpack.c.bf16 %v2622_v62, %v2619_v63  ;;  %v6806_v24 = vpack.c.bf16 %v5064_v56, %v5062_v57  ;;  %v6808_v14 = vpack.c.bf16 %v5069_v12, %v5067_v44  ;;  %v7850_v40 = vunpack.i.h.bf16 %v11834_v29  ;;  %v12954_v57 = vld [vmem:[#allocation18_spill] sm:$0xff]  ;;  %v12956_v62 = vld [vmem:[#allocation47_spill] sm:$0xff] }
 0x3c9   : > { %6505 = vmatprep.subr.bf16.mxu0 %v6504_v17  ;;  %v5068_v36 = vsel %vm1350_vm0, %v7810_v50, %v7804_v15  ;;  %v5071_v52 = vsel %vm1350_vm0, %v7819_v30, %v7820_v46  ;;  %v7849_v15 = vunpack.i.l.bf16 %v11834_v29  ;;  %v12953_v49 = vunpack.i.l.bf16 %v12952_v37  ;;  %v11945_v37 = vpop.permute.xlu0 %7877 }
 0x3ca   : > { %v11898_v25 = vpop.permute.xlu1 %7822  ;;  %v6810_v0 = vpack.c.bf16 %v5068_v36, %v5066_v41  ;;  %v12955_v23 = vunpack.i.l.bf16 %v12954_v57  ;;  %v12957_v44 = vunpack.i.l.bf16 %v12956_v62 }
 0x3cb   : > { %6803 = vmatpush1.bf16.msra.mxu1 %v6802_v28  ;;  %v7825_v9 = vunpack.i.h.bf16 %v11898_v25  ;;  %v7824_v8 = vunpack.i.l.bf16 %v11898_v25  ;;  %v3092_v4 = vsel %vm3084_vm14, %v7859_v35, %v12953_v49  ;;  %v8011_v25 = vld [vmem:[%s12147_s5 + $0x38] sm:$0xf] }
 0x3cc   : > { %6805 = vmatprep.subr.bf16.mxu1 %v6804_v42  ;;  %6507 = vmatpush3.bf16.msra.mxu0 %v6504_v17  ;;  %v3095_v17 = vsel %vm3084_vm14, %v7860_v51, %v12955_v23  ;;  %v12958_v42 = vld [vmem:[#allocation8_spill] sm:$0xff] }
 0x3cd   : > { %6509 = vmatprep.subr.bf16.mxu0 %v6508_v31  ;;  %v5073_v38 = vsel %vm1350_vm0, %v7824_v8, %v7825_v9  ;;  %v12959_v50 = vunpack.i.l.bf16 %v12958_v42  ;;  %v5072_v41 = vsel %vm1350_vm0, %v7830_v60, %v7824_v8  ;;  %v6516_v8 = vpack.c.bf16 %v3095_v17, %v3092_v4  ;;  %v11961_v49 = vpop.permute.xlu0 %7887  ;;  %v12960_v42 = vld [vmem:[#allocation17_spill] sm:$0xff] }
 0x3ce   : > { %v7833_v1 = vpop.permute.xlu1 %7832  ;;  %v7889_v54 = vunpack.i.l.bf16 %v11961_v49 }
 0x3cf   : > { %6807 = vmatpush1.bf16.msra.mxu1 %v6806_v24  ;;  %v7835_v20 = vunpack.i.h.bf16 %v7833_v1  ;;  %v7834_v6 = vunpack.i.l.bf16 %v7833_v1  ;;  %v6812_v1 = vpack.c.bf16 %v5073_v38, %v5071_v52  ;;  %v5077_v52 = vsel %vm1350_vm0, %v7849_v15, %v7850_v40 }
 0x3d0   : > { %6809 = vmatprep.subr.bf16.mxu1 %v6808_v14  ;;  %6511 = vmatpush3.bf16.msra.mxu0 %v6508_v31 }
 0x3d1   : > { %v3085_v28 = vsel %vm3084_vm14, %v7839_v61, %v7834_v6  ;;  %v3088_v63 = vsel %vm3084_vm14, %v7840_v5, %v7835_v20  ;;  %v3086_v56 = vsel %vm3084_vm14, %v7834_v6, %v12957_v44  ;;  %v3089_v12 = vsel %vm3084_vm14, %v7835_v20, %v12959_v50 }
 0x3d2   : > { %v6514_v24 = vpack.c.bf16 %v3088_v63, %v3085_v28  ;;  %v11943_v36 = vpop.permute.xlu1 %7842  ;;  %v6512_v14 = vpack.c.bf16 %v3089_v12, %v3086_v56  ;;  %v5070_v61 = vsel %vm1350_vm0, %v7829_v47, %v7819_v30  ;;  %v6820_v28 = vpack.c.bf16 %v7725_v59, %v7720_v27  ;;  %v5737_v56 = vld [vmem:[%s12147_s5 + $0x80] sm:$0xff]  ;;  %v12962_v12 = vld [vmem:[#allocation58_spill] sm:$0xff] }
 0x3d3   : > { %6811 = vmatpush1.bf16.msra.mxu1 %v6810_v0  ;;  %v7845_v31 = vunpack.i.h.bf16 %v11943_v36  ;;  %v7844_v5 = vunpack.i.l.bf16 %v11943_v36  ;;  %6038 = vmatmul.mubr.msk.f32.vlgmr.msra.gmra.mrb[12].mxu0 %vm1755_vm2, %v11783_v43  ;;  %v6814_v20 = vpack.c.bf16 %v5072_v41, %v5070_v61  ;;  %v7870_v43 = vunpack.i.h.bf16 %v11912_v21 }
 0x3d4   : > { %6813 = vmatprep.subr.bf16.mxu1 %v6812_v1  ;;  %6513 = vmatprep.subr.bf16.mxu0 %v6512_v14  ;;  %v7869_v0 = vunpack.i.l.bf16 %v11912_v21  ;;  %v7880_v44 = vunpack.i.h.bf16 %v11945_v37  ;;  %v7879_v21 = vunpack.i.l.bf16 %v11945_v37  ;;  %v12963_v22 = vunpack.i.l.bf16 %v12962_v12  ;;  %v11990_v14 = vpop.permute.xlu0 %7897 }
 0x3d5   : > { %v5075_v60 = vsel %vm1350_vm0, %v7844_v5, %v7845_v31  ;;  %6515 = vmatpush1.bf16.msra.mxu0 %v6514_v24  ;;  %3239 = vmatprep.mubr.f32.mxu0 %v11859_v55  ;;  %v6824_v1 = vpack.c.bf16 %v7745_v33, %v7740_v7  ;;  %v12965_v7 = vunpack.i.l.bf16 %v12964_v39  ;;  %v6844_v3 = vpack.c.bf16 %v7850_v40, %v7845_v31 }
 0x3d6   : > { %v7853_v6 = vpop.permute.xlu1 %7852  ;;  %v6816_v38 = vpack.c.bf16 %v5077_v52, %v5075_v60  ;;  %6517 = vmatprep.subr.bf16.mxu0 %v6516_v8  ;;  %v3101_v10 = vsel %vm3084_vm14, %v7870_v43, %v12963_v22 }
 0x3d7   : > { %6815 = vmatpush1.bf16.msra.mxu1 %v6814_v20  ;;  %v7855_v30 = vunpack.i.h.bf16 %v7853_v6  ;;  %v7854_v47 = vunpack.i.l.bf16 %v7853_v6  ;;  %v3104_v33 = vsel %vm3084_vm14, %v7879_v21, %v12965_v7  ;;  %v12978_v7 = vld [vmem:[#allocation68_spill] sm:$0xff] }
 0x3d8   : > { %6817 = vmatprep.subr.bf16.mxu1 %v6816_v38 }
 0x3d9   : > { %v5074_v4 = vsel %vm1350_vm0, %v7854_v47, %v7844_v5  ;;  %v5076_v57 = vsel %vm1350_vm0, %v7855_v30, %v7849_v15  ;;  %v12961_v15 = vunpack.i.l.bf16 %v12960_v42  ;;  %v6828_v30 = vpack.c.bf16 %v7765_v2, %v7760_v19  ;;  %v7908_v19 = vpop.permute.xlu0 %7907 }
 0x3da   : > { %v6818_v23 = vpack.c.bf16 %v5076_v57, %v5074_v4  ;;  %v7863_v17 = vpop.permute.xlu1 %7862  ;;  %v12968_v57 = vld [vmem:[#allocation48_spill] sm:$0xff] }
 0x3db   : > { %v7865_v63 = vunpack.i.h.bf16 %v7863_v17  ;;  %v7864_v62 = vunpack.i.l.bf16 %v7863_v17  ;;  %v3098_v50 = vsel %vm3084_vm14, %v7869_v0, %v12961_v15  ;;  %v6832_v15 = vpack.c.bf16 %v7785_v53, %v7780_v13 }
 0x3dc   : > { %6819 = vmatpush1.bf16.msra.mxu1 %v6818_v23  ;;  %v6520_v61 = vpack.c.bf16 %v3101_v10, %v3098_v50  ;;  %v12969_v23 = vunpack.i.l.bf16 %v12968_v57  ;;  %v7910_v10 = vunpack.i.h.bf16 %v7908_v19 }
 0x3dd   : > { %v3091_v27 = vsel %vm3084_vm14, %v7864_v62, %v7859_v35  ;;  %v3094_v59 = vsel %vm3084_vm14, %v7865_v63, %v7860_v51  ;;  %6821 = vmatprep.subr.bf16.mxu1 %v6820_v28  ;;  %v7890_v35 = vunpack.i.h.bf16 %v11961_v49  ;;  %v12966_v51 = vld [vmem:[#allocation28_spill] sm:$0xff] }
 0x3de   : > { %v6518_v41 = vpack.c.bf16 %v3094_v59, %v3091_v27  ;;  %v7873_v24 = vpop.permute.xlu1 %7872  ;;  %v12967_v20 = vunpack.i.l.bf16 %v12966_v51  ;;  %v3110_v17 = vsel %vm3084_vm14, %v7889_v54, %v12969_v23  ;;  %v7909_v27 = vunpack.i.l.bf16 %v7908_v19 }
 0x3df   : > { %v7875_v37 = vunpack.i.h.bf16 %v7873_v24  ;;  %v7874_v5 = vunpack.i.l.bf16 %v7873_v24  ;;  %5739 = vmatmul.mubr.msk.f32.vlgmr.msra.gmra.mrb[2].mxu1 %vm1755_vm2, %v5737_v56 }
 0x3e0   : > { %6519 = vmatpush1.bf16.msra.mxu0 %v6518_v41  ;;  %6823 = vmatpush3.bf16.msra.mxu1 %v6820_v28  ;;  %v3107_v8 = vsel %vm3084_vm14, %v7880_v44, %v12967_v20  ;;  %v12971_v28 = vunpack.i.l.bf16 %v12970_v18  ;;  %v12974_v41 = vld [vmem:[#allocation63_spill] sm:$0xff] }
 0x3e1   : > { %v3097_v60 = vsel %vm3084_vm14, %v7874_v5, %v7869_v0  ;;  %v3100_v52 = vsel %vm3084_vm14, %v7875_v37, %v7870_v43  ;;  %6521 = vmatprep.subr.bf16.mxu0 %v6520_v61  ;;  %6825 = vmatprep.subr.bf16.mxu1 %v6824_v1  ;;  %v6524_v4 = vpack.c.bf16 %v3107_v8, %v3104_v33  ;;  %v7900_v0 = vunpack.i.h.bf16 %v11990_v14  ;;  %v12976_v61 = vld [vmem:[#allocation19_spill] sm:$0xff] }
 0x3e2   : > { %v6522_v6 = vpack.c.bf16 %v3100_v52, %v3097_v60  ;;  %v7883_v38 = vpop.permute.xlu1 %7882  ;;  %5196 = vmatprep.mubr.f32.mxu1 %v11859_v55  ;;  %v7899_v43 = vunpack.i.l.bf16 %v11990_v14  ;;  %v3113_v32 = vsel %vm3084_vm14, %v7890_v35, %v12971_v28  ;;  %v12975_v24 = vunpack.i.l.bf16 %v12974_v41 }
 0x3e3   : > { %v7885_v47 = vunpack.i.h.bf16 %v7883_v38  ;;  %v7884_v49 = vunpack.i.l.bf16 %v7883_v38  ;;  %5740 = vmatmul.mubr.msk.f32.gmra.mrb[4].mxu1 %vm1755_vm2, %v11998_v34  ;;  %v6528_v22 = vpack.c.bf16 %v3113_v32, %v3110_v17  ;;  %v12977_v39 = vunpack.i.l.bf16 %v12976_v61 }
 0x3e4   : > { %6523 = vmatpush1.bf16.msra.mxu0 %v6522_v6  ;;  %6827 = vmatpush3.bf16.msra.mxu1 %v6824_v1  ;;  %v6836_v1 = vpack.c.bf16 %v7805_v26, %v7800_v58  ;;  %v6840_v26 = vpack.c.bf16 %v7825_v9, %v7820_v46  ;;  %v8010_v46 = vld [vmem:[%s12147_s5 + $0x30] sm:$0xff] }
 0x3e5   : > { %v3103_v2 = vsel %vm3084_vm14, %v7884_v49, %v7879_v21  ;;  %v3106_v63 = vsel %vm3084_vm14, %v7885_v47, %v7880_v44  ;;  %6525 = vmatprep.subr.bf16.mxu0 %v6524_v4  ;;  %6829 = vmatprep.subr.bf16.mxu1 %v6828_v30  ;;  %v12972_v21 = vld [vmem:[#allocation50_spill] sm:$0xff] }
 0x3e6   : > { %v6526_v62 = vpack.c.bf16 %v3106_v63, %v3103_v2  ;;  %v7893_v42 = vpop.permute.xlu1 %7892  ;;  %6223 = vmatprep.mubr.msk.f32.mxu1 %vm1755_vm2, %v5737_v56  ;;  %v12973_v44 = vunpack.i.l.bf16 %v12972_v21  ;;  %v3119_v56 = vsel %vm3084_vm14, %v7900_v0, %v12975_v24  ;;  %v5298_v24 = vld [vmem:[%s12148_s6] sm:$0x3f] }
 0x3e7   : > { %v7895_v50 = vunpack.i.h.bf16 %v7893_v42  ;;  %v7894_v12 = vunpack.i.l.bf16 %v7893_v42 }
 0x3e8   : > { %6527 = vmatpush1.bf16.msra.mxu0 %v6526_v62  ;;  %6831 = vmatpush3.bf16.msra.mxu1 %v6828_v30  ;;  %v3116_v59 = vsel %vm3084_vm14, %v7899_v43, %v12973_v44 }
 0x3e9   : > { %v3109_v11 = vsel %vm3084_vm14, %v7894_v12, %v7889_v54  ;;  %v3112_v45 = vsel %vm3084_vm14, %v7895_v50, %v7890_v35  ;;  %6529 = vmatprep.subr.bf16.mxu0 %v6528_v22  ;;  %6833 = vmatprep.subr.bf16.mxu1 %v6832_v15  ;;  %v6532_v5 = vpack.c.bf16 %v3119_v56, %v3116_v59  ;;  %v12979_v35 = vunpack.i.l.bf16 %v12978_v7  ;;  %v5378_v56 = vld [vmem:[%s12150_s8] sm:$0xff] }
 0x3ea   : > { %v6530_v13 = vpack.c.bf16 %v3112_v45, %v3109_v11  ;;  %v7903_v53 = vpop.permute.xlu1 %7902  ;;  %v3122_v54 = vsel %vm3084_vm14, %v7909_v27, %v12977_v39  ;;  %v8037_v22 = vmov 0.0|0.0  }
 0x3eb   : > { %v7905_v14 = vunpack.i.h.bf16 %v7903_v53  ;;  %v7904_v37 = vunpack.i.l.bf16 %v7903_v53  ;;  %v3125_v33 = vsel %vm3084_vm14, %v7910_v10, %v12979_v35 }
 0x3ec   : > { %6531 = vmatpush1.bf16.msra.mxu0 %v6530_v13  ;;  %6835 = vmatpush3.bf16.msra.mxu1 %v6832_v15  ;;  %v6536_v60 = vpack.c.bf16 %v3125_v33, %v3122_v54 }
 0x3ed   : > { %v3115_v51 = vsel %vm3084_vm14, %v7904_v37, %v7899_v43  ;;  %v3118_v16 = vsel %vm3084_vm14, %v7905_v14, %v7900_v0  ;;  %6533 = vmatprep.subr.bf16.mxu0 %v6532_v5  ;;  %6837 = vmatprep.subr.bf16.mxu1 %v6836_v1  ;;  %v5484_v14 = vld [vmem:[%s12152_s10] sm:$0xff]  ;;  %v5381_v37 = vld [vmem:[%s12151_s9 + $0x8] sm:$0xf] }
 0x3ee   : > { %v6534_v48 = vpack.c.bf16 %v3118_v16, %v3115_v51  ;;  %v7913_v58 = vpop.permute.xlu1 %7912  ;;  %v5380_v5 = vld [vmem:[%s12151_s9] sm:$0xff] }
 0x3ef   : > { %v7915_v20 = vunpack.i.h.bf16 %v7913_v58  ;;  %v7914_v8 = vunpack.i.l.bf16 %v7913_v58 }
 0x3f0   : > { %6535 = vmatpush1.bf16.msra.mxu0 %v6534_v48  ;;  %6839 = vmatpush3.bf16.msra.mxu1 %v6836_v1  ;;  %v5379_v1 = vld [vmem:[%s12150_s8 + $0x8] sm:$0xf] }
 0x3f1   : > { %v3121_v52 = vsel %vm3084_vm14, %v7914_v8, %v7909_v27  ;;  %v3124_v6 = vsel %vm3084_vm14, %v7915_v20, %v7910_v10  ;;  %6537 = vmatprep.subr.bf16.mxu0 %v6536_v60  ;;  %6841 = vmatprep.subr.bf16.mxu1 %v6840_v26 }
 0x3f2   : > { %v6538_v38 = vpack.c.bf16 %v3124_v6, %v3121_v52 }
 0x3f4   : > { %6539 = vmatpush1.bf16.msra.mxu0 %v6538_v38  ;;  %6843 = vmatpush3.bf16.msra.mxu1 %v6840_v26 }
 0x3f5   : > { %6845 = vmatprep.subr.bf16.mxu1 %v6844_v3  ;;  %6848 = vmatprep.subr.bf16.mxu0 %v8037_v22 }
 0x3f7   : > { %5704 = vmatmul.mubr.msk.f32.vlgmr.msra.gmra.mrb[8].mxu0 %vm1755_vm2, %v8010_v46 }
 0x3f8   : > { %6847 = vmatpush3.bf16.msra.mxu1 %v6844_v3  ;;  %3245 = vmatprep.mubr.f32.mxu0 %v11859_v55  ;;  %v5485_v3 = vld [vmem:[%s12152_s10 + $0x8] sm:$0xf] }
 0x3fb   : > { %5705 = vmatmul.mubr.msk.f32.gmra.mrb[10].mxu0 %vm1755_vm2, %v8011_v25  ;;  %6224 = vmatmul.mubr.msk.f32.vlgmr.msra.gmra.mrb[0].mxu1 %vm1755_vm2, %v11998_v34 }
 0x3fc   : > { %6230 = vmatprep.mubr.msk.f32.mxu0 %vm8038_vm9, %v11859_v55  ;;  %v5299_v55 = vld [vmem:[%s12149_s7] sm:$0x3f] }
 0x4a6   : > { %v6039_v29 = vpop.f32.mrb[12].mxu0 }
 0x4a7   : > { %v2814_v9 = vpop.f32.mrb[13].mxu0 }
 0x4b2   : > { %v5192_v40 = vpop.f32.mrb[2].mxu1 }
 0x4b3   : > { %v5194_v36 = vpop.f32.mrb[3].mxu1 }
 0x4b6   : > { %v5198_v31 = vpop.f32.mrb[4].mxu1 }
 0x4b7   : > { %v5200_v30 = vpop.f32.mrb[5].mxu1 }
 0x4ca   : > { %v3241_v47 = vpop.f32.mrb[8].mxu0 }
 0x4cb   : > { %v12071_v49 = vadd.f32 %v5192_v40, %v3241_v47  ;;  %v3243_v4 = vpop.f32.mrb[9].mxu0 }
 0x4cc   : > { %v12073_v0 = vadd.f32 %v5194_v36, %v3243_v4 }
 0x4ce   : > { %v3247_v43 = vpop.f32.mrb[10].mxu0  ;;  %v6225_v57 = vpop.f32.mrb[0].mxu1  ;;  %v5284_v19 = vadd.f32 %v12073_v0, %v12071_v49 }
 0x4cf   : > { %v12075_v23 = vadd.f32 %v5198_v31, %v3247_v43  ;;  %v12077_v17 = vadd.f32 %v6225_v57, %v6039_v29  ;;  %v3249_v18 = vpop.f32.mrb[11].mxu0  ;;  %v5269_v34 = vpop.f32.mrb[1].mxu1  ;;  %v5577_v57 = vld [vmem:[#allocation2 + $0x30] sm:$0xf] }
 0x4d0   : > { %v12079_v28 = vadd.f32 %v5200_v30, %v3249_v18  ;;  %v12081_v32 = vadd.f32 %v5269_v34, %v2814_v9  ;;  %v5578_v18 = vld [vmem:[#allocation2 + $0x38] sm:$0xf]  ;;  %v5579_v34 = vld [vmem:[#allocation2 + $0x40] sm:$0xf] }
 0x4d1   : > { %v5289_v2 = vsel %vm506_vm1, %v12075_v23, 0.0  ;;  %v5292_v50 = vsel %vm684_vm5, %v12077_v17, 0.0 }
 0x4d2   : > { %v5290_v63 = vsel %vm506_vm1, %v12079_v28, 0.0  ;;  %v5285_v62 = vsel %vm678_vm4, %v12081_v32, 0.0  ;;  %vm5300_vm1 = vcmask 97280  }
 0x4d3   : > { %v5291_v42 = vadd.f32 %v5290_v63, %v5289_v2  ;;  %v5286_v15 = vadd.f32 %v5285_v62, %v5284_v19 }
 0x4d5   : > { %5287 = vadd.xlane.f32.xlu0 %v5286_v15  ;;  %v5293_v12 = vadd.f32 %v5292_v50, %v5291_v42  ;;  %v5575_v15 = vld [vmem:[#allocation2 + $0x10] sm:$0xff] }
 0x4d7   : > { %5294 = vadd.xlane.f32.xlu1 %v5293_v12 }
 0x562   : > { %v5288_v10 = vpop.xlane.xlu0 %5287 }
 0x563   : > { %v5296_v21 = vmul.f32 0.003125, %v5288_v10 }
 0x564   : > { %v5295_v27 = vpop.xlane.xlu1 %5294 }
 0x565   : > { %v5297_v44 = vmul.f32 0.003125, %v5295_v27 }
 0x567   : > { %v6849_v59 = vpack.c.bf16 %v5297_v44, %v5296_v21 }
 0x569   : > { %6851 = vmatpush3.bf16.msk.msra.mxu0 %vm8323_vm3, %v6849_v59 }
 0x56c   : > { %6231 = vmatmul.mubr.msk.f32.vlgmr.msra.gmra.mrb[14].mxu0 %vm5300_vm1, %v5298_v24 }
 0x56d   : > { %6235 = vmatprep.mubr.msk.f32.mxu0 %vm5382_vm10, %v5378_v56 }
 0x63f   : > { %v5373_v11 = vpop.f32.mrb[14].mxu0 }
 0x640   : > { %v5374_v45 = vadd.f32 %v5373_v11, %v5299_v55  ;;  %v6232_v13 = vpop.f32.mrb[15].mxu0 }
 0x642   : > { %v5377_v53 = vmax.f32 %v5374_v45, 0.0 }
 0x644   : > { %6233 = vmatprep.subr.msk.mxu0 %vm5389_vm11, %v5377_v53 }
 0x645   : > { %6234 = vmatpush3.msk.msra.mxu0 %vm5389_vm11, %v5377_v53 }
 0x646   : > { %6236 = vmatmul.mubr.msk.f32.vlgmr.msra.gmra.mrb[16].mxu0 %vm5382_vm10, %v5379_v1 }
 0x647   : > { %6242 = vmatprep.mubr.msk.f32.mxu0 %vm5300_vm1, %v5484_v14 }
 0x719   : > { %v6237_v61 = vpop.f32.mrb[16].mxu0 }
 0x71a   : > { %v5465_v39 = vadd.f32 %v6237_v61, %v5381_v37  ;;  %v5459_v54 = vpop.f32.mrb[17].mxu0 }
 0x71b   : > { %v5460_v7 = vadd.f32 %v5459_v54, %v5380_v5 }
 0x71c   : > { %v5749_v35 = vmul.f32 -1.442695, %v5465_v39 }
 0x71d   : > { %v5748_v33 = vmul.f32 -1.442695, %v5460_v7 }
 0x71e   : > { %7917 = vpow2.f32 %v5749_v35 }
 0x71f   : > { %7919 = vpow2.f32 %v5748_v33 }
 0x728   : > { %v7918_v51 = vpop.eup %7917 }
 0x729   : > { %v7920_v16 = vpop.eup %7919  ;;  %v5475_v48 = vadd.f32 1.0, %v7918_v51 }
 0x72a   : > { %v5474_v58 = vadd.f32 1.0, %v7920_v16 }
 0x72b   : > { %7921 = vrcp.f32 %v5475_v48 }
 0x72c   : > { %7923 = vrcp.f32 %v5474_v58 }
 0x735   : > { %v7922_v26 = vpop.eup %7921 }
 0x736   : > { %v7924_v20 = vpop.eup %7923  ;;  %v5482_v8 = vmul.f32 1.442695, %v7922_v26 }
 0x737   : > { %v5480_v60 = vmul.f32 1.442695, %v7924_v20 }
 0x738   : > { %7925 = vpow2.f32 %v5482_v8 }
 0x739   : > { %7927 = vpow2.f32 %v5480_v60 }
 0x742   : > { %v7926_v52 = vpop.eup %7925 }
 0x743   : > { %v7928_v6 = vpop.eup %7927 }
 0x744   : > { %v6852_v38 = vpack.c.bf16 %v7926_v52, %v7928_v6 }
 0x746   : > { %6854 = vmatprep.subr.msk.bf16.mxu0 %vm8323_vm3, %v6852_v38 }
 0x747   : > { %6857 = vmatpush3.bf16.msk.msra.mxu0 %vm8323_vm3, %v6852_v38 }
 0x74a   : > { %6243 = vmatmul.mubr.msk.f32.vlgmr.msra.gmra.mrb[18].mxu0 %vm5300_vm1, %v5485_v3 }
 0x81d   : > { %v6244_v46 = vpop.f32.mrb[18].mxu0 }
 0x81e   : > { %7929 = vrcp.f32 %v6244_v46  ;;  %v5561_v25 = vpop.f32.mrb[19].mxu0 }
 0x81f   : > { %7931 = vrcp.f32 %v5561_v25 }
 0x828   : > { %v7930_v29 = vpop.eup %7929 }
 0x829   : > { %v7932_v9 = vpop.eup %7931  ;;  %v5573_v40 = vmul.f32 %v7930_v29, %v7926_v52 }
 0x82a   : > { %v5572_v36 = vmul.f32 %v7932_v9, %v7928_v6 }
 0x82b   : > { %5587 = vperm.xlu1 %7916, %v5573_v40  }
 0x82c   : > { %5582 = vperm.xlu0 %6935, %v5572_v36  }
 0x8aa   : > { %v5588_v31 = vpop.permute.xlu1 %5587 }
 0x8ab   : > { %v5593_v30 = vmul.f32 %v12075_v23, %v5588_v31  ;;  %v5594_v47 = vmul.f32 %v12079_v28, %v5588_v31  ;;  %v5595_v4 = vmul.f32 %v12077_v17, %v5588_v31  ;;  %v5583_v43 = vpop.permute.xlu0 %5582  ;;  %v5574_v28 = vld [vmem:[#allocation2 + $0x8] sm:$0xff]  ;;  %v5576_v17 = vld [vmem:[#allocation2 + $0x18] sm:$0xff] }
 0x8ac   : > { %v5590_v19 = vmul.f32 %v12071_v49, %v5583_v43  ;;  %v5591_v2 = vmul.f32 %v12073_v0, %v5583_v43  ;;  %v5592_v63 = vmul.f32 %v12081_v32, %v5583_v43 }
 0x8ad   : > { %v5599_v62 = vadd.f32 %v5593_v30, %v5577_v57  ;;  %v5600_v23 = vadd.f32 %v5594_v47, %v5578_v18  ;;  %v5601_v42 = vadd.f32 %v5595_v4, %v5579_v34 }
 0x8ae   : > { %v5596_v50 = vadd.f32 %v5590_v19, %v5574_v28  ;;  %v5597_v12 = vadd.f32 %v5591_v2, %v5575_v15  ;;  %v5598_v22 = vadd.f32 %v5592_v63, %v5576_v17 }
 0x8af   : > { %5605 = vst [vmem:[%s386_s14 + $0x18] sm:$0xf] %v5599_v62  ;;  %5606 = vst [vmem:[%s386_s14 + $0x20] sm:$0xf] %v5600_v23 }
 0x8b0   : > { %5607 = vst.msk [vmem:[%s386_s14 + $0x28] sm:$0xf] %vm684_vm5, %v5601_v42  ;;  %5602 = vst [vmem:[%s386_s14] sm:$0xff] %v5596_v50 }
 0x8b1   : > { %5603 = vst [vmem:[%s386_s14 + $0x8] sm:$0xff] %v5597_v12  ;;  %5604 = vst.msk [vmem:[%s386_s14 + $0x10] sm:$0xff] %vm678_vm4, %v5598_v22 }
 0x8b2 PF: > { %s21_s17 = sadd.s32 1, %s8018_s17  }
 0x8b3   : > { %p18_p4 = scmp.ge.s32.totalorder %s21_s17, 4  }
 0x8b5   :  { %20 = sbr.rel (!%p18_p4) target bundleno = 1 (0x1), region = 116 }

</bundles_post_ra>
